<compile_context>
chip_gen: v6e
topology: v6e:2x2x1
jax: 0.10.0
libtpu: 0.0.40
codegen_flags: <defaults>
</compile_context>

<pallas_src>
import functools
import math

import jax
import jax.numpy as jnp
from jax import lax
from jax.experimental import pallas as pl
from jax.experimental.pallas import tpu as pltpu


# ----------------------------------------------------------------------------
# tiling helpers
# ----------------------------------------------------------------------------
def _pick_pixel_tile(nrows, ncols, target_px, align):
    """Largest tile d*ncols (d | nrows) that is %align and <= target_px.
    Falls back to the smallest aligned tile, then to the full extent."""
    aligned = [d * ncols for d in range(1, nrows + 1)
               if nrows % d == 0 and (d * ncols) % align == 0]
    under = [p for p in aligned if p <= target_px]
    if under:
        return max(under)
    if aligned:
        return min(aligned)
    return nrows * ncols


def _pick_row_tile(nrows, ncols, target_px):
    """Largest row count d | nrows with d*ncols <= target_px (>= 1)."""
    best = 1
    for d in range(1, nrows + 1):
        if nrows % d == 0 and d * ncols <= target_px:
            best = d
    return best


# ----------------------------------------------------------------------------
# Kernel 1: conv1 = 3x3 stride-2 pad-1 conv (Cin=3) + bias + ReLU, done as a
# single K=27 matmul on an XLA-built 27-channel im2col (tiny: input is 3ch).
# Grid = (B, pixel tiles); both axes parallel.
# ----------------------------------------------------------------------------
def _conv1_kernel(im_ref, w_ref, b_ref, o_ref):
    y = jnp.dot(im_ref[0], w_ref[...], preferred_element_type=jnp.float32)
    y = jnp.maximum(y + b_ref[...], 0.0)
    o_ref[0] = y.astype(o_ref.dtype)


def conv1_3x3s2(x_nhwc, w27, bias):
    """x (B,H,W,3) -> flat (B, (H/2)*(W/2), 32) bf16.  w27: (27, 32) with row
    order (tap kh*3+kw, cin) matching the im2col concat below."""
    B, H, W, C = x_nhwc.shape
    Ho, Wo = H // 2, W // 2
    Cout = w27.shape[-1]
    xp = jnp.pad(x_nhwc.astype(jnp.bfloat16), ((0, 0), (1, 1), (1, 1), (0, 0)))
    taps = [xp[:, kh:kh + H:2, kw:kw + W:2, :]
            for kh in range(3) for kw in range(3)]
    im = jnp.concatenate(taps, axis=-1).reshape(B, Ho * Wo, 9 * C)

    hw = Ho * Wo
    tp = _pick_pixel_tile(Ho, Wo, 4096, 8)
    return pl.pallas_call(
        _conv1_kernel,
        out_shape=jax.ShapeDtypeStruct((B, hw, Cout), jnp.bfloat16),
        grid_spec=pltpu.PrefetchScalarGridSpec(
            num_scalar_prefetch=0,
            grid=(B, hw // tp),
            in_specs=[pl.BlockSpec((1, tp, 9 * C), lambda b, t: (b, t, 0)),
                      pl.BlockSpec((9 * C, Cout), lambda b, t: (0, 0)),
                      pl.BlockSpec((1, Cout), lambda b, t: (0, 0))],
            out_specs=pl.BlockSpec((1, tp, Cout), lambda b, t: (b, t, 0)),
        ),
        compiler_params=pltpu.CompilerParams(
            dimension_semantics=("parallel", "parallel")),
    )(im, w27.astype(jnp.bfloat16), bias.reshape(1, Cout).astype(jnp.float32))


# ----------------------------------------------------------------------------
# Kernel 2: conv2 (3x3/s2) + HybridEncoder 1x1 + ROI-average pooling + iEFL
# heads, fused.  f1 is pre-split (one fused XLA pass) into even/odd padded
# columns so all in-kernel column accesses are contiguous; rows are accessed
# pointwise, with the single halo row supplied by an extra 1-row BlockSpec.
# ROI masks are generated in-kernel from SMEM-prefetched integer bbox bounds.
# Grid = (B, row tiles); the row axis carries the pooled accumulator
# ("arbitrary"), B is "parallel".
# ----------------------------------------------------------------------------
def _conv2_enc_pool_kernel(bounds_ref, invc_ref,
                           ce_ref, ceh_ref, co_ref, coh_ref,
                           w2_ref, b2_ref, ew_ref, eb_ref, iw_ref, ib_ref,
                           fi_ref, ex_ref, acc_ref, *, TH, WO, E):
    b = pl.program_id(0)
    j = pl.program_id(1)
    nj = pl.num_programs(1)

    @pl.when(j == 0)
    def _():
        acc_ref[...] = jnp.zeros_like(acc_ref)

    col = lax.broadcasted_iota(jnp.int32, (1, WO), 1)

    def exemplar_mask(row_g):
        rows = []
        for e in range(E):
            y1 = bounds_ref[b, 4 * e + 0]
            y2 = bounds_ref[b, 4 * e + 1]
            x1 = bounds_ref[b, 4 * e + 2]
            x2 = bounds_ref[b, 4 * e + 3]
            in_row = jnp.logical_and(row_g >= y1, row_g <= y2)
            m = jnp.logical_and(jnp.logical_and(col >= x1, col <= x2), in_row)
            rows.append(m.astype(jnp.bfloat16))
        return jnp.concatenate(rows, axis=0)                      # (E, WO)

    def compute_row(ho, row_pairs):
        # row_pairs: 3 (even-col, odd-col) padded-f1 rows, each (WO+1, 32) bf16
        acc = jnp.zeros((WO, w2_ref.shape[-1]), jnp.float32)
        for kh in range(3):
            re, ro = row_pairs[kh]
            taps = (re[0:WO, :], ro[0:WO, :], re[1:WO + 1, :])    # kw = 0,1,2
            for kw in range(3):
                acc = acc + jnp.dot(taps[kw], w2_ref[kh * 3 + kw],
                                    preferred_element_type=jnp.float32)
        h = jnp.maximum(acc + b2_ref[...], 0.0).astype(jnp.bfloat16)   # (WO,64)
        fr = jnp.dot(h, ew_ref[...], preferred_element_type=jnp.float32)
        fr = jnp.maximum(fr + eb_ref[...], 0.0).astype(jnp.bfloat16)   # (WO,256)
        fi_ref[0, ho] = fr
        acc_ref[...] += jnp.dot(exemplar_mask(j * TH + ho), fr,
                                preferred_element_type=jnp.float32)

    def body(ho, carry):
        pairs = tuple((ce_ref[0, 2 * ho + kh], co_ref[0, 2 * ho + kh])
                      for kh in range(3))
        compute_row(ho, pairs)
        return carry

    lax.fori_loop(0, TH - 1, body, 0)
    # last output row of the tile: its kh=2 tap row lives in the 1-row halo.
    last = ((ce_ref[0, 2 * TH - 2], co_ref[0, 2 * TH - 2]),
            (ce_ref[0, 2 * TH - 1], co_ref[0, 2 * TH - 1]),
            (ceh_ref[0, 0], coh_ref[0, 0]))
    compute_row(TH - 1, last)

    @pl.when(j == nj - 1)
    def _():
        inv = jnp.concatenate(
            [jnp.full((1, 1), invc_ref[b, e], jnp.float32) for e in range(E)],
            axis=0)                                                # (E, 1) f32
        pooled = (acc_ref[...] * inv).astype(jnp.bfloat16)         # (E, 256)
        ex = jnp.dot(pooled, iw_ref[...], preferred_element_type=jnp.float32)
        ex_ref[0] = jnp.maximum(ex + ib_ref[...], 0.0).astype(ex_ref.dtype)


def conv2_enc_pool(f1, bounds, inv_cnt, w2, b2, enc_w, enc_b, iefl_w, iefl_b):
    """f1 (B, Ho1, Wo1, 32) bf16 -> Fi (B, Ho1/2, Wo1/2, 256) bf16 and fused
    iEFL exemplar features (B, E, 768) bf16."""
    B, Ho1, Wo1, C1 = f1.shape
    Ho, Wo = Ho1 // 2, Wo1 // 2
    E = bounds.shape[1]
    C2 = w2.shape[-1]
    Ce = enc_w.shape[-1]
    Ni = iefl_w.shape[-1]

    # one fused XLA pass over f1: pad + even/odd padded-column split
    f1p = jnp.pad(f1, ((0, 0), (1, 1), (1, 1), (0, 0)))
    ce = f1p[:, :, 0::2, :]                    # (B, Ho1+2, Wo+1, 32)
    co = f1p[:, :, 1::2, :]                    # (B, Ho1+2, Wo+1, 32)
    We = Wo + 1

    th = _pick_row_tile(Ho, Wo, 2048)
    nj = Ho // th

    main = pl.BlockSpec((1, 2 * th, We, C1), lambda b, j, *_: (b, j, 0, 0))
    halo = pl.BlockSpec((1, 1, We, C1),
                        lambda b, j, *_: (b, 2 * th * (j + 1), 0, 0))
    c2 = lambda shape: pl.BlockSpec(shape, lambda b, j, *_: (0, 0))
    c3 = lambda shape: pl.BlockSpec(shape, lambda b, j, *_: (0, 0, 0))

    return pl.pallas_call(
        functools.partial(_conv2_enc_pool_kernel, TH=th, WO=Wo, E=E),
        out_shape=(jax.ShapeDtypeStruct((B, Ho, Wo, Ce), jnp.bfloat16),
                   jax.ShapeDtypeStruct((B, E, Ni), jnp.bfloat16)),
        grid_spec=pltpu.PrefetchScalarGridSpec(
            num_scalar_prefetch=2,
            grid=(B, nj),
            in_specs=[main, halo, main, halo,
                      c3((9, C1, C2)), c2((1, C2)),
                      c2((C2, Ce)), c2((1, Ce)),
                      c2((Ce, Ni)), c2((1, Ni))],
            out_specs=(pl.BlockSpec((1, th, Wo, Ce),
                                    lambda b, j, *_: (b, j, 0, 0)),
                       pl.BlockSpec((1, E, Ni), lambda b, j, *_: (b, 0, 0))),
            scratch_shapes=[pltpu.VMEM((E, Ce), jnp.float32)],
        ),
        compiler_params=pltpu.CompilerParams(
            dimension_semantics=("parallel", "arbitrary")),
    )(bounds.reshape(B, E * 4), inv_cnt,
      ce, ce, co, co,
      w2.astype(jnp.bfloat16), b2.reshape(1, C2).astype(jnp.float32),
      enc_w.astype(jnp.bfloat16), enc_b.reshape(1, Ce).astype(jnp.float32),
      iefl_w.astype(jnp.bfloat16), iefl_b.reshape(1, Ni).astype(jnp.float32))


# ----------------------------------------------------------------------------
# Kernel 3: ExemplarImageMatching + DensityRegressionDecoder for all 3 levels.
# Correlation as ex @ Fi^T on the MXU; block-diagonal first decoder layer so
# all intermediates and the density output keep pixels in the lane dimension.
# Grid = (B, pixel tiles); both axes parallel (v7x dual-TC friendly).
# ----------------------------------------------------------------------------
def _match_decode_kernel(fi_ref, ex_ref, w1_ref, b1_ref, w2_ref, b2_ref, o_ref,
                         *, num_levels, hdim, scale):
    fi_t = fi_ref[0]                                     # (tm, C)   bf16
    ex = ex_ref[0]                                       # (L*E, C)  bf16
    resp_t = lax.dot_general(ex, fi_t, (((1,), (1,)), ((), ())),
                             preferred_element_type=jnp.float32) * scale
    h_t = jnp.dot(w1_ref[...], resp_t, preferred_element_type=jnp.float32)
    h_t = jnp.maximum(h_t + b1_ref[...], 0.0)            # (L*hdim, tm)
    g = h_t * w2_ref[...]
    for i in range(num_levels):
        d = jnp.sum(g[i * hdim:(i + 1) * hdim, :], axis=0, keepdims=True)
        d = jnp.maximum(d + b2_ref[i], 0.0)              # (1, tm)
        o_ref[0, i:i + 1, :] = d.astype(o_ref.dtype)


def match_decode(fi, ex_all, w1t, b1, w2, b2, *, tm):
    """fi (B, HW, C) bf16; ex_all (B, L*E, C) bf16 -> densities (B, L, HW) f32."""
    B, HW, C = fi.shape
    LE = ex_all.shape[1]
    L = b2.shape[0]
    hdim = w1t.shape[0] // L
    scale = 1.0 / math.sqrt(C)
    return pl.pallas_call(
        functools.partial(_match_decode_kernel, num_levels=L, hdim=hdim,
                          scale=scale),
        out_shape=jax.ShapeDtypeStruct((B, L, HW), jnp.float32),
        grid_spec=pltpu.PrefetchScalarGridSpec(
            num_scalar_prefetch=0,
            grid=(B, HW // tm),
            in_specs=[
                pl.BlockSpec((1, tm, C), lambda b, m: (b, m, 0)),
                pl.BlockSpec((1, LE, C), lambda b, m: (b, 0, 0)),
                pl.BlockSpec(w1t.shape, lambda b, m: (0, 0)),
                pl.BlockSpec(b1.shape, lambda b, m: (0, 0)),
                pl.BlockSpec(w2.shape, lambda b, m: (0, 0)),
                pl.BlockSpec(b2.shape, lambda b, m: (0, 0, 0)),
            ],
            out_specs=pl.BlockSpec((1, L, tm), lambda b, m: (b, 0, m)),
        ),
        compiler_params=pltpu.CompilerParams(
            dimension_semantics=("parallel", "parallel")),
    )(fi, ex_all, w1t, b1, w2, b2)


# ----------------------------------------------------------------------------
# Glue (JAX): bbox bounds, parameters, forward pass
# ----------------------------------------------------------------------------
def roi_bounds(bboxes, Hf, Wf, stride):
    """Integer pixel-center inclusion bounds on the feature grid + 1/count.
    TODO(synk): ROIAlign-style bilinear sampling not implemented."""
    x1 = bboxes[..., 0] / stride
    y1 = bboxes[..., 1] / stride
    x2 = bboxes[..., 2] / stride
    y2 = bboxes[..., 3] / stride
    y1i = jnp.ceil(y1 - 0.5).astype(jnp.int32)
    y2i = jnp.floor(y2 - 0.5).astype(jnp.int32)
    x1i = jnp.ceil(x1 - 0.5).astype(jnp.int32)
    x2i = jnp.floor(x2 - 0.5).astype(jnp.int32)
    ny = jnp.clip(jnp.minimum(y2i, Hf - 1) - jnp.maximum(y1i, 0) + 1, 0, Hf)
    nx = jnp.clip(jnp.minimum(x2i, Wf - 1) - jnp.maximum(x1i, 0) + 1, 0, Wf)
    cnt = (ny * nx).astype(jnp.float32)
    inv = 1.0 / jnp.maximum(cnt, 1.0)                    # (B, E) f32
    bounds = jnp.stack([y1i, y2i, x1i, x2i], axis=-1)    # (B, E, 4) int32
    return bounds, inv


def init_params(key):
    ks = jax.random.split(key, 8)
    p = {}
    # FeatureExtractor conv1: 3 -> 32, 3x3/s2; rows ordered (tap kh*3+kw, cin)
    p["bb1_w"] = 0.05 * jax.random.normal(ks[0], (27, 32), jnp.float32)
    p["bb1_b"] = jnp.zeros((32,), jnp.float32)
    # conv2: 32 -> 64, 3x3/s2, tap-indexed (kh*3+kw, cin, cout)
    p["bb2_w"] = 0.05 * jax.random.normal(ks[1], (9, 32, 64), jnp.float32)
    p["bb2_b"] = jnp.zeros((64,), jnp.float32)
    # HybridEncoder: 1x1 conv 64 -> 256
    p["enc_w"] = 0.05 * jax.random.normal(ks[2], (64, 256), jnp.float32)
    p["enc_b"] = jnp.zeros((256,), jnp.float32)
    # iEFL: three 256->256 heads fused into one (256, 768) matmul
    p["iefl_w"] = 0.05 * jax.random.normal(ks[3], (256, 3 * 256), jnp.float32)
    p["iefl_b"] = jnp.zeros((3 * 256,), jnp.float32)
    # Density decoders (E -> 16 -> 1 per level), packed for the fused kernel:
    # block-diagonal transposed first layer (L*16, L*E), column biases/weights.
    L, E, DH = 3, 3, 16
    w1 = 0.2 * jax.random.normal(ks[4], (L, E, DH), jnp.float32)
    w2 = 0.2 * jax.random.normal(ks[5], (L, DH), jnp.float32)
    w1t = jnp.zeros((L * DH, L * E), jnp.float32)
    for i in range(L):
        w1t = w1t.at[i * DH:(i + 1) * DH, i * E:(i + 1) * E].set(w1[i].T)
    p["dec_w1T"] = w1t
    p["dec_b1"] = jnp.zeros((L * DH, 1), jnp.float32)
    p["dec_w2"] = w2.reshape(L * DH, 1)
    p["dec_b2"] = jnp.zeros((L, 1, 1), jnp.float32)
    return p


def fsc_forward(params, image_nchw, bboxes, num_exemplars=3):
    """Returns a list of 3 density maps, each (B, 1, Hf, Wf) in NCHW."""
    B, _, H, W = image_nchw.shape
    assert H % 4 == 0 and W % 4 == 0  # TODO(synk): other spatial sizes unsupported
    x = jnp.transpose(image_nchw, (0, 2, 3, 1))                    # NCHW -> NHWC

    # K1: backbone conv1
    f1 = conv1_3x3s2(x, params["bb1_w"], params["bb1_b"])
    Ho1, Wo1 = H // 2, W // 2
    f1 = f1.reshape(B, Ho1, Wo1, f1.shape[-1])                     # (B,H/2,W/2,32)

    Hf, Wf = H // 4, W // 4
    bounds, inv_cnt = roi_bounds(bboxes, Hf, Wf, stride=H // Hf)
    E = bounds.shape[1]
    assert E == num_exemplars

    # dropout(0.1): identity in inference mode.
    # TODO(synk): training-mode dropout (pltpu.prng_random_bits mask) not implemented.

    # K2: conv2 + HybridEncoder + ROI pooling + iEFL heads (fused)
    fi_map, ex = conv2_enc_pool(f1, bounds, inv_cnt,
                                params["bb2_w"], params["bb2_b"],
                                params["enc_w"], params["enc_b"],
                                params["iefl_w"], params["iefl_b"])
    C = fi_map.shape[-1]
    L = 3
    ex_all = (ex.reshape(B, E, L, C).transpose(0, 2, 1, 3)
                .reshape(B, L * E, C))                             # (B, L*E, 256) bf16

    # K3: matching + density decoding for all 3 levels
    HW = Hf * Wf
    fi = fi_map.reshape(B, HW, C)                                  # free reshape, no pad
    tm = _pick_pixel_tile(Hf, Wf, 2048, 128)
    dens = match_decode(fi, ex_all, params["dec_w1T"], params["dec_b1"],
                        params["dec_w2"], params["dec_b2"], tm=tm) # (B, L, HW)
    dens = dens.reshape(B, L, Hf, Wf)
    return [dens[:, i:i + 1] for i in range(L)]                    # 3x (B,1,Hf,Wf)


if __name__ == "__main__":
    key = jax.random.PRNGKey(0)
    k_img, k_par = jax.random.split(key)

    B, Cin, H, W = 2, 3, 32, 32
    num_exemplars = 3
    image = jax.random.normal(k_img, (B, Cin, H, W), jnp.float32)  # NCHW like PyTorch
    # bboxes in pixel coords [x1, y1, x2, y2], (B, num_exemplars, 4)
    bboxes = jnp.array(
        [[[2.0, 2.0, 12.0, 12.0], [8.0, 8.0, 20.0, 20.0], [16.0, 4.0, 30.0, 18.0]],
         [[0.0, 0.0, 10.0, 10.0], [12.0, 12.0, 28.0, 28.0], [4.0, 16.0, 18.0, 30.0]]],
        dtype=jnp.float32)

    params = init_params(k_par)
    fwd = jax.jit(functools.partial(fsc_forward, num_exemplars=num_exemplars))
    outs = fwd(params, image, bboxes)
    outs = [jax.block_until_ready(o) for o in outs]

    assert len(outs) == 3
    for o in outs:
        assert o.shape == (B, 1, H // 4, W // 4), o.shape
        assert jnp.all(jnp.isfinite(o))
    print("KERNEL_OK")
</pallas_src>

<mosaic_0001>
module attributes {stable_mosaic.version = 11 : i64} {
  func.func @_conv1_kernel(%arg0: i32, %arg1: i32, %arg2: memref<1x256x27xbf16, #tpu.memory_space<vmem>>, %arg3: memref<27x32xbf16, #tpu.memory_space<vmem>>, %arg4: memref<1x32xf32, #tpu.memory_space<vmem>>, %arg5: memref<1x256x32xbf16, #tpu.memory_space<vmem>>) attributes {dimension_semantics = [#tpu.dimension_semantics<parallel>, #tpu.dimension_semantics<parallel>], iteration_bounds = array<i64: 2, 1>, scalar_prefetch = 0 : i64, scratch_operands = 0 : i64, tpu.core_type = #tpu.core_type<tc>, window_params = [{transform_indices = @transform_0, window_bounds = array<i64: 1, 256, 27>}, {pipeline_mode = #tpu.pipeline_mode<synchronous>, transform_indices = @transform_1, window_bounds = array<i64: 27, 32>}, {pipeline_mode = #tpu.pipeline_mode<synchronous>, transform_indices = @transform_2, window_bounds = array<i64: 1, 32>}, {transform_indices = @transform_3, window_bounds = array<i64: 1, 256, 32>}]} {
    %c0 = arith.constant 0 : index
    %c0_0 = arith.constant 0 : index
    %c0_1 = arith.constant 0 : index
    %0 = vector.load %arg2[%c0, %c0_0, %c0_1] : memref<1x256x27xbf16, #tpu.memory_space<vmem>>, vector<1x256x27xbf16>
    %1 = vector.shape_cast %0 : vector<1x256x27xbf16> to vector<256x27xbf16>
    %c0_2 = arith.constant 0 : index
    %c0_3 = arith.constant 0 : index
    %2 = vector.load %arg3[%c0_2, %c0_3] : memref<27x32xbf16, #tpu.memory_space<vmem>>, vector<27x32xbf16>
    %cst = arith.constant dense<0.000000e+00> : vector<256x32xf32>
    %3 = tpu.matmul %1, %2, %cst {dimension_numbers = #tpu.dot_dimension_numbers<[1], [0], [0], [1], [0, 0, 1, 1], [], []>} : vector<256x27xbf16>, vector<27x32xbf16>, vector<256x32xf32> -> vector<256x32xf32>
    %c0_4 = arith.constant 0 : index
    %c0_5 = arith.constant 0 : index
    %4 = vector.load %arg4[%c0_4, %c0_5] : memref<1x32xf32, #tpu.memory_space<vmem>>, vector<1x32xf32>
    %5 = vector.broadcast %4 : vector<1x32xf32> to vector<256x32xf32>
    %6 = arith.addf %3, %5 : vector<256x32xf32>
    %cst_6 = arith.constant 0.000000e+00 : f32
    %7 = vector.broadcast %cst_6 : f32 to vector<256x32xf32>
    %8 = arith.maximumf %6, %7 : vector<256x32xf32>
    %9 = arith.truncf %8 : vector<256x32xf32> to vector<256x32xbf16>
    %c0_7 = arith.constant 0 : index
    %c0_8 = arith.constant 0 : index
    %c0_9 = arith.constant 0 : index
    %10 = vector.load %arg5[%c0_7, %c0_8, %c0_9] : memref<1x256x32xbf16, #tpu.memory_space<vmem>>, vector<1x256x32xbf16>
    %11 = vector.shape_cast %10 : vector<1x256x32xbf16> to vector<256x32xbf16>
    %12 = vector.shape_cast %9 : vector<256x32xbf16> to vector<1x256x32xbf16>
    tpu.vector_store %arg5[%c0_7, %c0_8, %c0_9], %12 {strides = array<i32>} : memref<1x256x32xbf16, #tpu.memory_space<vmem>>, vector<1x256x32xbf16>,
    return
  }
  func.func @transform_0(%arg0: i32, %arg1: i32) -> (i32, i32, i32) {
    %c0_i32 = arith.constant 0 : i32
    %c0_i32_0 = arith.constant 0 : i32
    return %arg0, %arg1, %c0_i32 : i32, i32, i32
  }
  func.func @transform_1(%arg0: i32, %arg1: i32) -> (i32, i32) {
    %c0_i32 = arith.constant 0 : i32
    %c0_i32_0 = arith.constant 0 : i32
    %c0_i32_1 = arith.constant 0 : i32
    return %c0_i32, %c0_i32_0 : i32, i32
  }
  func.func @transform_2(%arg0: i32, %arg1: i32) -> (i32, i32) {
    %c0_i32 = arith.constant 0 : i32
    %c0_i32_0 = arith.constant 0 : i32
    %c0_i32_1 = arith.constant 0 : i32
    return %c0_i32, %c0_i32_0 : i32, i32
  }
  func.func @transform_3(%arg0: i32, %arg1: i32) -> (i32, i32, i32) {
    %c0_i32 = arith.constant 0 : i32
    %c0_i32_0 = arith.constant 0 : i32
    return %arg0, %arg1, %c0_i32 : i32, i32, i32
  }
}

module attributes {stable_mosaic.version = 11 : i64} {
  func.func @_conv2_enc_pool_kernel(%arg0: i32, %arg1: i32, %arg2: memref<2x12xi32, #tpu.memory_space<smem>>, %arg3: memref<2x3xf32, #tpu.memory_space<smem>>, %arg4: memref<1x16x9x32xbf16, #tpu.memory_space<vmem>>, %arg5: memref<1x1x9x32xbf16, #tpu.memory_space<vmem>>, %arg6: memref<1x16x9x32xbf16, #tpu.memory_space<vmem>>, %arg7: memref<1x1x9x32xbf16, #tpu.memory_space<vmem>>, %arg8: memref<9x32x64xbf16, #tpu.memory_space<vmem>>, %arg9: memref<1x64xf32, #tpu.memory_space<vmem>>, %arg10: memref<64x256xbf16, #tpu.memory_space<vmem>>, %arg11: memref<1x256xf32, #tpu.memory_space<vmem>>, %arg12: memref<256x768xbf16, #tpu.memory_space<vmem>>, %arg13: memref<1x768xf32, #tpu.memory_space<vmem>>, %arg14: memref<1x8x8x256xbf16, #tpu.memory_space<vmem>>, %arg15: memref<1x3x768xbf16, #tpu.memory_space<vmem>>, %arg16: memref<3x256xf32, #tpu.memory_space<vmem>>) attributes {dimension_semantics = [#tpu.dimension_semantics<parallel>, #tpu.dimension_semantics<arbitrary>], iteration_bounds = array<i64: 2, 1>, scalar_prefetch = 2 : i64, scratch_operands = 1 : i64, tpu.core_type = #tpu.core_type<tc>, window_params = [{transform_indices = @transform_0, window_bounds = array<i64: 1, 16, 9, 32>}, {transform_indices = @transform_1, window_bounds = array<i64: 1, 1, 9, 32>}, {transform_indices = @transform_2, window_bounds = array<i64: 1, 16, 9, 32>}, {transform_indices = @transform_3, window_bounds = array<i64: 1, 1, 9, 32>}, {pipeline_mode = #tpu.pipeline_mode<synchronous>, transform_indices = @transform_4, window_bounds = array<i64: 9, 32, 64>}, {pipeline_mode = #tpu.pipeline_mode<synchronous>, transform_indices = @transform_5, window_bounds = array<i64: 1, 64>}, {pipeline_mode = #tpu.pipeline_mode<synchronous>, transform_indices = @transform_6, window_bounds = array<i64: 64, 256>}, {pipeline_mode = #tpu.pipeline_mode<synchronous>, transform_indices = @transform_7, window_bounds = array<i64: 1, 256>}, {pipeline_mode = #tpu.pipeline_mode<synchronous>, transform_indices = @transform_8, window_bounds = array<i64: 256, 768>}, {pipeline_mode = #tpu.pipeline_mode<synchronous>, transform_indices = @transform_9, window_bounds = array<i64: 1, 768>}, {transform_indices = @transform_10, window_bounds = array<i64: 1, 8, 8, 256>}, {transform_indices = @transform_11, window_bounds = array<i64: 1, 3, 768>}]} {
    %c0_i32 = arith.constant 0 : i32
    %0 = arith.cmpi eq, %arg1, %c0_i32 : i32
    %1 = arith.extui %0 : i1 to i32
    %c0_i32_0 = arith.constant 0 : i32
    %2 = arith.cmpi ne, %1, %c0_i32_0 : i32
    scf.if %2 {
      %cst_82 = arith.constant 0.000000e+00 : f32
      %153 = vector.broadcast %cst_82 : f32 to vector<3x256xf32>
      %c0_83 = arith.constant 0 : index
      %c0_84 = arith.constant 0 : index
      %154 = vector.load %arg16[%c0_83, %c0_84] : memref<3x256xf32, #tpu.memory_space<vmem>>, vector<3x256xf32>
      tpu.vector_store %arg16[%c0_83, %c0_84], %153 {strides = array<i32>} : memref<3x256xf32, #tpu.memory_space<vmem>>, vector<3x256xf32>,
    } else {
    }
    %3 = tpu.iota {dimensions = array<i32: 1>} : vector<1x8xi32>
    %c0_i32_1 = arith.constant 0 : i32
    %c7_i32 = arith.constant 7 : i32
    %4 = arith.addi %c0_i32_1, %c7_i32 : i32
    %c1_i32 = arith.constant 1 : i32
    scf.for %arg17 = %c0_i32_1 to %4 step %c1_i32  : i32 {
      %c2_i32 = arith.constant 2 : i32
      %153 = arith.muli %c2_i32, %arg17 : i32
      %c0_i32_82 = arith.constant 0 : i32
      %154 = arith.addi %153, %c0_i32_82 : i32
      %c0_83 = arith.constant 0 : index
      %155 = arith.index_cast %154 : i32 to index
      %c0_84 = arith.constant 0 : index
      %c0_85 = arith.constant 0 : index
      %156 = vector.load %arg4[%c0_83, %155, %c0_84, %c0_85] : memref<1x16x9x32xbf16, #tpu.memory_space<vmem>>, vector<1x1x9x32xbf16>
      %157 = vector.shape_cast %156 : vector<1x1x9x32xbf16> to vector<9x32xbf16>
      %c2_i32_86 = arith.constant 2 : i32
      %158 = arith.muli %c2_i32_86, %arg17 : i32
      %c0_i32_87 = arith.constant 0 : i32
      %159 = arith.addi %158, %c0_i32_87 : i32
      %c0_88 = arith.constant 0 : index
      %160 = arith.index_cast %159 : i32 to index
      %c0_89 = arith.constant 0 : index
      %c0_90 = arith.constant 0 : index
      %161 = vector.load %arg6[%c0_88, %160, %c0_89, %c0_90] : memref<1x16x9x32xbf16, #tpu.memory_space<vmem>>, vector<1x1x9x32xbf16>
      %162 = vector.shape_cast %161 : vector<1x1x9x32xbf16> to vector<9x32xbf16>
      %c2_i32_91 = arith.constant 2 : i32
      %163 = arith.muli %c2_i32_91, %arg17 : i32
      %c1_i32_92 = arith.constant 1 : i32
      %164 = arith.addi %163, %c1_i32_92 : i32
      %c0_93 = arith.constant 0 : index
      %165 = arith.index_cast %164 : i32 to index
      %c0_94 = arith.constant 0 : index
      %c0_95 = arith.constant 0 : index
      %166 = vector.load %arg4[%c0_93, %165, %c0_94, %c0_95] : memref<1x16x9x32xbf16, #tpu.memory_space<vmem>>, vector<1x1x9x32xbf16>
      %167 = vector.shape_cast %166 : vector<1x1x9x32xbf16> to vector<9x32xbf16>
      %c2_i32_96 = arith.constant 2 : i32
      %168 = arith.muli %c2_i32_96, %arg17 : i32
      %c1_i32_97 = arith.constant 1 : i32
      %169 = arith.addi %168, %c1_i32_97 : i32
      %c0_98 = arith.constant 0 : index
      %170 = arith.index_cast %169 : i32 to index
      %c0_99 = arith.constant 0 : index
      %c0_100 = arith.constant 0 : index
      %171 = vector.load %arg6[%c0_98, %170, %c0_99, %c0_100] : memref<1x16x9x32xbf16, #tpu.memory_space<vmem>>, vector<1x1x9x32xbf16>
      %172 = vector.shape_cast %171 : vector<1x1x9x32xbf16> to vector<9x32xbf16>
      %c2_i32_101 = arith.constant 2 : i32
      %173 = arith.muli %c2_i32_101, %arg17 : i32
      %c2_i32_102 = arith.constant 2 : i32
      %174 = arith.addi %173, %c2_i32_102 : i32
      %c0_103 = arith.constant 0 : index
      %175 = arith.index_cast %174 : i32 to index
      %c0_104 = arith.constant 0 : index
      %c0_105 = arith.constant 0 : index
      %176 = vector.load %arg4[%c0_103, %175, %c0_104, %c0_105] : memref<1x16x9x32xbf16, #tpu.memory_space<vmem>>, vector<1x1x9x32xbf16>
      %177 = vector.shape_cast %176 : vector<1x1x9x32xbf16> to vector<9x32xbf16>
      %c2_i32_106 = arith.constant 2 : i32
      %178 = arith.muli %c2_i32_106, %arg17 : i32
      %c2_i32_107 = arith.constant 2 : i32
      %179 = arith.addi %178, %c2_i32_107 : i32
      %c0_108 = arith.constant 0 : index
      %180 = arith.index_cast %179 : i32 to index
      %c0_109 = arith.constant 0 : index
      %c0_110 = arith.constant 0 : index
      %181 = vector.load %arg6[%c0_108, %180, %c0_109, %c0_110] : memref<1x16x9x32xbf16, #tpu.memory_space<vmem>>, vector<1x1x9x32xbf16>
      %182 = vector.shape_cast %181 : vector<1x1x9x32xbf16> to vector<9x32xbf16>
      %cst_111 = arith.constant 0.000000e+00 : f32
      %183 = vector.broadcast %cst_111 : f32 to vector<8x64xf32>
      %184 = vector.extract_strided_slice %157 {offsets = [0, 0], sizes = [8, 32], strides = [1, 1]} : vector<9x32xbf16> to vector<8x32xbf16>
      %185 = vector.extract_strided_slice %162 {offsets = [0, 0], sizes = [8, 32], strides = [1, 1]} : vector<9x32xbf16> to vector<8x32xbf16>
      %186 = vector.extract_strided_slice %157 {offsets = [1, 0], sizes = [8, 32], strides = [1, 1]} : vector<9x32xbf16> to vector<8x32xbf16>
      %c0_112 = arith.constant 0 : index
      %c0_113 = arith.constant 0 : index
      %c0_114 = arith.constant 0 : index
      %187 = vector.load %arg8[%c0_112, %c0_113, %c0_114] : memref<9x32x64xbf16, #tpu.memory_space<vmem>>, vector<1x32x64xbf16>
      %188 = vector.shape_cast %187 : vector<1x32x64xbf16> to vector<32x64xbf16>
      %cst_115 = arith.constant dense<0.000000e+00> : vector<8x64xf32>
      %189 = tpu.matmul %184, %188, %cst_115 {dimension_numbers = #tpu.dot_dimension_numbers<[1], [0], [0], [1], [0, 0, 1, 1], [], []>} : vector<8x32xbf16>, vector<32x64xbf16>, vector<8x64xf32> -> vector<8x64xf32>
      %190 = arith.addf %183, %189 : vector<8x64xf32>
      %c1_116 = arith.constant 1 : index
      %c0_117 = arith.constant 0 : index
      %c0_118 = arith.constant 0 : index
      %191 = vector.load %arg8[%c1_116, %c0_117, %c0_118] : memref<9x32x64xbf16, #tpu.memory_space<vmem>>, vector<1x32x64xbf16>
      %192 = vector.shape_cast %191 : vector<1x32x64xbf16> to vector<32x64xbf16>
      %cst_119 = arith.constant dense<0.000000e+00> : vector<8x64xf32>
      %193 = tpu.matmul %185, %192, %cst_119 {dimension_numbers = #tpu.dot_dimension_numbers<[1], [0], [0], [1], [0, 0, 1, 1], [], []>} : vector<8x32xbf16>, vector<32x64xbf16>, vector<8x64xf32> -> vector<8x64xf32>
      %194 = arith.addf %190, %193 : vector<8x64xf32>
      %c2_120 = arith.constant 2 : index
      %c0_121 = arith.constant 0 : index
      %c0_122 = arith.constant 0 : index
      %195 = vector.load %arg8[%c2_120, %c0_121, %c0_122] : memref<9x32x64xbf16, #tpu.memory_space<vmem>>, vector<1x32x64xbf16>
      %196 = vector.shape_cast %195 : vector<1x32x64xbf16> to vector<32x64xbf16>
      %cst_123 = arith.constant dense<0.000000e+00> : vector<8x64xf32>
      %197 = tpu.matmul %186, %196, %cst_123 {dimension_numbers = #tpu.dot_dimension_numbers<[1], [0], [0], [1], [0, 0, 1, 1], [], []>} : vector<8x32xbf16>, vector<32x64xbf16>, vector<8x64xf32> -> vector<8x64xf32>
      %198 = arith.addf %194, %197 : vector<8x64xf32>
      %199 = vector.extract_strided_slice %167 {offsets = [0, 0], sizes = [8, 32], strides = [1, 1]} : vector<9x32xbf16> to vector<8x32xbf16>
      %200 = vector.extract_strided_slice %172 {offsets = [0, 0], sizes = [8, 32], strides = [1, 1]} : vector<9x32xbf16> to vector<8x32xbf16>
      %201 = vector.extract_strided_slice %167 {offsets = [1, 0], sizes = [8, 32], strides = [1, 1]} : vector<9x32xbf16> to vector<8x32xbf16>
      %c3_124 = arith.constant 3 : index
      %c0_125 = arith.constant 0 : index
      %c0_126 = arith.constant 0 : index
      %202 = vector.load %arg8[%c3_124, %c0_125, %c0_126] : memref<9x32x64xbf16, #tpu.memory_space<vmem>>, vector<1x32x64xbf16>
      %203 = vector.shape_cast %202 : vector<1x32x64xbf16> to vector<32x64xbf16>
      %cst_127 = arith.constant dense<0.000000e+00> : vector<8x64xf32>
      %204 = tpu.matmul %199, %203, %cst_127 {dimension_numbers = #tpu.dot_dimension_numbers<[1], [0], [0], [1], [0, 0, 1, 1], [], []>} : vector<8x32xbf16>, vector<32x64xbf16>, vector<8x64xf32> -> vector<8x64xf32>
      %205 = arith.addf %198, %204 : vector<8x64xf32>
      %c4_128 = arith.constant 4 : index
      %c0_129 = arith.constant 0 : index
      %c0_130 = arith.constant 0 : index
      %206 = vector.load %arg8[%c4_128, %c0_129, %c0_130] : memref<9x32x64xbf16, #tpu.memory_space<vmem>>, vector<1x32x64xbf16>
      %207 = vector.shape_cast %206 : vector<1x32x64xbf16> to vector<32x64xbf16>
      %cst_131 = arith.constant dense<0.000000e+00> : vector<8x64xf32>
      %208 = tpu.matmul %200, %207, %cst_131 {dimension_numbers = #tpu.dot_dimension_numbers<[1], [0], [0], [1], [0, 0, 1, 1], [], []>} : vector<8x32xbf16>, vector<32x64xbf16>, vector<8x64xf32> -> vector<8x64xf32>
      %209 = arith.addf %205, %208 : vector<8x64xf32>
      %c5_132 = arith.constant 5 : index
      %c0_133 = arith.constant 0 : index
      %c0_134 = arith.constant 0 : index
      %210 = vector.load %arg8[%c5_132, %c0_133, %c0_134] : memref<9x32x64xbf16, #tpu.memory_space<vmem>>, vector<1x32x64xbf16>
      %211 = vector.shape_cast %210 : vector<1x32x64xbf16> to vector<32x64xbf16>
      %cst_135 = arith.constant dense<0.000000e+00> : vector<8x64xf32>
      %212 = tpu.matmul %201, %211, %cst_135 {dimension_numbers = #tpu.dot_dimension_numbers<[1], [0], [0], [1], [0, 0, 1, 1], [], []>} : vector<8x32xbf16>, vector<32x64xbf16>, vector<8x64xf32> -> vector<8x64xf32>
      %213 = arith.addf %209, %212 : vector<8x64xf32>
      %214 = vector.extract_strided_slice %177 {offsets = [0, 0], sizes = [8, 32], strides = [1, 1]} : vector<9x32xbf16> to vector<8x32xbf16>
      %215 = vector.extract_strided_slice %182 {offsets = [0, 0], sizes = [8, 32], strides = [1, 1]} : vector<9x32xbf16> to vector<8x32xbf16>
      %216 = vector.extract_strided_slice %177 {offsets = [1, 0], sizes = [8, 32], strides = [1, 1]} : vector<9x32xbf16> to vector<8x32xbf16>
      %c6_136 = arith.constant 6 : index
      %c0_137 = arith.constant 0 : index
      %c0_138 = arith.constant 0 : index
      %217 = vector.load %arg8[%c6_136, %c0_137, %c0_138] : memref<9x32x64xbf16, #tpu.memory_space<vmem>>, vector<1x32x64xbf16>
      %218 = vector.shape_cast %217 : vector<1x32x64xbf16> to vector<32x64xbf16>
      %cst_139 = arith.constant dense<0.000000e+00> : vector<8x64xf32>
      %219 = tpu.matmul %214, %218, %cst_139 {dimension_numbers = #tpu.dot_dimension_numbers<[1], [0], [0], [1], [0, 0, 1, 1], [], []>} : vector<8x32xbf16>, vector<32x64xbf16>, vector<8x64xf32> -> vector<8x64xf32>
      %220 = arith.addf %213, %219 : vector<8x64xf32>
      %c7_140 = arith.constant 7 : index
      %c0_141 = arith.constant 0 : index
      %c0_142 = arith.constant 0 : index
      %221 = vector.load %arg8[%c7_140, %c0_141, %c0_142] : memref<9x32x64xbf16, #tpu.memory_space<vmem>>, vector<1x32x64xbf16>
      %222 = vector.shape_cast %221 : vector<1x32x64xbf16> to vector<32x64xbf16>
      %cst_143 = arith.constant dense<0.000000e+00> : vector<8x64xf32>
      %223 = tpu.matmul %215, %222, %cst_143 {dimension_numbers = #tpu.dot_dimension_numbers<[1], [0], [0], [1], [0, 0, 1, 1], [], []>} : vector<8x32xbf16>, vector<32x64xbf16>, vector<8x64xf32> -> vector<8x64xf32>
      %224 = arith.addf %220, %223 : vector<8x64xf32>
      %c8_144 = arith.constant 8 : index
      %c0_145 = arith.constant 0 : index
      %c0_146 = arith.constant 0 : index
      %225 = vector.load %arg8[%c8_144, %c0_145, %c0_146] : memref<9x32x64xbf16, #tpu.memory_space<vmem>>, vector<1x32x64xbf16>
      %226 = vector.shape_cast %225 : vector<1x32x64xbf16> to vector<32x64xbf16>
      %cst_147 = arith.constant dense<0.000000e+00> : vector<8x64xf32>
      %227 = tpu.matmul %216, %226, %cst_147 {dimension_numbers = #tpu.dot_dimension_numbers<[1], [0], [0], [1], [0, 0, 1, 1], [], []>} : vector<8x32xbf16>, vector<32x64xbf16>, vector<8x64xf32> -> vector<8x64xf32>
      %228 = arith.addf %224, %227 : vector<8x64xf32>
      %c0_148 = arith.constant 0 : index
      %c0_149 = arith.constant 0 : index
      %229 = vector.load %arg9[%c0_148, %c0_149] : memref<1x64xf32, #tpu.memory_space<vmem>>, vector<1x64xf32>
      %230 = vector.broadcast %229 : vector<1x64xf32> to vector<8x64xf32>
      %231 = arith.addf %228, %230 : vector<8x64xf32>
      %cst_150 = arith.constant 0.000000e+00 : f32
      %232 = vector.broadcast %cst_150 : f32 to vector<8x64xf32>
      %233 = arith.maximumf %231, %232 : vector<8x64xf32>
      %234 = arith.truncf %233 : vector<8x64xf32> to vector<8x64xbf16>
      %c0_151 = arith.constant 0 : index
      %c0_152 = arith.constant 0 : index
      %235 = vector.load %arg10[%c0_151, %c0_152] : memref<64x256xbf16, #tpu.memory_space<vmem>>, vector<64x256xbf16>
      %cst_153 = arith.constant dense<0.000000e+00> : vector<8x256xf32>
      %236 = tpu.matmul %234, %235, %cst_153 {dimension_numbers = #tpu.dot_dimension_numbers<[1], [0], [0], [1], [0, 0, 1, 1], [], []>} : vector<8x64xbf16>, vector<64x256xbf16>, vector<8x256xf32> -> vector<8x256xf32>
      %c0_154 = arith.constant 0 : index
      %c0_155 = arith.constant 0 : index
      %237 = vector.load %arg11[%c0_154, %c0_155] : memref<1x256xf32, #tpu.memory_space<vmem>>, vector<1x256xf32>
      %238 = vector.broadcast %237 : vector<1x256xf32> to vector<8x256xf32>
      %239 = arith.addf %236, %238 : vector<8x256xf32>
      %cst_156 = arith.constant 0.000000e+00 : f32
      %240 = vector.broadcast %cst_156 : f32 to vector<8x256xf32>
      %241 = arith.maximumf %239, %240 : vector<8x256xf32>
      %242 = arith.truncf %241 : vector<8x256xf32> to vector<8x256xbf16>
      %c0_157 = arith.constant 0 : index
      %243 = arith.index_cast %arg17 : i32 to index
      %c0_158 = arith.constant 0 : index
      %c0_159 = arith.constant 0 : index
      %244 = vector.load %arg14[%c0_157, %243, %c0_158, %c0_159] : memref<1x8x8x256xbf16, #tpu.memory_space<vmem>>, vector<1x1x8x256xbf16>
      %245 = vector.shape_cast %244 : vector<1x1x8x256xbf16> to vector<8x256xbf16>
      %246 = vector.shape_cast %242 : vector<8x256xbf16> to vector<1x1x8x256xbf16>
      tpu.vector_store %arg14[%c0_157, %243, %c0_158, %c0_159], %246 {strides = array<i32>} : memref<1x8x8x256xbf16, #tpu.memory_space<vmem>>, vector<1x1x8x256xbf16>,
      %c0_160 = arith.constant 0 : index
      %c0_161 = arith.constant 0 : index
      %247 = vector.load %arg16[%c0_160, %c0_161] : memref<3x256xf32, #tpu.memory_space<vmem>>, vector<3x256xf32>
      %c8_i32_162 = arith.constant 8 : i32
      %248 = arith.muli %arg1, %c8_i32_162 : i32
      %249 = arith.addi %248, %arg17 : i32
      %250 = arith.index_cast %arg0 : i32 to index
      %c0_163 = arith.constant 0 : index
      %251 = memref.load %arg2[%250, %c0_163] : memref<2x12xi32, #tpu.memory_space<smem>>
      %252 = arith.index_cast %arg0 : i32 to index
      %c1_164 = arith.constant 1 : index
      %253 = memref.load %arg2[%252, %c1_164] : memref<2x12xi32, #tpu.memory_space<smem>>
      %254 = arith.index_cast %arg0 : i32 to index
      %c2_165 = arith.constant 2 : index
      %255 = memref.load %arg2[%254, %c2_165] : memref<2x12xi32, #tpu.memory_space<smem>>
      %256 = arith.index_cast %arg0 : i32 to index
      %c3_166 = arith.constant 3 : index
      %257 = memref.load %arg2[%256, %c3_166] : memref<2x12xi32, #tpu.memory_space<smem>>
      %258 = arith.cmpi sge, %249, %251 : i32
      %259 = arith.cmpi sle, %249, %253 : i32
      %260 = arith.andi %258, %259 : i1
      %261 = vector.broadcast %255 : i32 to vector<1x8xi32>
      %262 = arith.cmpi sge, %3, %261 : vector<1x8xi32>
      %263 = vector.broadcast %257 : i32 to vector<1x8xi32>
      %264 = arith.cmpi sle, %3, %263 : vector<1x8xi32>
      %265 = arith.andi %262, %264 : vector<1x8xi1>
      %266 = vector.broadcast %260 : i1 to vector<1x8xi1>
      %267 = arith.andi %265, %266 : vector<1x8xi1>
      %268 = arith.extui %267 : vector<1x8xi1> to vector<1x8xi32>
      %269 = arith.sitofp %268 : vector<1x8xi32> to vector<1x8xf32>
      %270 = arith.truncf %269 : vector<1x8xf32> to vector<1x8xbf16>
      %271 = arith.index_cast %arg0 : i32 to index
      %c4_167 = arith.constant 4 : index
      %272 = memref.load %arg2[%271, %c4_167] : memref<2x12xi32, #tpu.memory_space<smem>>
      %273 = arith.index_cast %arg0 : i32 to index
      %c5_168 = arith.constant 5 : index
      %274 = memref.load %arg2[%273, %c5_168] : memref<2x12xi32, #tpu.memory_space<smem>>
      %275 = arith.index_cast %arg0 : i32 to index
      %c6_169 = arith.constant 6 : index
      %276 = memref.load %arg2[%275, %c6_169] : memref<2x12xi32, #tpu.memory_space<smem>>
      %277 = arith.index_cast %arg0 : i32 to index
      %c7_170 = arith.constant 7 : index
      %278 = memref.load %arg2[%277, %c7_170] : memref<2x12xi32, #tpu.memory_space<smem>>
      %279 = arith.cmpi sge, %249, %272 : i32
      %280 = arith.cmpi sle, %249, %274 : i32
      %281 = arith.andi %279, %280 : i1
      %282 = vector.broadcast %276 : i32 to vector<1x8xi32>
      %283 = arith.cmpi sge, %3, %282 : vector<1x8xi32>
      %284 = vector.broadcast %278 : i32 to vector<1x8xi32>
      %285 = arith.cmpi sle, %3, %284 : vector<1x8xi32>
      %286 = arith.andi %283, %285 : vector<1x8xi1>
      %287 = vector.broadcast %281 : i1 to vector<1x8xi1>
      %288 = arith.andi %286, %287 : vector<1x8xi1>
      %289 = arith.extui %288 : vector<1x8xi1> to vector<1x8xi32>
      %290 = arith.sitofp %289 : vector<1x8xi32> to vector<1x8xf32>
      %291 = arith.truncf %290 : vector<1x8xf32> to vector<1x8xbf16>
      %292 = arith.index_cast %arg0 : i32 to index
      %c8_171 = arith.constant 8 : index
      %293 = memref.load %arg2[%292, %c8_171] : memref<2x12xi32, #tpu.memory_space<smem>>
      %294 = arith.index_cast %arg0 : i32 to index
      %c9_172 = arith.constant 9 : index
      %295 = memref.load %arg2[%294, %c9_172] : memref<2x12xi32, #tpu.memory_space<smem>>
      %296 = arith.index_cast %arg0 : i32 to index
      %c10_173 = arith.constant 10 : index
      %297 = memref.load %arg2[%296, %c10_173] : memref<2x12xi32, #tpu.memory_space<smem>>
      %298 = arith.index_cast %arg0 : i32 to index
      %c11_174 = arith.constant 11 : index
      %299 = memref.load %arg2[%298, %c11_174] : memref<2x12xi32, #tpu.memory_space<smem>>
      %300 = arith.cmpi sge, %249, %293 : i32
      %301 = arith.cmpi sle, %249, %295 : i32
      %302 = arith.andi %300, %301 : i1
      %303 = vector.broadcast %297 : i32 to vector<1x8xi32>
      %304 = arith.cmpi sge, %3, %303 : vector<1x8xi32>
      %305 = vector.broadcast %299 : i32 to vector<1x8xi32>
      %306 = arith.cmpi sle, %3, %305 : vector<1x8xi32>
      %307 = arith.andi %304, %306 : vector<1x8xi1>
      %308 = vector.broadcast %302 : i1 to vector<1x8xi1>
      %309 = arith.andi %307, %308 : vector<1x8xi1>
      %310 = arith.extui %309 : vector<1x8xi1> to vector<1x8xi32>
      %311 = arith.sitofp %310 : vector<1x8xi32> to vector<1x8xf32>
      %312 = arith.truncf %311 : vector<1x8xf32> to vector<1x8xbf16>
      %313 = tpu.concatenate %270, %291, %312 in 0 : vector<1x8xbf16>, vector<1x8xbf16>, vector<1x8xbf16> -> vector<3x8xbf16>
      %cst_175 = arith.constant dense<0.000000e+00> : vector<3x256xf32>
      %314 = tpu.matmul %313, %242, %cst_175 {dimension_numbers = #tpu.dot_dimension_numbers<[1], [0], [0], [1], [0, 0, 1, 1], [], []>} : vector<3x8xbf16>, vector<8x256xbf16>, vector<3x256xf32> -> vector<3x256xf32>
      %315 = arith.addf %247, %314 : vector<3x256xf32>
      %c0_176 = arith.constant 0 : index
      %c0_177 = arith.constant 0 : index
      %316 = vector.load %arg16[%c0_176, %c0_177] : memref<3x256xf32, #tpu.memory_space<vmem>>, vector<3x256xf32>
      tpu.vector_store %arg16[%c0_176, %c0_177], %315 {strides = array<i32>} : memref<3x256xf32, #tpu.memory_space<vmem>>, vector<3x256xf32>,
    }
    %c7_i32_2 = arith.constant 7 : i32
    %c0 = arith.constant 0 : index
    %c14 = arith.constant 14 : index
    %c0_3 = arith.constant 0 : index
    %c0_4 = arith.constant 0 : index
    %5 = vector.load %arg4[%c0, %c14, %c0_3, %c0_4] : memref<1x16x9x32xbf16, #tpu.memory_space<vmem>>, vector<1x1x9x32xbf16>
    %6 = vector.shape_cast %5 : vector<1x1x9x32xbf16> to vector<9x32xbf16>
    %c0_5 = arith.constant 0 : index
    %c14_6 = arith.constant 14 : index
    %c0_7 = arith.constant 0 : index
    %c0_8 = arith.constant 0 : index
    %7 = vector.load %arg6[%c0_5, %c14_6, %c0_7, %c0_8] : memref<1x16x9x32xbf16, #tpu.memory_space<vmem>>, vector<1x1x9x32xbf16>
    %8 = vector.shape_cast %7 : vector<1x1x9x32xbf16> to vector<9x32xbf16>
    %c0_9 = arith.constant 0 : index
    %c15 = arith.constant 15 : index
    %c0_10 = arith.constant 0 : index
    %c0_11 = arith.constant 0 : index
    %9 = vector.load %arg4[%c0_9, %c15, %c0_10, %c0_11] : memref<1x16x9x32xbf16, #tpu.memory_space<vmem>>, vector<1x1x9x32xbf16>
    %10 = vector.shape_cast %9 : vector<1x1x9x32xbf16> to vector<9x32xbf16>
    %c0_12 = arith.constant 0 : index
    %c15_13 = arith.constant 15 : index
    %c0_14 = arith.constant 0 : index
    %c0_15 = arith.constant 0 : index
    %11 = vector.load %arg6[%c0_12, %c15_13, %c0_14, %c0_15] : memref<1x16x9x32xbf16, #tpu.memory_space<vmem>>, vector<1x1x9x32xbf16>
    %12 = vector.shape_cast %11 : vector<1x1x9x32xbf16> to vector<9x32xbf16>
    %c0_16 = arith.constant 0 : index
    %c0_17 = arith.constant 0 : index
    %c0_18 = arith.constant 0 : index
    %c0_19 = arith.constant 0 : index
    %13 = vector.load %arg5[%c0_16, %c0_17, %c0_18, %c0_19] : memref<1x1x9x32xbf16, #tpu.memory_space<vmem>>, vector<1x1x9x32xbf16>
    %14 = vector.shape_cast %13 : vector<1x1x9x32xbf16> to vector<9x32xbf16>
    %c0_20 = arith.constant 0 : index
    %c0_21 = arith.constant 0 : index
    %c0_22 = arith.constant 0 : index
    %c0_23 = arith.constant 0 : index
    %15 = vector.load %arg7[%c0_20, %c0_21, %c0_22, %c0_23] : memref<1x1x9x32xbf16, #tpu.memory_space<vmem>>, vector<1x1x9x32xbf16>
    %16 = vector.shape_cast %15 : vector<1x1x9x32xbf16> to vector<9x32xbf16>
    %cst = arith.constant 0.000000e+00 : f32
    %17 = vector.broadcast %cst : f32 to vector<8x64xf32>
    %18 = vector.extract_strided_slice %6 {offsets = [0, 0], sizes = [8, 32], strides = [1, 1]} : vector<9x32xbf16> to vector<8x32xbf16>
    %19 = vector.extract_strided_slice %8 {offsets = [0, 0], sizes = [8, 32], strides = [1, 1]} : vector<9x32xbf16> to vector<8x32xbf16>
    %20 = vector.extract_strided_slice %6 {offsets = [1, 0], sizes = [8, 32], strides = [1, 1]} : vector<9x32xbf16> to vector<8x32xbf16>
    %c0_24 = arith.constant 0 : index
    %c0_25 = arith.constant 0 : index
    %c0_26 = arith.constant 0 : index
    %21 = vector.load %arg8[%c0_24, %c0_25, %c0_26] : memref<9x32x64xbf16, #tpu.memory_space<vmem>>, vector<1x32x64xbf16>
    %22 = vector.shape_cast %21 : vector<1x32x64xbf16> to vector<32x64xbf16>
    %cst_27 = arith.constant dense<0.000000e+00> : vector<8x64xf32>
    %23 = tpu.matmul %18, %22, %cst_27 {dimension_numbers = #tpu.dot_dimension_numbers<[1], [0], [0], [1], [0, 0, 1, 1], [], []>} : vector<8x32xbf16>, vector<32x64xbf16>, vector<8x64xf32> -> vector<8x64xf32>
    %24 = arith.addf %17, %23 : vector<8x64xf32>
    %c1 = arith.constant 1 : index
    %c0_28 = arith.constant 0 : index
    %c0_29 = arith.constant 0 : index
    %25 = vector.load %arg8[%c1, %c0_28, %c0_29] : memref<9x32x64xbf16, #tpu.memory_space<vmem>>, vector<1x32x64xbf16>
    %26 = vector.shape_cast %25 : vector<1x32x64xbf16> to vector<32x64xbf16>
    %cst_30 = arith.constant dense<0.000000e+00> : vector<8x64xf32>
    %27 = tpu.matmul %19, %26, %cst_30 {dimension_numbers = #tpu.dot_dimension_numbers<[1], [0], [0], [1], [0, 0, 1, 1], [], []>} : vector<8x32xbf16>, vector<32x64xbf16>, vector<8x64xf32> -> vector<8x64xf32>
    %28 = arith.addf %24, %27 : vector<8x64xf32>
    %c2 = arith.constant 2 : index
    %c0_31 = arith.constant 0 : index
    %c0_32 = arith.constant 0 : index
    %29 = vector.load %arg8[%c2, %c0_31, %c0_32] : memref<9x32x64xbf16, #tpu.memory_space<vmem>>, vector<1x32x64xbf16>
    %30 = vector.shape_cast %29 : vector<1x32x64xbf16> to vector<32x64xbf16>
    %cst_33 = arith.constant dense<0.000000e+00> : vector<8x64xf32>
    %31 = tpu.matmul %20, %30, %cst_33 {dimension_numbers = #tpu.dot_dimension_numbers<[1], [0], [0], [1], [0, 0, 1, 1], [], []>} : vector<8x32xbf16>, vector<32x64xbf16>, vector<8x64xf32> -> vector<8x64xf32>
    %32 = arith.addf %28, %31 : vector<8x64xf32>
    %33 = vector.extract_strided_slice %10 {offsets = [0, 0], sizes = [8, 32], strides = [1, 1]} : vector<9x32xbf16> to vector<8x32xbf16>
    %34 = vector.extract_strided_slice %12 {offsets = [0, 0], sizes = [8, 32], strides = [1, 1]} : vector<9x32xbf16> to vector<8x32xbf16>
    %35 = vector.extract_strided_slice %10 {offsets = [1, 0], sizes = [8, 32], strides = [1, 1]} : vector<9x32xbf16> to vector<8x32xbf16>
    %c3 = arith.constant 3 : index
    %c0_34 = arith.constant 0 : index
    %c0_35 = arith.constant 0 : index
    %36 = vector.load %arg8[%c3, %c0_34, %c0_35] : memref<9x32x64xbf16, #tpu.memory_space<vmem>>, vector<1x32x64xbf16>
    %37 = vector.shape_cast %36 : vector<1x32x64xbf16> to vector<32x64xbf16>
    %cst_36 = arith.constant dense<0.000000e+00> : vector<8x64xf32>
    %38 = tpu.matmul %33, %37, %cst_36 {dimension_numbers = #tpu.dot_dimension_numbers<[1], [0], [0], [1], [0, 0, 1, 1], [], []>} : vector<8x32xbf16>, vector<32x64xbf16>, vector<8x64xf32> -> vector<8x64xf32>
    %39 = arith.addf %32, %38 : vector<8x64xf32>
    %c4 = arith.constant 4 : index
    %c0_37 = arith.constant 0 : index
    %c0_38 = arith.constant 0 : index
    %40 = vector.load %arg8[%c4, %c0_37, %c0_38] : memref<9x32x64xbf16, #tpu.memory_space<vmem>>, vector<1x32x64xbf16>
    %41 = vector.shape_cast %40 : vector<1x32x64xbf16> to vector<32x64xbf16>
    %cst_39 = arith.constant dense<0.000000e+00> : vector<8x64xf32>
    %42 = tpu.matmul %34, %41, %cst_39 {dimension_numbers = #tpu.dot_dimension_numbers<[1], [0], [0], [1], [0, 0, 1, 1], [], []>} : vector<8x32xbf16>, vector<32x64xbf16>, vector<8x64xf32> -> vector<8x64xf32>
    %43 = arith.addf %39, %42 : vector<8x64xf32>
    %c5 = arith.constant 5 : index
    %c0_40 = arith.constant 0 : index
    %c0_41 = arith.constant 0 : index
    %44 = vector.load %arg8[%c5, %c0_40, %c0_41] : memref<9x32x64xbf16, #tpu.memory_space<vmem>>, vector<1x32x64xbf16>
    %45 = vector.shape_cast %44 : vector<1x32x64xbf16> to vector<32x64xbf16>
    %cst_42 = arith.constant dense<0.000000e+00> : vector<8x64xf32>
    %46 = tpu.matmul %35, %45, %cst_42 {dimension_numbers = #tpu.dot_dimension_numbers<[1], [0], [0], [1], [0, 0, 1, 1], [], []>} : vector<8x32xbf16>, vector<32x64xbf16>, vector<8x64xf32> -> vector<8x64xf32>
    %47 = arith.addf %43, %46 : vector<8x64xf32>
    %48 = vector.extract_strided_slice %14 {offsets = [0, 0], sizes = [8, 32], strides = [1, 1]} : vector<9x32xbf16> to vector<8x32xbf16>
    %49 = vector.extract_strided_slice %16 {offsets = [0, 0], sizes = [8, 32], strides = [1, 1]} : vector<9x32xbf16> to vector<8x32xbf16>
    %50 = vector.extract_strided_slice %14 {offsets = [1, 0], sizes = [8, 32], strides = [1, 1]} : vector<9x32xbf16> to vector<8x32xbf16>
    %c6 = arith.constant 6 : index
    %c0_43 = arith.constant 0 : index
    %c0_44 = arith.constant 0 : index
    %51 = vector.load %arg8[%c6, %c0_43, %c0_44] : memref<9x32x64xbf16, #tpu.memory_space<vmem>>, vector<1x32x64xbf16>
    %52 = vector.shape_cast %51 : vector<1x32x64xbf16> to vector<32x64xbf16>
    %cst_45 = arith.constant dense<0.000000e+00> : vector<8x64xf32>
    %53 = tpu.matmul %48, %52, %cst_45 {dimension_numbers = #tpu.dot_dimension_numbers<[1], [0], [0], [1], [0, 0, 1, 1], [], []>} : vector<8x32xbf16>, vector<32x64xbf16>, vector<8x64xf32> -> vector<8x64xf32>
    %54 = arith.addf %47, %53 : vector<8x64xf32>
    %c7 = arith.constant 7 : index
    %c0_46 = arith.constant 0 : index
    %c0_47 = arith.constant 0 : index
    %55 = vector.load %arg8[%c7, %c0_46, %c0_47] : memref<9x32x64xbf16, #tpu.memory_space<vmem>>, vector<1x32x64xbf16>
    %56 = vector.shape_cast %55 : vector<1x32x64xbf16> to vector<32x64xbf16>
    %cst_48 = arith.constant dense<0.000000e+00> : vector<8x64xf32>
    %57 = tpu.matmul %49, %56, %cst_48 {dimension_numbers = #tpu.dot_dimension_numbers<[1], [0], [0], [1], [0, 0, 1, 1], [], []>} : vector<8x32xbf16>, vector<32x64xbf16>, vector<8x64xf32> -> vector<8x64xf32>
    %58 = arith.addf %54, %57 : vector<8x64xf32>
    %c8 = arith.constant 8 : index
    %c0_49 = arith.constant 0 : index
    %c0_50 = arith.constant 0 : index
    %59 = vector.load %arg8[%c8, %c0_49, %c0_50] : memref<9x32x64xbf16, #tpu.memory_space<vmem>>, vector<1x32x64xbf16>
    %60 = vector.shape_cast %59 : vector<1x32x64xbf16> to vector<32x64xbf16>
    %cst_51 = arith.constant dense<0.000000e+00> : vector<8x64xf32>
    %61 = tpu.matmul %50, %60, %cst_51 {dimension_numbers = #tpu.dot_dimension_numbers<[1], [0], [0], [1], [0, 0, 1, 1], [], []>} : vector<8x32xbf16>, vector<32x64xbf16>, vector<8x64xf32> -> vector<8x64xf32>
    %62 = arith.addf %58, %61 : vector<8x64xf32>
    %c0_52 = arith.constant 0 : index
    %c0_53 = arith.constant 0 : index
    %63 = vector.load %arg9[%c0_52, %c0_53] : memref<1x64xf32, #tpu.memory_space<vmem>>, vector<1x64xf32>
    %64 = vector.broadcast %63 : vector<1x64xf32> to vector<8x64xf32>
    %65 = arith.addf %62, %64 : vector<8x64xf32>
    %cst_54 = arith.constant 0.000000e+00 : f32
    %66 = vector.broadcast %cst_54 : f32 to vector<8x64xf32>
    %67 = arith.maximumf %65, %66 : vector<8x64xf32>
    %68 = arith.truncf %67 : vector<8x64xf32> to vector<8x64xbf16>
    %c0_55 = arith.constant 0 : index
    %c0_56 = arith.constant 0 : index
    %69 = vector.load %arg10[%c0_55, %c0_56] : memref<64x256xbf16, #tpu.memory_space<vmem>>, vector<64x256xbf16>
    %cst_57 = arith.constant dense<0.000000e+00> : vector<8x256xf32>
    %70 = tpu.matmul %68, %69, %cst_57 {dimension_numbers = #tpu.dot_dimension_numbers<[1], [0], [0], [1], [0, 0, 1, 1], [], []>} : vector<8x64xbf16>, vector<64x256xbf16>, vector<8x256xf32> -> vector<8x256xf32>
    %c0_58 = arith.constant 0 : index
    %c0_59 = arith.constant 0 : index
    %71 = vector.load %arg11[%c0_58, %c0_59] : memref<1x256xf32, #tpu.memory_space<vmem>>, vector<1x256xf32>
    %72 = vector.broadcast %71 : vector<1x256xf32> to vector<8x256xf32>
    %73 = arith.addf %70, %72 : vector<8x256xf32>
    %cst_60 = arith.constant 0.000000e+00 : f32
    %74 = vector.broadcast %cst_60 : f32 to vector<8x256xf32>
    %75 = arith.maximumf %73, %74 : vector<8x256xf32>
    %76 = arith.truncf %75 : vector<8x256xf32> to vector<8x256xbf16>
    %c0_61 = arith.constant 0 : index
    %c7_62 = arith.constant 7 : index
    %c0_63 = arith.constant 0 : index
    %c0_64 = arith.constant 0 : index
    %77 = vector.load %arg14[%c0_61, %c7_62, %c0_63, %c0_64] : memref<1x8x8x256xbf16, #tpu.memory_space<vmem>>, vector<1x1x8x256xbf16>
    %78 = vector.shape_cast %77 : vector<1x1x8x256xbf16> to vector<8x256xbf16>
    %79 = vector.shape_cast %76 : vector<8x256xbf16> to vector<1x1x8x256xbf16>
    tpu.vector_store %arg14[%c0_61, %c7_62, %c0_63, %c0_64], %79 {strides = array<i32>} : memref<1x8x8x256xbf16, #tpu.memory_space<vmem>>, vector<1x1x8x256xbf16>,
    %c0_65 = arith.constant 0 : index
    %c0_66 = arith.constant 0 : index
    %80 = vector.load %arg16[%c0_65, %c0_66] : memref<3x256xf32, #tpu.memory_space<vmem>>, vector<3x256xf32>
    %c8_i32 = arith.constant 8 : i32
    %81 = arith.muli %arg1, %c8_i32 : i32
    %c7_i32_67 = arith.constant 7 : i32
    %82 = arith.addi %81, %c7_i32_67 : i32
    %83 = arith.index_cast %arg0 : i32 to index
    %c0_68 = arith.constant 0 : index
    %84 = memref.load %arg2[%83, %c0_68] : memref<2x12xi32, #tpu.memory_space<smem>>
    %85 = arith.index_cast %arg0 : i32 to index
    %c1_69 = arith.constant 1 : index
    %86 = memref.load %arg2[%85, %c1_69] : memref<2x12xi32, #tpu.memory_space<smem>>
    %87 = arith.index_cast %arg0 : i32 to index
    %c2_70 = arith.constant 2 : index
    %88 = memref.load %arg2[%87, %c2_70] : memref<2x12xi32, #tpu.memory_space<smem>>
    %89 = arith.index_cast %arg0 : i32 to index
    %c3_71 = arith.constant 3 : index
    %90 = memref.load %arg2[%89, %c3_71] : memref<2x12xi32, #tpu.memory_space<smem>>
    %91 = arith.cmpi sge, %82, %84 : i32
    %92 = arith.cmpi sle, %82, %86 : i32
    %93 = arith.andi %91, %92 : i1
    %94 = vector.broadcast %88 : i32 to vector<1x8xi32>
    %95 = arith.cmpi sge, %3, %94 : vector<1x8xi32>
    %96 = vector.broadcast %90 : i32 to vector<1x8xi32>
    %97 = arith.cmpi sle, %3, %96 : vector<1x8xi32>
    %98 = arith.andi %95, %97 : vector<1x8xi1>
    %99 = vector.broadcast %93 : i1 to vector<1x8xi1>
    %100 = arith.andi %98, %99 : vector<1x8xi1>
    %101 = arith.extui %100 : vector<1x8xi1> to vector<1x8xi32>
    %102 = arith.sitofp %101 : vector<1x8xi32> to vector<1x8xf32>
    %103 = arith.truncf %102 : vector<1x8xf32> to vector<1x8xbf16>
    %104 = arith.index_cast %arg0 : i32 to index
    %c4_72 = arith.constant 4 : index
    %105 = memref.load %arg2[%104, %c4_72] : memref<2x12xi32, #tpu.memory_space<smem>>
    %106 = arith.index_cast %arg0 : i32 to index
    %c5_73 = arith.constant 5 : index
    %107 = memref.load %arg2[%106, %c5_73] : memref<2x12xi32, #tpu.memory_space<smem>>
    %108 = arith.index_cast %arg0 : i32 to index
    %c6_74 = arith.constant 6 : index
    %109 = memref.load %arg2[%108, %c6_74] : memref<2x12xi32, #tpu.memory_space<smem>>
    %110 = arith.index_cast %arg0 : i32 to index
    %c7_75 = arith.constant 7 : index
    %111 = memref.load %arg2[%110, %c7_75] : memref<2x12xi32, #tpu.memory_space<smem>>
    %112 = arith.cmpi sge, %82, %105 : i32
    %113 = arith.cmpi sle, %82, %107 : i32
    %114 = arith.andi %112, %113 : i1
    %115 = vector.broadcast %109 : i32 to vector<1x8xi32>
    %116 = arith.cmpi sge, %3, %115 : vector<1x8xi32>
    %117 = vector.broadcast %111 : i32 to vector<1x8xi32>
    %118 = arith.cmpi sle, %3, %117 : vector<1x8xi32>
    %119 = arith.andi %116, %118 : vector<1x8xi1>
    %120 = vector.broadcast %114 : i1 to vector<1x8xi1>
    %121 = arith.andi %119, %120 : vector<1x8xi1>
    %122 = arith.extui %121 : vector<1x8xi1> to vector<1x8xi32>
    %123 = arith.sitofp %122 : vector<1x8xi32> to vector<1x8xf32>
    %124 = arith.truncf %123 : vector<1x8xf32> to vector<1x8xbf16>
    %125 = arith.index_cast %arg0 : i32 to index
    %c8_76 = arith.constant 8 : index
    %126 = memref.load %arg2[%125, %c8_76] : memref<2x12xi32, #tpu.memory_space<smem>>
    %127 = arith.index_cast %arg0 : i32 to index
    %c9 = arith.constant 9 : index
    %128 = memref.load %arg2[%127, %c9] : memref<2x12xi32, #tpu.memory_space<smem>>
    %129 = arith.index_cast %arg0 : i32 to index
    %c10 = arith.constant 10 : index
    %130 = memref.load %arg2[%129, %c10] : memref<2x12xi32, #tpu.memory_space<smem>>
    %131 = arith.index_cast %arg0 : i32 to index
    %c11 = arith.constant 11 : index
    %132 = memref.load %arg2[%131, %c11] : memref<2x12xi32, #tpu.memory_space<smem>>
    %133 = arith.cmpi sge, %82, %126 : i32
    %134 = arith.cmpi sle, %82, %128 : i32
    %135 = arith.andi %133, %134 : i1
    %136 = vector.broadcast %130 : i32 to vector<1x8xi32>
    %137 = arith.cmpi sge, %3, %136 : vector<1x8xi32>
    %138 = vector.broadcast %132 : i32 to vector<1x8xi32>
    %139 = arith.cmpi sle, %3, %138 : vector<1x8xi32>
    %140 = arith.andi %137, %139 : vector<1x8xi1>
    %141 = vector.broadcast %135 : i1 to vector<1x8xi1>
    %142 = arith.andi %140, %141 : vector<1x8xi1>
    %143 = arith.extui %142 : vector<1x8xi1> to vector<1x8xi32>
    %144 = arith.sitofp %143 : vector<1x8xi32> to vector<1x8xf32>
    %145 = arith.truncf %144 : vector<1x8xf32> to vector<1x8xbf16>
    %146 = tpu.concatenate %103, %124, %145 in 0 : vector<1x8xbf16>, vector<1x8xbf16>, vector<1x8xbf16> -> vector<3x8xbf16>
    %cst_77 = arith.constant dense<0.000000e+00> : vector<3x256xf32>
    %147 = tpu.matmul %146, %76, %cst_77 {dimension_numbers = #tpu.dot_dimension_numbers<[1], [0], [0], [1], [0, 0, 1, 1], [], []>} : vector<3x8xbf16>, vector<8x256xbf16>, vector<3x256xf32> -> vector<3x256xf32>
    %148 = arith.addf %80, %147 : vector<3x256xf32>
    %c0_78 = arith.constant 0 : index
    %c0_79 = arith.constant 0 : index
    %149 = vector.load %arg16[%c0_78, %c0_79] : memref<3x256xf32, #tpu.memory_space<vmem>>, vector<3x256xf32>
    tpu.vector_store %arg16[%c0_78, %c0_79], %148 {strides = array<i32>} : memref<3x256xf32, #tpu.memory_space<vmem>>, vector<3x256xf32>,
    %c0_i32_80 = arith.constant 0 : i32
    %150 = arith.cmpi eq, %arg1, %c0_i32_80 : i32
    %151 = arith.extui %150 : i1 to i32
    %c0_i32_81 = arith.constant 0 : i32
    %152 = arith.cmpi ne, %151, %c0_i32_81 : i32
    scf.if %152 {
      %153 = arith.index_cast %arg0 : i32 to index
      %c0_82 = arith.constant 0 : index
      %154 = memref.load %arg3[%153, %c0_82] : memref<2x3xf32, #tpu.memory_space<smem>>
      %155 = vector.broadcast %154 : f32 to vector<1x1xf32>
      %156 = arith.index_cast %arg0 : i32 to index
      %c1_83 = arith.constant 1 : index
      %157 = memref.load %arg3[%156, %c1_83] : memref<2x3xf32, #tpu.memory_space<smem>>
      %158 = vector.broadcast %157 : f32 to vector<1x1xf32>
      %159 = arith.index_cast %arg0 : i32 to index
      %c2_84 = arith.constant 2 : index
      %160 = memref.load %arg3[%159, %c2_84] : memref<2x3xf32, #tpu.memory_space<smem>>
      %161 = vector.broadcast %160 : f32 to vector<1x1xf32>
      %162 = tpu.concatenate %155, %158, %161 in 0 : vector<1x1xf32>, vector<1x1xf32>, vector<1x1xf32> -> vector<3x1xf32>
      %c0_85 = arith.constant 0 : index
      %c0_86 = arith.constant 0 : index
      %163 = vector.load %arg16[%c0_85, %c0_86] : memref<3x256xf32, #tpu.memory_space<vmem>>, vector<3x256xf32>
      %164 = vector.broadcast %162 : vector<3x1xf32> to vector<3x256xf32>
      %165 = arith.mulf %163, %164 : vector<3x256xf32>
      %166 = arith.truncf %165 : vector<3x256xf32> to vector<3x256xbf16>
      %c0_87 = arith.constant 0 : index
      %c0_88 = arith.constant 0 : index
      %167 = vector.load %arg12[%c0_87, %c0_88] : memref<256x768xbf16, #tpu.memory_space<vmem>>, vector<256x768xbf16>
      %cst_89 = arith.constant dense<0.000000e+00> : vector<3x768xf32>
      %168 = tpu.matmul %166, %167, %cst_89 {dimension_numbers = #tpu.dot_dimension_numbers<[1], [0], [0], [1], [0, 0, 1, 1], [], []>} : vector<3x256xbf16>, vector<256x768xbf16>, vector<3x768xf32> -> vector<3x768xf32>
      %c0_90 = arith.constant 0 : index
      %c0_91 = arith.constant 0 : index
      %169 = vector.load %arg13[%c0_90, %c0_91] : memref<1x768xf32, #tpu.memory_space<vmem>>, vector<1x768xf32>
      %170 = vector.broadcast %169 : vector<1x768xf32> to vector<3x768xf32>
      %171 = arith.addf %168, %170 : vector<3x768xf32>
      %cst_92 = arith.constant 0.000000e+00 : f32
      %172 = vector.broadcast %cst_92 : f32 to vector<3x768xf32>
      %173 = arith.maximumf %171, %172 : vector<3x768xf32>
      %174 = arith.truncf %173 : vector<3x768xf32> to vector<3x768xbf16>
      %c0_93 = arith.constant 0 : index
      %c0_94 = arith.constant 0 : index
      %c0_95 = arith.constant 0 : index
      %175 = vector.load %arg15[%c0_93, %c0_94, %c0_95] : memref<1x3x768xbf16, #tpu.memory_space<vmem>>, vector<1x3x768xbf16>
      %176 = vector.shape_cast %175 : vector<1x3x768xbf16> to vector<3x768xbf16>
      %177 = vector.shape_cast %174 : vector<3x768xbf16> to vector<1x3x768xbf16>
      tpu.vector_store %arg15[%c0_93, %c0_94, %c0_95], %177 {strides = array<i32>} : memref<1x3x768xbf16, #tpu.memory_space<vmem>>, vector<1x3x768xbf16>,
    } else {
    }
    return
  }
  func.func @transform_0(%arg0: i32, %arg1: i32, %arg2: memref<2x12xi32, #tpu.memory_space<smem>>, %arg3: memref<2x3xf32, #tpu.memory_space<smem>>) -> (i32, i32, i32, i32) {
    %c0_i32 = arith.constant 0 : i32
    %c0_i32_0 = arith.constant 0 : i32
    %c0_i32_1 = arith.constant 0 : i32
    return %arg0, %arg1, %c0_i32, %c0_i32_0 : i32, i32, i32, i32
  }
  func.func @transform_1(%arg0: i32, %arg1: i32, %arg2: memref<2x12xi32, #tpu.memory_space<smem>>, %arg3: memref<2x3xf32, #tpu.memory_space<smem>>) -> (i32, i32, i32, i32) {
    %c1_i32 = arith.constant 1 : i32
    %0 = arith.addi %arg1, %c1_i32 : i32
    %c16_i32 = arith.constant 16 : i32
    %1 = arith.muli %c16_i32, %0 : i32
    %c0_i32 = arith.constant 0 : i32
    %c0_i32_0 = arith.constant 0 : i32
    %c0_i32_1 = arith.constant 0 : i32
    return %arg0, %1, %c0_i32, %c0_i32_0 : i32, i32, i32, i32
  }
  func.func @transform_2(%arg0: i32, %arg1: i32, %arg2: memref<2x12xi32, #tpu.memory_space<smem>>, %arg3: memref<2x3xf32, #tpu.memory_space<smem>>) -> (i32, i32, i32, i32) {
    %c0_i32 = arith.constant 0 : i32
    %c0_i32_0 = arith.constant 0 : i32
    %c0_i32_1 = arith.constant 0 : i32
    return %arg0, %arg1, %c0_i32, %c0_i32_0 : i32, i32, i32, i32
  }
  func.func @transform_3(%arg0: i32, %arg1: i32, %arg2: memref<2x12xi32, #tpu.memory_space<smem>>, %arg3: memref<2x3xf32, #tpu.memory_space<smem>>) -> (i32, i32, i32, i32) {
    %c1_i32 = arith.constant 1 : i32
    %0 = arith.addi %arg1, %c1_i32 : i32
    %c16_i32 = arith.constant 16 : i32
    %1 = arith.muli %c16_i32, %0 : i32
    %c0_i32 = arith.constant 0 : i32
    %c0_i32_0 = arith.constant 0 : i32
    %c0_i32_1 = arith.constant 0 : i32
    return %arg0, %1, %c0_i32, %c0_i32_0 : i32, i32, i32, i32
  }
  func.func @transform_4(%arg0: i32, %arg1: i32, %arg2: memref<2x12xi32, #tpu.memory_space<smem>>, %arg3: memref<2x3xf32, #tpu.memory_space<smem>>) -> (i32, i32, i32) {
    %c0_i32 = arith.constant 0 : i32
    %c0_i32_0 = arith.constant 0 : i32
    %c0_i32_1 = arith.constant 0 : i32
    %c0_i32_2 = arith.constant 0 : i32
    return %c0_i32, %c0_i32_0, %c0_i32_1 : i32, i32, i32
  }
  func.func @transform_5(%arg0: i32, %arg1: i32, %arg2: memref<2x12xi32, #tpu.memory_space<smem>>, %arg3: memref<2x3xf32, #tpu.memory_space<smem>>) -> (i32, i32) {
    %c0_i32 = arith.constant 0 : i32
    %c0_i32_0 = arith.constant 0 : i32
    %c0_i32_1 = arith.constant 0 : i32
    return %c0_i32, %c0_i32_0 : i32, i32
  }
  func.func @transform_6(%arg0: i32, %arg1: i32, %arg2: memref<2x12xi32, #tpu.memory_space<smem>>, %arg3: memref<2x3xf32, #tpu.memory_space<smem>>) -> (i32, i32) {
    %c0_i32 = arith.constant 0 : i32
    %c0_i32_0 = arith.constant 0 : i32
    %c0_i32_1 = arith.constant 0 : i32
    return %c0_i32, %c0_i32_0 : i32, i32
  }
  func.func @transform_7(%arg0: i32, %arg1: i32, %arg2: memref<2x12xi32, #tpu.memory_space<smem>>, %arg3: memref<2x3xf32, #tpu.memory_space<smem>>) -> (i32, i32) {
    %c0_i32 = arith.constant 0 : i32
    %c0_i32_0 = arith.constant 0 : i32
    %c0_i32_1 = arith.constant 0 : i32
    return %c0_i32, %c0_i32_0 : i32, i32
  }
  func.func @transform_8(%arg0: i32, %arg1: i32, %arg2: memref<2x12xi32, #tpu.memory_space<smem>>, %arg3: memref<2x3xf32, #tpu.memory_space<smem>>) -> (i32, i32) {
    %c0_i32 = arith.constant 0 : i32
    %c0_i32_0 = arith.constant 0 : i32
    %c0_i32_1 = arith.constant 0 : i32
    return %c0_i32, %c0_i32_0 : i32, i32
  }
  func.func @transform_9(%arg0: i32, %arg1: i32, %arg2: memref<2x12xi32, #tpu.memory_space<smem>>, %arg3: memref<2x3xf32, #tpu.memory_space<smem>>) -> (i32, i32) {
    %c0_i32 = arith.constant 0 : i32
    %c0_i32_0 = arith.constant 0 : i32
    %c0_i32_1 = arith.constant 0 : i32
    return %c0_i32, %c0_i32_0 : i32, i32
  }
  func.func @transform_10(%arg0: i32, %arg1: i32, %arg2: memref<2x12xi32, #tpu.memory_space<smem>>, %arg3: memref<2x3xf32, #tpu.memory_space<smem>>) -> (i32, i32, i32, i32) {
    %c0_i32 = arith.constant 0 : i32
    %c0_i32_0 = arith.constant 0 : i32
    %c0_i32_1 = arith.constant 0 : i32
    return %arg0, %arg1, %c0_i32, %c0_i32_0 : i32, i32, i32, i32
  }
  func.func @transform_11(%arg0: i32, %arg1: i32, %arg2: memref<2x12xi32, #tpu.memory_space<smem>>, %arg3: memref<2x3xf32, #tpu.memory_space<smem>>) -> (i32, i32, i32) {
    %c0_i32 = arith.constant 0 : i32
    %c0_i32_0 = arith.constant 0 : i32
    %c0_i32_1 = arith.constant 0 : i32
    return %arg0, %c0_i32, %c0_i32_0 : i32, i32, i32
  }
}

module attributes {stable_mosaic.version = 11 : i64} {
  func.func @_match_decode_kernel(%arg0: i32, %arg1: i32, %arg2: memref<1x64x256xbf16, #tpu.memory_space<vmem>>, %arg3: memref<1x9x256xbf16, #tpu.memory_space<vmem>>, %arg4: memref<48x9xf32, #tpu.memory_space<vmem>>, %arg5: memref<48x1xf32, #tpu.memory_space<vmem>>, %arg6: memref<48x1xf32, #tpu.memory_space<vmem>>, %arg7: memref<3x1x1xf32, #tpu.memory_space<vmem>>, %arg8: memref<1x3x64xf32, #tpu.memory_space<vmem>>) attributes {dimension_semantics = [#tpu.dimension_semantics<parallel>, #tpu.dimension_semantics<parallel>], iteration_bounds = array<i64: 2, 1>, scalar_prefetch = 0 : i64, scratch_operands = 0 : i64, tpu.core_type = #tpu.core_type<tc>, window_params = [{transform_indices = @transform_0, window_bounds = array<i64: 1, 64, 256>}, {transform_indices = @transform_1, window_bounds = array<i64: 1, 9, 256>}, {pipeline_mode = #tpu.pipeline_mode<synchronous>, transform_indices = @transform_2, window_bounds = array<i64: 48, 9>}, {pipeline_mode = #tpu.pipeline_mode<synchronous>, transform_indices = @transform_3, window_bounds = array<i64: 48, 1>}, {pipeline_mode = #tpu.pipeline_mode<synchronous>, transform_indices = @transform_4, window_bounds = array<i64: 48, 1>}, {pipeline_mode = #tpu.pipeline_mode<synchronous>, transform_indices = @transform_5, window_bounds = array<i64: 3, 1, 1>}, {transform_indices = @transform_6, window_bounds = array<i64: 1, 3, 64>}]} {
    %c0 = arith.constant 0 : index
    %c0_0 = arith.constant 0 : index
    %c0_1 = arith.constant 0 : index
    %0 = vector.load %arg2[%c0, %c0_0, %c0_1] : memref<1x64x256xbf16, #tpu.memory_space<vmem>>, vector<1x64x256xbf16>
    %1 = vector.shape_cast %0 : vector<1x64x256xbf16> to vector<64x256xbf16>
    %c0_2 = arith.constant 0 : index
    %c0_3 = arith.constant 0 : index
    %c0_4 = arith.constant 0 : index
    %2 = vector.load %arg3[%c0_2, %c0_3, %c0_4] : memref<1x9x256xbf16, #tpu.memory_space<vmem>>, vector<1x9x256xbf16>
    %3 = vector.shape_cast %2 : vector<1x9x256xbf16> to vector<9x256xbf16>
    %cst = arith.constant dense<0.000000e+00> : vector<9x64xf32>
    %4 = tpu.matmul %3, %1, %cst {dimension_numbers = #tpu.dot_dimension_numbers<[1], [1], [0], [0], [0, 0, 1, 0], [], []>} : vector<9x256xbf16>, vector<64x256xbf16>, vector<9x64xf32> -> vector<9x64xf32>
    %cst_5 = arith.constant 6.250000e-02 : f32
    %5 = vector.broadcast %cst_5 : f32 to vector<9x64xf32>
    %6 = arith.mulf %4, %5 : vector<9x64xf32>
    %c0_6 = arith.constant 0 : index
    %c0_7 = arith.constant 0 : index
    %7 = vector.load %arg4[%c0_6, %c0_7] : memref<48x9xf32, #tpu.memory_space<vmem>>, vector<48x9xf32>
    %cst_8 = arith.constant dense<0.000000e+00> : vector<48x64xf32>
    %8 = tpu.matmul %7, %6, %cst_8 {dimension_numbers = #tpu.dot_dimension_numbers<[1], [0], [0], [1], [0, 0, 1, 1], [], []>} : vector<48x9xf32>, vector<9x64xf32>, vector<48x64xf32> -> vector<48x64xf32>
    %c0_9 = arith.constant 0 : index
    %c0_10 = arith.constant 0 : index
    %9 = vector.load %arg5[%c0_9, %c0_10] : memref<48x1xf32, #tpu.memory_space<vmem>>, vector<48x1xf32>
    %10 = vector.broadcast %9 : vector<48x1xf32> to vector<48x64xf32>
    %11 = arith.addf %8, %10 : vector<48x64xf32>
    %cst_11 = arith.constant 0.000000e+00 : f32
    %12 = vector.broadcast %cst_11 : f32 to vector<48x64xf32>
    %13 = arith.maximumf %11, %12 : vector<48x64xf32>
    %c0_12 = arith.constant 0 : index
    %c0_13 = arith.constant 0 : index
    %14 = vector.load %arg6[%c0_12, %c0_13] : memref<48x1xf32, #tpu.memory_space<vmem>>, vector<48x1xf32>
    %15 = vector.broadcast %14 : vector<48x1xf32> to vector<48x64xf32>
    %16 = arith.mulf %13, %15 : vector<48x64xf32>
    %17 = vector.extract_strided_slice %16 {offsets = [0, 0], sizes = [16, 64], strides = [1, 1]} : vector<48x64xf32> to vector<16x64xf32>
    %cst_14 = arith.constant dense<0.000000e+00> : vector<64xf32>
    %18 = vector.multi_reduction <add>, %17, %cst_14 [0] : vector<16x64xf32> to vector<64xf32>
    %19 = vector.shape_cast %18 : vector<64xf32> to vector<1x64xf32>
    %c0_15 = arith.constant 0 : index
    %c0_16 = arith.constant 0 : index
    %c0_17 = arith.constant 0 : index
    %20 = vector.load %arg7[%c0_15, %c0_16, %c0_17] : memref<3x1x1xf32, #tpu.memory_space<vmem>>, vector<1x1x1xf32>
    %21 = vector.shape_cast %20 : vector<1x1x1xf32> to vector<1x1xf32>
    %22 = vector.broadcast %21 : vector<1x1xf32> to vector<1x64xf32>
    %23 = arith.addf %19, %22 : vector<1x64xf32>
    %cst_18 = arith.constant 0.000000e+00 : f32
    %24 = vector.broadcast %cst_18 : f32 to vector<1x64xf32>
    %25 = arith.maximumf %23, %24 : vector<1x64xf32>
    %c0_19 = arith.constant 0 : index
    %c0_20 = arith.constant 0 : index
    %c0_21 = arith.constant 0 : index
    %26 = vector.load %arg8[%c0_19, %c0_20, %c0_21] : memref<1x3x64xf32, #tpu.memory_space<vmem>>, vector<1x1x64xf32>
    %27 = vector.shape_cast %26 : vector<1x1x64xf32> to vector<1x64xf32>
    %28 = vector.shape_cast %25 : vector<1x64xf32> to vector<1x1x64xf32>
    tpu.vector_store %arg8[%c0_19, %c0_20, %c0_21], %28 {strides = array<i32>} : memref<1x3x64xf32, #tpu.memory_space<vmem>>, vector<1x1x64xf32>,
    %29 = vector.extract_strided_slice %16 {offsets = [16, 0], sizes = [16, 64], strides = [1, 1]} : vector<48x64xf32> to vector<16x64xf32>
    %cst_22 = arith.constant dense<0.000000e+00> : vector<64xf32>
    %30 = vector.multi_reduction <add>, %29, %cst_22 [0] : vector<16x64xf32> to vector<64xf32>
    %31 = vector.shape_cast %30 : vector<64xf32> to vector<1x64xf32>
    %c1 = arith.constant 1 : index
    %c0_23 = arith.constant 0 : index
    %c0_24 = arith.constant 0 : index
    %32 = vector.load %arg7[%c1, %c0_23, %c0_24] : memref<3x1x1xf32, #tpu.memory_space<vmem>>, vector<1x1x1xf32>
    %33 = vector.shape_cast %32 : vector<1x1x1xf32> to vector<1x1xf32>
    %34 = vector.broadcast %33 : vector<1x1xf32> to vector<1x64xf32>
    %35 = arith.addf %31, %34 : vector<1x64xf32>
    %cst_25 = arith.constant 0.000000e+00 : f32
    %36 = vector.broadcast %cst_25 : f32 to vector<1x64xf32>
    %37 = arith.maximumf %35, %36 : vector<1x64xf32>
    %c0_26 = arith.constant 0 : index
    %c1_27 = arith.constant 1 : index
    %c0_28 = arith.constant 0 : index
    %38 = vector.load %arg8[%c0_26, %c1_27, %c0_28] : memref<1x3x64xf32, #tpu.memory_space<vmem>>, vector<1x1x64xf32>
    %39 = vector.shape_cast %38 : vector<1x1x64xf32> to vector<1x64xf32>
    %40 = vector.shape_cast %37 : vector<1x64xf32> to vector<1x1x64xf32>
    tpu.vector_store %arg8[%c0_26, %c1_27, %c0_28], %40 {strides = array<i32>} : memref<1x3x64xf32, #tpu.memory_space<vmem>>, vector<1x1x64xf32>,
    %41 = vector.extract_strided_slice %16 {offsets = [32, 0], sizes = [16, 64], strides = [1, 1]} : vector<48x64xf32> to vector<16x64xf32>
    %cst_29 = arith.constant dense<0.000000e+00> : vector<64xf32>
    %42 = vector.multi_reduction <add>, %41, %cst_29 [0] : vector<16x64xf32> to vector<64xf32>
    %43 = vector.shape_cast %42 : vector<64xf32> to vector<1x64xf32>
    %c2 = arith.constant 2 : index
    %c0_30 = arith.constant 0 : index
    %c0_31 = arith.constant 0 : index
    %44 = vector.load %arg7[%c2, %c0_30, %c0_31] : memref<3x1x1xf32, #tpu.memory_space<vmem>>, vector<1x1x1xf32>
    %45 = vector.shape_cast %44 : vector<1x1x1xf32> to vector<1x1xf32>
    %46 = vector.broadcast %45 : vector<1x1xf32> to vector<1x64xf32>
    %47 = arith.addf %43, %46 : vector<1x64xf32>
    %cst_32 = arith.constant 0.000000e+00 : f32
    %48 = vector.broadcast %cst_32 : f32 to vector<1x64xf32>
    %49 = arith.maximumf %47, %48 : vector<1x64xf32>
    %c0_33 = arith.constant 0 : index
    %c2_34 = arith.constant 2 : index
    %c0_35 = arith.constant 0 : index
    %50 = vector.load %arg8[%c0_33, %c2_34, %c0_35] : memref<1x3x64xf32, #tpu.memory_space<vmem>>, vector<1x1x64xf32>
    %51 = vector.shape_cast %50 : vector<1x1x64xf32> to vector<1x64xf32>
    %52 = vector.shape_cast %49 : vector<1x64xf32> to vector<1x1x64xf32>
    tpu.vector_store %arg8[%c0_33, %c2_34, %c0_35], %52 {strides = array<i32>} : memref<1x3x64xf32, #tpu.memory_space<vmem>>, vector<1x1x64xf32>,
    return
  }
  func.func @transform_0(%arg0: i32, %arg1: i32) -> (i32, i32, i32) {
    %c0_i32 = arith.constant 0 : i32
    %c0_i32_0 = arith.constant 0 : i32
    return %arg0, %arg1, %c0_i32 : i32, i32, i32
  }
  func.func @transform_1(%arg0: i32, %arg1: i32) -> (i32, i32, i32) {
    %c0_i32 = arith.constant 0 : i32
    %c0_i32_0 = arith.constant 0 : i32
    %c0_i32_1 = arith.constant 0 : i32
    return %arg0, %c0_i32, %c0_i32_0 : i32, i32, i32
  }
  func.func @transform_2(%arg0: i32, %arg1: i32) -> (i32, i32) {
    %c0_i32 = arith.constant 0 : i32
    %c0_i32_0 = arith.constant 0 : i32
    %c0_i32_1 = arith.constant 0 : i32
    return %c0_i32, %c0_i32_0 : i32, i32
  }
  func.func @transform_3(%arg0: i32, %arg1: i32) -> (i32, i32) {
    %c0_i32 = arith.constant 0 : i32
    %c0_i32_0 = arith.constant 0 : i32
    %c0_i32_1 = arith.constant 0 : i32
    return %c0_i32, %c0_i32_0 : i32, i32
  }
  func.func @transform_4(%arg0: i32, %arg1: i32) -> (i32, i32) {
    %c0_i32 = arith.constant 0 : i32
    %c0_i32_0 = arith.constant 0 : i32
    %c0_i32_1 = arith.constant 0 : i32
    return %c0_i32, %c0_i32_0 : i32, i32
  }
  func.func @transform_5(%arg0: i32, %arg1: i32) -> (i32, i32, i32) {
    %c0_i32 = arith.constant 0 : i32
    %c0_i32_0 = arith.constant 0 : i32
    %c0_i32_1 = arith.constant 0 : i32
    %c0_i32_2 = arith.constant 0 : i32
    return %c0_i32, %c0_i32_0, %c0_i32_1 : i32, i32, i32
  }
  func.func @transform_6(%arg0: i32, %arg1: i32) -> (i32, i32, i32) {
    %c0_i32 = arith.constant 0 : i32
    %c0_i32_0 = arith.constant 0 : i32
    return %arg0, %c0_i32, %arg1 : i32, i32, i32
  }
}

</mosaic_0001>

<bundles_post_ra>
// kernel: fsc_forward.3
= control target key start
LH: loop header
LB: loop body
LE: loop exit
PB: predicated region body
PF: predicated region fallthrough
CT: control target
= control target key end

     0   :  { %s1100_s12 = smov 0   ;;  %s1102_s13 = smov 0   ;;  %s1283_s0 = inlined_call_operand.vmem [shape: bf16[2,256,27], index: 0, kind: input, shape index: {}]   ;;  %s1284_s1 = inlined_call_operand.vmem [shape: bf16[27,32], index: 1, kind: input, shape index: {}]   ;;  %s1285_s2 = inlined_call_operand.vmem [shape: f32[1,32], index: 2, kind: input, shape index: {}]   ;;  %s1286_s3 = inlined_call_operand.vmem [shape: bf16[2,256,32], index: 3, kind: output, shape index: {}]  }
   0x1   :  { %s1104_s14 = smov 0  }
   0x2 LB: > { %s25_s15 = sadd.s32 1, %s1073_s13  ;;  %p846_p0 = scmp.ge.s32.totalorder %s1077_s14, 1  ;;  %s1077_s14 = sphi %s1104_s14, %s13_s14   ;;  %s1073_s13 = sphi %s1102_s13, %s1288_s13   ;;  %s1069_s12 = sphi %s1100_s12, %s1287_s12  }
   0x3   : > { %p27_p1 = scmp.ge.s32.totalorder %s25_s15, 2  ;;  %p158_p2 = scmp.lt.s32.totalorder %s1077_s14, 3 }
   0x5   : > { %s1290_s15 = smov (%p27_p1, %s25_s15), 0  ;;  %p159_p3 = pnand %p846_p0, %p158_p2 }
   0x6   : > { %p191_p4 = scmp.lt.s32.totalorder (!%p159_p3), %s1069_s12, 1 }
   0x7   : > { %162 = sbr.rel (%p159_p3) target bundleno = 256 (0x100), region = 32 }
   0xc   : > { %v1037_v0 = vld [vmem:[%s1284_s1 + $0x8] sm:$0x3f]   ;;  %vm394_vm0 = vcmask 1044480   ;;  %vm395_vm1 = vcmask 1045504   ;;  %v1079_v1 = vmov 65535   ;;  %v1038_v5 = vld [vmem:[%s1284_s1] sm:$0xff]  }
   0xd   : > { %v396_v2 = vsel %vm394_vm0, 4294967295, %v1079_v1  ;;  %s1292_s12 = smov (!%p191_p4, %s1069_s12), 1  ;;  %vm345_vm2 = vcmask 220160   ;;  %v1169_v22 = vld [vmem:[%s1285_s2] ss:$0 sm:$0xff]  ;;  %vm722_vm3 = vcmask 257024  }
   0xe   : > { %v397_v3 = vsel %vm395_vm1, %v396_v2, 0  ;;  %s920_s20 = sshll.u32 %s1292_s12, 7 }
   0xf   : > { %v399_v4 = vand.u32 %v1037_v0, %v397_v3  ;;  %s1132_s23 = scalar_lea.vmem %s1283_s0, %s920_s20  ;;  %s1180_s28 = scalar_lea.vmem %s1286_s3, %s920_s20 }
  0x10   : > { %v1039_v6 = vld [vmem:[%s1132_s23] sm:$0xff]   ;;  %v1041_v8 = vld [vmem:[%s1132_s23 + $0x8] sm:$0xff]   ;;  %v1043_v10 = vld [vmem:[%s1132_s23 + $0x10] sm:$0xff]  }
  0x11   : > { %972 = vmatprep.subr.bf16.mxu0 %v399_v4  ;;  %1008 = vmatprep.subr.bf16.mxu1 %v399_v4  ;;  %v1040_v7 = vld [vmem:[%s1132_s23 + $0x40] sm:$0xff]   ;;  %v1042_v9 = vld [vmem:[%s1132_s23 + $0x48] sm:$0xff]   ;;  %v1044_v11 = vld [vmem:[%s1132_s23 + $0x50] sm:$0xff]  }
  0x12   : > { %973 = vmatpush3.bf16.msra.mxu0 %v399_v4  ;;  %1010 = vmatpush3.bf16.msra.mxu1 %v399_v4  ;;  %v1045_v12 = vld [vmem:[%s1132_s23 + $0x18] sm:$0xff]   ;;  %v1047_v14 = vld [vmem:[%s1132_s23 + $0x20] sm:$0xff]   ;;  %v1049_v16 = vld [vmem:[%s1132_s23 + $0x28] sm:$0xff]  }
  0x13   : > { %974 = vmatprep.subr.bf16.mxu0 %v1038_v5  ;;  %1009 = vmatprep.subr.bf16.mxu1 %v1038_v5  ;;  %v1046_v13 = vld [vmem:[%s1132_s23 + $0x58] sm:$0xff]   ;;  %v1048_v15 = vld [vmem:[%s1132_s23 + $0x60] sm:$0xff]   ;;  %v1050_v17 = vld [vmem:[%s1132_s23 + $0x68] sm:$0xff]  }
  0x14   : > { %976 = vmatprep.mubr.msk.bf16.mxu0 %vm345_vm2, %v1039_v6  ;;  %992 = vmatprep.mubr.msk.bf16.mxu1 %vm345_vm2, %v1040_v7  ;;  %v1051_v18 = vld [vmem:[%s1132_s23 + $0x30] sm:$0xff]   ;;  %v1053_v20 = vld [vmem:[%s1132_s23 + $0x38] sm:$0xff]  }
  0x15   : > { %v1052_v19 = vld [vmem:[%s1132_s23 + $0x70] sm:$0xff]   ;;  %v1054_v21 = vld [vmem:[%s1132_s23 + $0x78] sm:$0xff]  }
  0x16   : > { %975 = vmatpush3.bf16.msra.mxu0 %v1038_v5  ;;  %1011 = vmatpush3.bf16.msra.mxu1 %v1038_v5 }
  0x19   : > { %977 = vmatmul.mubr.msk.bf16.vlgmr.msra.gmra.mxu0 %vm345_vm2, %v1041_v8  ;;  %993 = vmatmul.mubr.msk.bf16.vlgmr.msra.gmra.mxu1 %vm345_vm2, %v1042_v9 }
  0x1a   : > { %980 = vmatprep.mubr.msk.bf16.mxu0 %vm345_vm2, %v1043_v10  ;;  %996 = vmatprep.mubr.msk.bf16.mxu1 %vm345_vm2, %v1044_v11 }
  0x21   : > { %981 = vmatmul.mubr.msk.bf16.gmra.mxu0 %vm345_vm2, %v1045_v12  ;;  %997 = vmatmul.mubr.msk.bf16.gmra.mxu1 %vm345_vm2, %v1046_v13 }
  0x22   : > { %984 = vmatprep.mubr.msk.bf16.mxu0 %vm345_vm2, %v1047_v14  ;;  %1000 = vmatprep.mubr.msk.bf16.mxu1 %vm345_vm2, %v1048_v15 }
  0x29   : > { %985 = vmatmul.mubr.msk.bf16.gmra.mxu0 %vm345_vm2, %v1049_v16  ;;  %1001 = vmatmul.mubr.msk.bf16.gmra.mxu1 %vm345_vm2, %v1050_v17 }
  0x2a   : > { %988 = vmatprep.mubr.msk.bf16.mxu0 %vm345_vm2, %v1051_v18  ;;  %1004 = vmatprep.mubr.msk.bf16.mxu1 %vm345_vm2, %v1052_v19 }
  0x31   : > { %989 = vmatmul.mubr.msk.bf16.gmra.mxu0 %vm345_vm2, %v1053_v20  ;;  %1005 = vmatmul.mubr.msk.bf16.gmra.mxu1 %vm345_vm2, %v1054_v21 }
  0xd9   : > { %v978_v23 = vpop.f32.mrf.mxu0  ;;  %v994_v24 = vpop.f32.mrf.mxu1 }
  0xda   : > { %v444_v25 = vadd.f32 %v978_v23, %v1169_v22  ;;  %v508_v26 = vadd.f32 %v994_v24, %v1169_v22 }
  0xdb   : > { %v435_v27 = vpop.f32.mrf.mxu0  ;;  %v499_v28 = vpop.f32.mrf.mxu1 }
  0xdc   : > { %v564_v29 = vmax.f32 %v444_v25, 0.0  ;;  %v580_v30 = vmax.f32 %v508_v26, 0.0  ;;  %v436_v31 = vadd.f32 %v1169_v22, %v435_v27  ;;  %v500_v32 = vadd.f32 %v1169_v22, %v499_v28 }
  0xdd   : > { %v979_v33 = vpop.f32.mrf.mxu0  ;;  %v995_v34 = vpop.f32.mrf.mxu1 }
  0xde   : > { %v924_v35 = vpack.c.bf16 %v564_v29, %v564_v29  ;;  %v940_v36 = vpack.c.bf16 %v580_v30, %v580_v30  ;;  %v562_v37 = vmax.f32 %v436_v31, 0.0  ;;  %v578_v38 = vmax.f32 %v500_v32, 0.0 }
  0xdf   : > { %v447_v39 = vadd.f32 %v979_v33, %v1169_v22  ;;  %v511_v40 = vadd.f32 %v995_v34, %v1169_v22  ;;  %v438_v41 = vpop.f32.mrf.mxu0  ;;  %v502_v42 = vpop.f32.mrf.mxu1 }
  0xe0   : > { %725 = vst.msk [vmem:[%s1180_s28 + $0x8] sm:$0xf] %vm722_vm3, %v924_v35  ;;  %741 = vst.msk [vmem:[%s1180_s28 + $0x48] sm:$0xf] %vm722_vm3, %v940_v36  ;;  %v922_v43 = vpack.c.bf16 %v562_v37, %v562_v37  ;;  %v938_v44 = vpack.c.bf16 %v578_v38, %v578_v38  ;;  %v439_v45 = vadd.f32 %v1169_v22, %v438_v41 }
  0xe1   : > { %v503_v46 = vadd.f32 %v1169_v22, %v502_v42  ;;  %v565_v47 = vmax.f32 %v447_v39, 0.0  ;;  %v581_v48 = vmax.f32 %v511_v40, 0.0  ;;  %v982_v49 = vpop.f32.mrf.mxu0  ;;  %v998_v50 = vpop.f32.mrf.mxu1 }
  0xe2   : > { %723 = vst.msk [vmem:[%s1180_s28] sm:$0xf] %vm722_vm3, %v922_v43  ;;  %739 = vst.msk [vmem:[%s1180_s28 + $0x40] sm:$0xf] %vm722_vm3, %v938_v44  ;;  %v563_v51 = vmax.f32 %v439_v45, 0.0  ;;  %v460_v53 = vadd.f32 %v982_v49, %v1169_v22  ;;  %v524_v54 = vadd.f32 %v998_v50, %v1169_v22 }
  0xe3   : > { %v579_v52 = vmax.f32 %v503_v46, 0.0  ;;  %v925_v55 = vpack.c.bf16 %v565_v47, %v565_v47  ;;  %v941_v56 = vpack.c.bf16 %v581_v48, %v581_v48  ;;  %v451_v57 = vpop.f32.mrf.mxu0  ;;  %v515_v58 = vpop.f32.mrf.mxu1 }
  0xe4   : > { %v923_v59 = vpack.c.bf16 %v563_v51, %v563_v51  ;;  %v568_v61 = vmax.f32 %v460_v53, 0.0  ;;  %v584_v62 = vmax.f32 %v524_v54, 0.0  ;;  %v452_v63 = vadd.f32 %v1169_v22, %v451_v57 }
  0xe5   : > { %v939_v60 = vpack.c.bf16 %v579_v52, %v579_v52  ;;  %726 = vst.msk [vmem:[%s1180_s28 + $0xc] sm:$0xf] %vm722_vm3, %v925_v55  ;;  %742 = vst.msk [vmem:[%s1180_s28 + $0x4c] sm:$0xf] %vm722_vm3, %v941_v56  ;;  %v516_v0 = vadd.f32 %v1169_v22, %v515_v58  ;;  %v983_v1 = vpop.f32.mrf.mxu0  ;;  %v999_v2 = vpop.f32.mrf.mxu1 }
  0xe6   : > { %724 = vst.msk [vmem:[%s1180_s28 + $0x4] sm:$0xf] %vm722_vm3, %v923_v59  ;;  %v928_v3 = vpack.c.bf16 %v568_v61, %v568_v61  ;;  %v944_v4 = vpack.c.bf16 %v584_v62, %v584_v62  ;;  %v463_v5 = vadd.f32 %v983_v1, %v1169_v22  ;;  %v527_v6 = vadd.f32 %v999_v2, %v1169_v22 }
  0xe7   : > { %740 = vst.msk [vmem:[%s1180_s28 + $0x44] sm:$0xf] %vm722_vm3, %v939_v60  ;;  %v566_v7 = vmax.f32 %v452_v63, 0.0  ;;  %v582_v8 = vmax.f32 %v516_v0, 0.0  ;;  %v454_v9 = vpop.f32.mrf.mxu0  ;;  %v518_v10 = vpop.f32.mrf.mxu1 }
  0xe8   : > { %729 = vst.msk [vmem:[%s1180_s28 + $0x18] sm:$0xf] %vm722_vm3, %v928_v3  ;;  %745 = vst.msk [vmem:[%s1180_s28 + $0x58] sm:$0xf] %vm722_vm3, %v944_v4  ;;  %v569_v11 = vmax.f32 %v463_v5, 0.0  ;;  %v585_v12 = vmax.f32 %v527_v6, 0.0  ;;  %v455_v13 = vadd.f32 %v1169_v22, %v454_v9  ;;  %v519_v14 = vadd.f32 %v1169_v22, %v518_v10 }
  0xe9   : > { %v926_v15 = vpack.c.bf16 %v566_v7, %v566_v7  ;;  %v942_v16 = vpack.c.bf16 %v582_v8, %v582_v8  ;;  %v986_v17 = vpop.f32.mrf.mxu0  ;;  %v1002_v18 = vpop.f32.mrf.mxu1 }
  0xea   : > { %v929_v19 = vpack.c.bf16 %v569_v11, %v569_v11  ;;  %v945_v20 = vpack.c.bf16 %v585_v12, %v585_v12  ;;  %v567_v21 = vmax.f32 %v455_v13, 0.0  ;;  %v583_v23 = vmax.f32 %v519_v14, 0.0 }
  0xeb   : > { %727 = vst.msk [vmem:[%s1180_s28 + $0x10] sm:$0xf] %vm722_vm3, %v926_v15  ;;  %743 = vst.msk [vmem:[%s1180_s28 + $0x50] sm:$0xf] %vm722_vm3, %v942_v16  ;;  %v476_v24 = vadd.f32 %v986_v17, %v1169_v22  ;;  %v540_v25 = vadd.f32 %v1002_v18, %v1169_v22  ;;  %v467_v26 = vpop.f32.mrf.mxu0  ;;  %v531_v27 = vpop.f32.mrf.mxu1 }
  0xec   : > { %730 = vst.msk [vmem:[%s1180_s28 + $0x1c] sm:$0xf] %vm722_vm3, %v929_v19  ;;  %746 = vst.msk [vmem:[%s1180_s28 + $0x5c] sm:$0xf] %vm722_vm3, %v945_v20  ;;  %v927_v28 = vpack.c.bf16 %v567_v21, %v567_v21  ;;  %v943_v29 = vpack.c.bf16 %v583_v23, %v583_v23  ;;  %v468_v30 = vadd.f32 %v1169_v22, %v467_v26 }
  0xed   : > { %v532_v31 = vadd.f32 %v1169_v22, %v531_v27  ;;  %v572_v32 = vmax.f32 %v476_v24, 0.0  ;;  %v588_v33 = vmax.f32 %v540_v25, 0.0  ;;  %v987_v34 = vpop.f32.mrf.mxu0  ;;  %v1003_v35 = vpop.f32.mrf.mxu1 }
  0xee   : > { %728 = vst.msk [vmem:[%s1180_s28 + $0x14] sm:$0xf] %vm722_vm3, %v927_v28  ;;  %744 = vst.msk [vmem:[%s1180_s28 + $0x54] sm:$0xf] %vm722_vm3, %v943_v29  ;;  %v570_v36 = vmax.f32 %v468_v30, 0.0  ;;  %v479_v38 = vadd.f32 %v987_v34, %v1169_v22  ;;  %v543_v39 = vadd.f32 %v1003_v35, %v1169_v22 }
  0xef   : > { %v586_v37 = vmax.f32 %v532_v31, 0.0  ;;  %v932_v40 = vpack.c.bf16 %v572_v32, %v572_v32  ;;  %v948_v41 = vpack.c.bf16 %v588_v33, %v588_v33  ;;  %v470_v42 = vpop.f32.mrf.mxu0  ;;  %v534_v43 = vpop.f32.mrf.mxu1 }
  0xf0   : > { %v930_v44 = vpack.c.bf16 %v570_v36, %v570_v36  ;;  %v573_v46 = vmax.f32 %v479_v38, 0.0  ;;  %v589_v47 = vmax.f32 %v543_v39, 0.0  ;;  %v471_v48 = vadd.f32 %v1169_v22, %v470_v42 }
  0xf1   : > { %v946_v45 = vpack.c.bf16 %v586_v37, %v586_v37  ;;  %733 = vst.msk [vmem:[%s1180_s28 + $0x28] sm:$0xf] %vm722_vm3, %v932_v40  ;;  %749 = vst.msk [vmem:[%s1180_s28 + $0x68] sm:$0xf] %vm722_vm3, %v948_v41  ;;  %v535_v49 = vadd.f32 %v1169_v22, %v534_v43  ;;  %v990_v50 = vpop.f32.mrf.mxu0  ;;  %v1006_v51 = vpop.f32.mrf.mxu1 }
  0xf2   : > { %731 = vst.msk [vmem:[%s1180_s28 + $0x20] sm:$0xf] %vm722_vm3, %v930_v44  ;;  %v933_v52 = vpack.c.bf16 %v573_v46, %v573_v46  ;;  %v949_v53 = vpack.c.bf16 %v589_v47, %v589_v47  ;;  %v492_v54 = vadd.f32 %v990_v50, %v1169_v22  ;;  %v556_v55 = vadd.f32 %v1006_v51, %v1169_v22 }
  0xf3   : > { %747 = vst.msk [vmem:[%s1180_s28 + $0x60] sm:$0xf] %vm722_vm3, %v946_v45  ;;  %v571_v56 = vmax.f32 %v471_v48, 0.0  ;;  %v587_v57 = vmax.f32 %v535_v49, 0.0  ;;  %v483_v58 = vpop.f32.mrf.mxu0  ;;  %v547_v59 = vpop.f32.mrf.mxu1 }
  0xf4   : > { %734 = vst.msk [vmem:[%s1180_s28 + $0x2c] sm:$0xf] %vm722_vm3, %v933_v52  ;;  %750 = vst.msk [vmem:[%s1180_s28 + $0x6c] sm:$0xf] %vm722_vm3, %v949_v53  ;;  %v576_v60 = vmax.f32 %v492_v54, 0.0  ;;  %v592_v61 = vmax.f32 %v556_v55, 0.0  ;;  %v484_v62 = vadd.f32 %v1169_v22, %v483_v58  ;;  %v548_v63 = vadd.f32 %v1169_v22, %v547_v59 }
  0xf5   : > { %v931_v0 = vpack.c.bf16 %v571_v56, %v571_v56  ;;  %v947_v1 = vpack.c.bf16 %v587_v57, %v587_v57  ;;  %v991_v2 = vpop.f32.mrf.mxu0  ;;  %v1007_v3 = vpop.f32.mrf.mxu1 }
  0xf6   : > { %v936_v4 = vpack.c.bf16 %v576_v60, %v576_v60  ;;  %v952_v5 = vpack.c.bf16 %v592_v61, %v592_v61  ;;  %v574_v6 = vmax.f32 %v484_v62, 0.0  ;;  %v590_v7 = vmax.f32 %v548_v63, 0.0 }
  0xf7   : > { %732 = vst.msk [vmem:[%s1180_s28 + $0x24] sm:$0xf] %vm722_vm3, %v931_v0  ;;  %748 = vst.msk [vmem:[%s1180_s28 + $0x64] sm:$0xf] %vm722_vm3, %v947_v1  ;;  %v495_v8 = vadd.f32 %v991_v2, %v1169_v22  ;;  %v559_v9 = vadd.f32 %v1007_v3, %v1169_v22  ;;  %v486_v10 = vpop.f32.mrf.mxu0  ;;  %v550_v11 = vpop.f32.mrf.mxu1 }
  0xf8   : > { %737 = vst.msk [vmem:[%s1180_s28 + $0x38] sm:$0xf] %vm722_vm3, %v936_v4  ;;  %753 = vst.msk [vmem:[%s1180_s28 + $0x78] sm:$0xf] %vm722_vm3, %v952_v5  ;;  %v934_v12 = vpack.c.bf16 %v574_v6, %v574_v6  ;;  %v950_v13 = vpack.c.bf16 %v590_v7, %v590_v7  ;;  %v487_v14 = vadd.f32 %v1169_v22, %v486_v10 }
  0xf9   : > { %v551_v15 = vadd.f32 %v1169_v22, %v550_v11  ;;  %v577_v16 = vmax.f32 %v495_v8, 0.0  ;;  %v593_v17 = vmax.f32 %v559_v9, 0.0 }
  0xfa   : > { %735 = vst.msk [vmem:[%s1180_s28 + $0x30] sm:$0xf] %vm722_vm3, %v934_v12  ;;  %751 = vst.msk [vmem:[%s1180_s28 + $0x70] sm:$0xf] %vm722_vm3, %v950_v13  ;;  %v575_v18 = vmax.f32 %v487_v14, 0.0 }
  0xfb   : > { %v591_v19 = vmax.f32 %v551_v15, 0.0  ;;  %v937_v20 = vpack.c.bf16 %v577_v16, %v577_v16  ;;  %v953_v21 = vpack.c.bf16 %v593_v17, %v593_v17 }
  0xfc   : > { %v935_v23 = vpack.c.bf16 %v575_v18, %v575_v18 }
  0xfd   : > { %v951_v24 = vpack.c.bf16 %v591_v19, %v591_v19  ;;  %738 = vst.msk [vmem:[%s1180_s28 + $0x3c] sm:$0xf] %vm722_vm3, %v937_v20  ;;  %754 = vst.msk [vmem:[%s1180_s28 + $0x7c] sm:$0xf] %vm722_vm3, %v953_v21 }
  0xfe   : > { %736 = vst.msk [vmem:[%s1180_s28 + $0x34] sm:$0xf] %vm722_vm3, %v935_v23 }
  0xff   : > { %752 = vst.msk [vmem:[%s1180_s28 + $0x74] sm:$0xf] %vm722_vm3, %v951_v24 }
 0x100 PF: > { %s13_s14 = sadd.s32 1, %s1077_s14   ;;  %s1287_s12 = smov %s1073_s13 }
 0x101   : > { %p10_p5 = scmp.ge.s32.totalorder %s13_s14, 4   ;;  %s1288_s13 = smov %s1290_s15 }
 0x103   :  { %12 = sbr.rel (!%p10_p5) target bundleno = 2 (0x2), region = 62 }

// kernel: fsc_forward.5
= control target key start
LH: loop header
LB: loop body
LE: loop exit
PB: predicated region body
PF: predicated region fallthrough
CT: control target
= control target key end

     0   :  { %s939_s21 = smov 0   ;;  %s941_s22 = smov 0   ;;  %s1055_s0 = inlined_call_operand.vmem [shape: bf16[2,64,256], index: 0, kind: input, shape index: {}]   ;;  %s1056_s1 = inlined_call_operand.vmem [shape: bf16[2,9,256], index: 1, kind: input, shape index: {}]   ;;  %s1057_s2 = inlined_call_operand.vmem [shape: f32[48,9], index: 2, kind: input, shape index: {}]   ;;  %s1058_s3 = inlined_call_operand.vmem [shape: f32[48,1], index: 3, kind: input, shape index: {}]   ;;  %s1059_s4 = inlined_call_operand.vmem [shape: f32[48,1], index: 4, kind: input, shape index: {}]   ;;  %s1060_s5 = inlined_call_operand.vmem [shape: f32[3,1,1], index: 5, kind: input, shape index: {}]   ;;  %s1061_s6 = inlined_call_operand.vmem [shape: f32[2,3,64], index: 6, kind: output, shape index: {}]  }
   0x1   :  { %s943_s23 = smov 0  }
   0x2 LB: > { %s28_s24 = sadd.s32 1, %s897_s22  ;;  %p787_p0 = scmp.ge.s32.totalorder %s901_s23, 1  ;;  %s901_s23 = sphi %s943_s23, %s16_s23   ;;  %s897_s22 = sphi %s941_s22, %s1063_s22   ;;  %s893_s21 = sphi %s939_s21, %s1062_s21  }
   0x3   : > { %p30_p1 = scmp.ge.s32.totalorder %s28_s24, 2  ;;  %p244_p2 = scmp.lt.s32.totalorder %s901_s23, 3 }
   0x5   : > { %s1065_s24 = smov (%p30_p1, %s28_s24), 0  ;;  %p245_p3 = pnand %p787_p0, %p244_p2 }
   0x6   : > { %p287_p4 = scmp.lt.s32.totalorder (!%p245_p3), %s893_s21, 1 }
   0x7   : > { %248 = sbr.rel (%p245_p3) target bundleno = 480 (0x1e0), region = 44 }
   0xc   : > { %s1067_s21 = smov (!%p287_p4, %s893_s21), 1  ;;  %v413_v10 = vld [vmem:[%s1057_s2] sm:$0xff]  ;;  %vm455_vm0 = vcmask 72704   ;;  %v421_v12 = vld [vmem:[%s1058_s3 + $0x10] sm:$0xff]  ;;  %v903_v13 = vmov 0   ;;  %v420_v14 = vld [vmem:[%s1058_s3 + $0x8] sm:$0xff] }
   0xd   : > { %s814_s25 = sshll.u32 %s1067_s21, 6  ;;  %s815_s29 = sshll.u32 %s1067_s21, 4  ;;  %828 = vmatprep.mubr.msk.f32.mxu1 %vm455_vm0, %v413_v10  ;;  %v419_v11 = vld [vmem:[%s1058_s3] sm:$0xff]  ;;  %862 = vset.pattern.permute.xlu0 %v903_v13  ;;  %v422_v15 = vld [vmem:[%s1058_s3 + $0x18] sm:$0xff]  ;;  %v424_v17 = vld [vmem:[%s1058_s3 + $0x28] sm:$0xff]  ;;  %vm474_vm1 = vcmask 1040384  }
   0xe   : > { %s295_s28 = scalar_lea.vmem %s1055_s0, %s814_s25  ;;  %s301_s8 = scalar_lea.vmem %s1056_s1, %s815_s29  ;;  %863 = vset.pattern.permute.xlu1 %v903_v13  ;;  %427 = vperm.xlu0 %862, %v419_v11   ;;  %v423_v16 = vld [vmem:[%s1058_s3 + $0x20] sm:$0xff]  ;;  %v580_v19 = vld [vmem:[%s1059_s4 + $0x8] sm:$0xff]  ;;  %v581_v20 = vld [vmem:[%s1059_s4 + $0x10] sm:$0xff]  ;;  %vm621_vm2 = vcmask 523264   ;;  %vm643_vm3 = vcmask 516096  }
   0xf   : > { %v864_v0 = vld [vmem:[%s295_s28 + $0x34] ss:$8 sps:$4 sm:$0xff]   ;;  %v866_v1 = vld [vmem:[%s295_s28 + $0x30] ss:$8 sps:$4 sm:$0xff]   ;;  %v867_v2 = vld [vmem:[%s295_s28 + $0x24] ss:$8 sps:$4 sm:$0xff]   ;;  %437 = vperm.xlu1 %863, %v421_v12  }
  0x10   : > { %378 = vmatprep.subr.bf16.mxu0 %v864_v0  ;;  %v878_v3 = vld [vmem:[%s301_s8 + $0x4] ss:$8 sps:$4 sm:$0x1f]   ;;  %v869_v4 = vld [vmem:[%s295_s28 + $0x20] ss:$8 sps:$4 sm:$0xff]   ;;  %v582_v21 = vld [vmem:[%s1059_s4 + $0x18] sm:$0xff] }
  0x11   : > { %379 = vmatpush1.bf16.xpose.msra.mxu0 %v866_v1  ;;  %v870_v5 = vld [vmem:[%s295_s28 + $0x14] ss:$8 sps:$4 sm:$0xff]   ;;  %402 = vmatprep.mubr.bf16.mxu0 %v878_v3  ;;  %v872_v6 = vld [vmem:[%s295_s28 + $0x10] ss:$8 sps:$4 sm:$0xff]   ;;  %v873_v7 = vld [vmem:[%s295_s28 + $0x4] ss:$8 sps:$4 sm:$0xff]   ;;  %v637_v3 = vlaneseq }
  0x12   : > { %380 = vmatprep.subr.bf16.mxu0 %v867_v2  ;;  %v875_v8 = vld [vmem:[%s295_s28] ss:$8 sps:$4 sm:$0xff]   ;;  %432 = vperm.xlu0 %862, %v420_v14   ;;  %v415_v34 = vld [vmem:[%s1057_s2 + $0x10] sm:$0xff]  ;;  %v416_v35 = vld [vmem:[%s1057_s2 + $0x18] sm:$0xff]  ;;  %s792_s11 = sshll.u32 %s1067_s21, 2 }
  0x13   : > { %v876_v9 = vld [vmem:[%s301_s8] ss:$8 sps:$4 sm:$0x1f]   ;;  %442 = vperm.xlu1 %863, %v422_v15   ;;  %s308_s14 = scalar_lea.vmem %s1061_s6, %s792_s11 }
  0x14   : > { %v579_v18 = vld [vmem:[%s1059_s4] sm:$0xff]  ;;  %v584_v23 = vld [vmem:[%s1059_s4 + $0x28] sm:$0xff] }
  0x15   : > { %v583_v22 = vld [vmem:[%s1059_s4 + $0x20] sm:$0xff]  ;;  %v414_v33 = vld [vmem:[%s1057_s2 + $0x8] sm:$0xff] }
  0x16   : > { %447 = vperm.xlu0 %862, %v423_v16   ;;  %v631_v24 = vld [vmem:[%s1060_s5] sm:$0x1]  ;;  %v810_v25 = vld [vmem:[%s1060_s5 + $0x1] sm:$0x1]  ;;  %v811_v26 = vld [vmem:[%s1060_s5 + $0x2] sm:$0x1] }
  0x17   : > { %452 = vperm.xlu1 %863, %v424_v17   ;;  %v417_v36 = vld [vmem:[%s1057_s2 + $0x20] sm:$0xff]  ;;  %v418_v37 = vld [vmem:[%s1057_s2 + $0x28] sm:$0xff]  ;;  %v638_v16 = vshrl.u32 %v637_v3, 7 }
  0x19   : > { %381 = vmatpush1.bf16.xpose.msra.mxu0 %v869_v4 }
  0x1a   : > { %382 = vmatprep.subr.bf16.mxu0 %v870_v5  ;;  %587 = vperm.xlu0 %862, %v579_v18  }
  0x1b   : > { %592 = vperm.xlu1 %863, %v580_v19  }
  0x1e   : > { %597 = vperm.xlu0 %862, %v581_v20  }
  0x1f   : > { %602 = vperm.xlu1 %863, %v582_v21  }
  0x21   : > { %383 = vmatpush1.bf16.xpose.msra.mxu0 %v872_v6 }
  0x22   : > { %384 = vmatprep.subr.bf16.mxu0 %v873_v7  ;;  %607 = vperm.xlu0 %862, %v583_v22  }
  0x23   : > { %612 = vperm.xlu1 %863, %v584_v23  }
  0x26   : > { %634 = vperm.xlu0 %862, %v631_v24   ;;  %v639_v24 = vsub.s32 0, %v638_v16 }
  0x27   : > { %658 = vperm.xlu1 %863, %v810_v25  }
  0x29   : > { %385 = vmatpush1.bf16.xpose.msra.mxu0 %v875_v8 }
  0x2a   : > { %681 = vperm.xlu0 %862, %v811_v26  }
  0x30   : > { %403 = vmatmul.mubr.bf16.vlgmr.msra.gmra.mxu0 %v876_v9 }
  0x89   : > { %v428_v39 = vpop.permute.xlu0 %427 }
  0x8a   : > { %v438_v38 = vpop.permute.xlu1 %437 }
  0x8d   : > { %v433_v41 = vpop.permute.xlu0 %432 }
  0x8e   : > { %v443_v40 = vpop.permute.xlu1 %442 }
  0x91   : > { %v448_v43 = vpop.permute.xlu0 %447 }
  0x92   : > { %v453_v42 = vpop.permute.xlu1 %452 }
  0x95   : > { %v588_v47 = vpop.permute.xlu0 %587 }
  0x96   : > { %v593_v44 = vpop.permute.xlu1 %592 }
  0x99   : > { %v598_v60 = vpop.permute.xlu0 %597 }
  0x9a   : > { %v603_v55 = vpop.permute.xlu1 %602 }
  0x9d   : > { %v608_v15 = vpop.permute.xlu0 %607 }
  0x9e   : > { %v613_v9 = vpop.permute.xlu1 %612 }
  0xf0   : > { %v404_v27 = vpop.f32.mrf.mxu0 }
  0xf1   : > { %v411_v32 = vmul.f32 0.0625, %v404_v27 }
  0xf2   : > { %v406_v28 = vpop.f32.mrf.mxu0 }
  0xf4   : > { %v407_v29 = vpop.f32.mrf.mxu0 }
  0xf5   : > { %v412_v30 = vmul.f32 0.0625, %v407_v29 }
  0xf6   : > { %v409_v31 = vpop.f32.mrf.mxu0 }
  0xf7   : > { %824 = vmatprep.subr.msk.mxu1 %vm474_vm1, %v412_v30  ;;  %v635_v31 = vpop.permute.xlu0 %634 }
  0xf8   : > { %825 = vmatpush3.msk.msra.mxu1 %vm474_vm1, %v412_v30 }
  0xf9   : > { %826 = vmatprep.subr.mxu1 %v411_v32 }
  0xfa   : > { %827 = vmatpush3.msra.mxu1 %v411_v32  ;;  %v640_v32 = vrot.slane %v635_v31, %v639_v24 }
  0xfb   : > { %829 = vmatmul.mubr.msk.f32.vlgmr.msra.gmra.mxu1 %vm455_vm0, %v414_v33 }
  0xfc   : > { %831 = vmatprep.mubr.msk.f32.mxu1 %vm455_vm0, %v415_v34 }
  0xff   : > { %832 = vmatmul.mubr.msk.f32.gmra.mxu1 %vm455_vm0, %v416_v35 }
 0x100   : > { %834 = vmatprep.mubr.msk.f32.mxu1 %vm455_vm0, %v417_v36  ;;  %v659_v36 = vpop.permute.xlu1 %658 }
 0x103   : > { %835 = vmatmul.mubr.msk.f32.gmra.mxu1 %vm455_vm0, %v418_v37 }
 0x1bb   : > { %v830_v45 = vpop.f32.mrf.mxu1 }
 0x1bc   : > { %v550_v46 = vadd.f32 %v830_v45, %v433_v41 }
 0x1bd   : > { %v544_v48 = vpop.f32.mrf.mxu1 }
 0x1be   : > { %v574_v49 = vmax.f32 %v550_v46, 0.0  ;;  %v545_v50 = vadd.f32 %v544_v48, %v428_v39 }
 0x1bf   : > { %v833_v51 = vpop.f32.mrf.mxu1 }
 0x1c0   : > { %v616_v52 = vmul.f32 %v593_v44, %v574_v49  ;;  %v573_v53 = vmax.f32 %v545_v50, 0.0  ;;  %v560_v54 = vadd.f32 %v833_v51, %v443_v40  ;;  %v664_v40 = vrot.slane %v659_v36, %v639_v24  ;;  %v682_v44 = vpop.permute.xlu0 %681 }
 0x1c1   : > { %v554_v56 = vpop.f32.mrf.mxu1 }
 0x1c2   : > { %v615_v57 = vmul.f32 %v588_v47, %v573_v53  ;;  %v576_v58 = vmax.f32 %v560_v54, 0.0  ;;  %v555_v59 = vadd.f32 %v554_v56, %v438_v38  ;;  %v623_v61 = vsel %vm621_vm2, %v616_v52, 0.0 }
 0x1c3   : > { %v836_v62 = vpop.f32.mrf.mxu1  ;;  %v687_v47 = vrot.slane %v682_v44, %v639_v24 }
 0x1c4   : > { %v622_v63 = vsel %vm621_vm2, %v615_v57, 0.0  ;;  %v618_v0 = vmul.f32 %v603_v55, %v576_v58  ;;  %v575_v1 = vmax.f32 %v555_v59, 0.0  ;;  %v570_v2 = vadd.f32 %v836_v62, %v453_v42 }
 0x1c5   : > { %v624_v4 = vadd.f32 %v623_v61, %v622_v63  ;;  %v564_v5 = vpop.f32.mrf.mxu1 }
 0x1c6   : > { %v617_v6 = vmul.f32 %v598_v60, %v575_v1  ;;  %v578_v7 = vmax.f32 %v570_v2, 0.0  ;;  %v565_v8 = vadd.f32 %v564_v5, %v448_v43  ;;  %v646_v11 = vsel %vm621_vm2, %v618_v0, 0.0 }
 0x1c7   : > { %v625_v10 = vrot.slane %v624_v4, 4 }
 0x1c8   : > { %v645_v12 = vsel %vm621_vm2, %v617_v6, 0.0  ;;  %v620_v13 = vmul.f32 %v613_v9, %v578_v7  ;;  %v577_v14 = vmax.f32 %v565_v8, 0.0 }
 0x1c9   : > { %v626_v17 = vadd.f32 %v625_v10, %v624_v4  ;;  %v647_v18 = vadd.f32 %v646_v11, %v645_v12 }
 0x1ca   : > { %v619_v19 = vmul.f32 %v608_v15, %v577_v14  ;;  %v669_v22 = vsel %vm621_vm2, %v620_v13, 0.0 }
 0x1cb   : > { %v627_v20 = vrot.slane %v626_v17, 2  ;;  %v648_v21 = vrot.slane %v647_v18, 4 }
 0x1cc   : > { %v668_v23 = vsel %vm621_vm2, %v619_v19, 0.0 }
 0x1cd   : > { %v628_v25 = vadd.f32 %v627_v20, %v626_v17  ;;  %v649_v26 = vadd.f32 %v648_v21, %v647_v18  ;;  %v670_v27 = vadd.f32 %v669_v22, %v668_v23 }
 0x1cf   : > { %v629_v28 = vrot.slane %v628_v25, 1  ;;  %v650_v29 = vrot.slane %v649_v26, 2  ;;  %v671_v30 = vrot.slane %v670_v27, 4 }
 0x1d1   : > { %v630_v33 = vadd.f32 %v629_v28, %v628_v25  ;;  %v651_v34 = vadd.f32 %v650_v29, %v649_v26  ;;  %v672_v35 = vadd.f32 %v671_v30, %v670_v27 }
 0x1d3   : > { %v641_v37 = vadd.f32 %v640_v32, %v630_v33  ;;  %v652_v38 = vrot.slane %v651_v34, 1  ;;  %v673_v39 = vrot.slane %v672_v35, 2 }
 0x1d5   : > { %v642_v41 = vmax.f32 %v641_v37, 0.0  ;;  %v653_v42 = vadd.f32 %v652_v38, %v651_v34  ;;  %v674_v43 = vadd.f32 %v673_v39, %v672_v35 }
 0x1d7   : > { %644 = vst.msk [vmem:[%s308_s14] sm:$0x1] %vm643_vm3, %v642_v41  ;;  %v665_v45 = vadd.f32 %v664_v40, %v653_v42  ;;  %v675_v46 = vrot.slane %v674_v43, 1 }
 0x1d9   : > { %v666_v48 = vmax.f32 %v665_v45, 0.0  ;;  %v676_v49 = vadd.f32 %v675_v46, %v674_v43 }
 0x1db   : > { %667 = vst.msk [vmem:[%s308_s14 + $0x1] sm:$0x1] %vm643_vm3, %v666_v48  ;;  %v688_v50 = vadd.f32 %v687_v47, %v676_v49 }
 0x1dd   : > { %v689_v51 = vmax.f32 %v688_v50, 0.0 }
 0x1df   : > { %690 = vst.msk [vmem:[%s308_s14 + $0x2] sm:$0x1] %vm643_vm3, %v689_v51 }
 0x1e0 PF: > { %s16_s23 = sadd.s32 1, %s901_s23   ;;  %s1062_s21 = smov %s897_s22 }
 0x1e1   : > { %p13_p5 = scmp.ge.s32.totalorder %s16_s23, 4   ;;  %s1063_s22 = smov %s1065_s24 }
 0x1e3   :  { %15 = sbr.rel (!%p13_p5) target bundleno = 2 (0x2), region = 79 }

// kernel: fsc_forward.4
= control target key start
LH: loop header
LB: loop body
LE: loop exit
PB: predicated region body
PF: predicated region fallthrough
CT: control target
= control target key end

     0   :  { %s5261_s0 = inlined_call_operand.vmem [shape: s32[2,12], index: 0, kind: input, shape index: {}]   ;;  %s5262_s2 = inlined_call_operand.vmem [shape: bf16[2,18,9,32], index: 2, kind: input, shape index: {}, may-alias: {2,3}]   ;;  %s5263_s3 = inlined_call_operand.vmem [shape: bf16[2,18,9,32], index: 3, kind: input, shape index: {}, may-alias: {2,3}]   ;;  %s5264_s4 = inlined_call_operand.vmem [shape: bf16[2,18,9,32], index: 4, kind: input, shape index: {}, may-alias: {4,5}]   ;;  %s5265_s5 = inlined_call_operand.vmem [shape: bf16[2,18,9,32], index: 5, kind: input, shape index: {}, may-alias: {4,5}]   ;;  %s5266_s6 = inlined_call_operand.vmem [shape: bf16[9,32,64], index: 6, kind: input, shape index: {}]   ;;  %s5267_s7 = inlined_call_operand.vmem [shape: f32[1,64], index: 7, kind: input, shape index: {}]   ;;  %s5268_s8 = inlined_call_operand.vmem [shape: bf16[64,256], index: 8, kind: input, shape index: {}]   ;;  %s5269_s9 = inlined_call_operand.vmem [shape: f32[1,256], index: 9, kind: input, shape index: {}]   ;;  %s5270_s10 = inlined_call_operand.vmem [shape: bf16[256,768], index: 10, kind: input, shape index: {}]   ;;  %s5271_s11 = inlined_call_operand.vmem [shape: f32[1,768], index: 11, kind: input, shape index: {}]   ;;  %s5272_s12 = inlined_call_operand.vmem [shape: bf16[2,8,8,256], index: 12, kind: output, shape index: {0}]   ;;  %s5273_s13 = inlined_call_operand.vmem [shape: bf16[2,3,768], index: 13, kind: output, shape index: {1}]   ;;  %s5274_s1 = inlined_call_operand.vmem [shape: f32[2,3], index: 1, kind: input, shape index: {}]  }
   0x1   :  { %5285 = sst [smem:[#allocation12_spill]] %s5262_s2  ;;  %s19_s27 = sshll.u32 %s5261_s0, 4  ;;  %s20_s27 = int_to_ptr.vmem [resolvable:$true] %s19_s27 }
   0x2   :  { %5286 = sst [smem:[#allocation13_spill]] %s5263_s3  ;;  %s23_s30 = sshll.u32 %s5274_s1, 4  ;;  %s24_s30 = int_to_ptr.vmem [resolvable:$true] %s23_s30 }
   0x3   :  { %5287 = sst [smem:[#allocation14_spill]] %s5264_s4  ;;  %s4222_s14 = scalar_lea.vmem %s20_s27, 32 }
   0x4   :  { %5288 = sst [smem:[#allocation15_spill]] %s5265_s5  ;;  %p4223_p0 = scmp.ne.s32.totalorder %s20_s27, %s4222_s14 }
   0x5   :  { %5289 = sst [smem:[#allocation16_spill]] %s5271_s11  ;;  %p4227_p1 = scmp.lt.s32.totalorder %s20_s27, %s20_s27 }
   0x6   :  { %5290 = sst [smem:[#allocation17_spill]] %s5272_s12  ;;  %p4228_p2 = scmp.lt.s32.totalorder %s4222_s14, %s4222_s14 }
   0x7   :  { %5291 = sst [smem:[#allocation18_spill]] %s5273_s13 }
   0x8   :  { %p4229_p3 = por %p4228_p2, %p4227_p1 }
   0xa   :  { %p4230_p4 = pnand %p4229_p3, %p4223_p0 }
   0xc   :  { %4233 = shalt.err (!%p4230_p4)  }
   0xd   :  { %s4280_s15 = smov [#allocation4]   ;;  %s4234_s16 = scalar_lea.vmem %s24_s30, 32 }
   0xe   :  { %22 = dma.vmem_to_smem %s20_s27, 32, %s4280_s15, [#allocation3] }
   0xf   :  { %p4235_p5 = scmp.ne.s32.totalorder %s24_s30, %s4234_s16  ;;  %p4239_p6 = scmp.lt.s32.totalorder %s24_s30, %s24_s30 }
  0x10   :  { %p4240_p7 = scmp.lt.s32.totalorder %s4234_s16, %s4234_s16 }
  0x12   :  { %p4241_p8 = por %p4240_p7, %p4239_p6 }
  0x14   :  { %p4242_p9 = pnand %p4241_p8, %p4235_p5 }
  0x16   :  { %4245 = shalt.err (!%p4242_p9)  }
  0x17   :  { %s4281_s0 = smov [#allocation5]  }
  0x18   :  { %26 = dma.vmem_to_smem %s24_s30, 32, %s4281_s0, [#allocation3] }
  0x19   :  { %4262 = dma.done.wait [#allocation3], 64 }
  0x1a   :  { %4263 = vsyncadd [#allocation3], 4294967232 }
  0x1b   :  { %28 = sfence }
  0x1c   :  { %s4366_s1 = smov 0   ;;  %s4368_s17 = smov 0  }
  0x1d   :  { %s4370_s18 = smov 0  }
  0x1e LB: > { %5292 = sst [smem:[#allocation7_spill]] %s4266_s1  ;;  %s46_s19 = sadd.s32 1, %s4270_s17  ;;  %s4274_s18 = sphi %s4370_s18, %s34_s18   ;;  %s4270_s17 = sphi %s4368_s17, %s5342_s17   ;;  %s4266_s1 = sphi %s4366_s1, %s5341_s1  }
  0x1f   : > { %5293 = sst [smem:[#allocation8_spill]] %s4270_s17  ;;  %p3447_p10 = scmp.ge.s32.totalorder %s4274_s18, 1 }
  0x20   : > { %5294 = sst [smem:[#allocation9_spill]] %s4274_s18  ;;  %p48_p11 = scmp.ge.s32.totalorder %s46_s19, 2 }
  0x21   : > { %p460_p12 = scmp.lt.s32.totalorder %s4274_s18, 3 }
  0x22   : > { %s5344_s19 = smov (%p48_p11, %s46_s19), 0 }
  0x23   : > { %5295 = sst [smem:[#allocation10_spill]] %s5344_s19  ;;  %p461_p13 = pnand %p3447_p10, %p460_p12 }
  0x25   : > { %464 = sbr.rel (%p461_p13) target bundleno = 1455 (0x5af), region = 60 }
  0x2a   : > { %p563_p0 = scmp.lt.s32.totalorder %s4266_s1, 1  ;;  %v647_v0 = vlaneseq  ;;  %v4282_v1 = vmov 0.0   ;;  %s5296_s12 = sld [smem:[#allocation17_spill]] }
  0x2b   : > { %646 = vst [vmem:[#allocation2] sm:$0x77] %v4282_v1  ;;  %s5297_s2 = sld [smem:[#allocation12_spill]] }
  0x2c   : > { %s564_s20 = scalar_select %p563_p0, %s4266_s1, 1  ;;  %v4390_v2 = vand.u32 127, %v647_v0 }
  0x2d   : > { %s5298_s3 = sld [smem:[#allocation13_spill]] }
  0x2e   : > { %s3965_s21 = smul.u32 144, %s564_s20  ;;  %s3756_s22 = sshll.u32 %s564_s20, 6 }
  0x2f   : > { %s5299_s4 = sld [smem:[#allocation14_spill]]  ;;  %s3967_s24 = smul.u32 12, %s564_s20 }
  0x30   : > { %s4395_s25 = scalar_lea.vmem %s5296_s12, %s3756_s22  ;;  %s3753_s29 = sadd.s32 128, %s3965_s21 }
  0x31   : > { %s4400_s28 = scalar_lea.vmem %s5297_s2, %s3965_s21  ;;  %s5300_s5 = sld [smem:[#allocation15_spill]] }
  0x32   : > { %s5301_s13 = sld [smem:[#allocation18_spill]]  ;;  %s4422_s12 = smov 0  }
  0x33   : > { %s4405_s15 = scalar_lea.vmem %s5298_s3, %s3753_s29 }
  0x35   : > { %s4410_s19 = scalar_lea.vmem %s5299_s4, %s3965_s21 }
  0x37   : > { %s4415_s22 = scalar_lea.vmem %s5300_s5, %s3753_s29 }
  0x38   : > { %s4420_s2 = scalar_lea.vmem %s5301_s13, %s3967_s24 }
  0x39   : > { %5302 = sst [smem:[#allocation11_spill]] %s4420_s2 }
  0x3a LB: >> { %v4011_v3 = vld [vmem:[%s5266_s6 + $0x18] sm:$0xff]   ;;  %v4283_v4 = vmov 0.0   ;;  %v4012_v5 = vld [vmem:[%s5266_s6 + $0x8] sm:$0xff]   ;;  %v4013_v6 = vld [vmem:[%s5266_s6 + $0x10] sm:$0xff]   ;;  %vm4284_vm0 = vmmov 0   ;;  %s3758_s16 = sshll.u32 %s4278_s12, 4  ;;  %s4278_s12 = sphi %s4422_s12, %s654_s12  }
  0x3b   : >> { %3821 = vmatprep.subr.bf16.mxu0 %v4283_v4  ;;  %3829 = vmatprep.subr.bf16.mxu1 %v4283_v4  ;;  %v4014_v7 = vld [vmem:[%s5266_s6] sm:$0xff]   ;;  %s4446_s24 = scalar_lea.vmem %s4400_s28, %s3758_s16  ;;  %s4449_s26 = scalar_lea.vmem %s4410_s19, %s3758_s16  ;;  %vm703_vm1 = vcmask 261120   ;;  %v4016_v12 = vld [vmem:[%s5266_s6 + $0x28] sm:$0xff]   ;;  %v4017_v14 = vld [vmem:[%s5266_s6 + $0x38] sm:$0xff]   ;;  %v4285_v54 = vmov 0   ;;  %vm1335_vm2 = vcmask 523264  }
  0x3c   : >> { %3822 = vmatpush3.bf16.msra.mxu0 %v4011_v3  ;;  %3825 = vmatprep.mubr.msk.bf16.mxu0 %vm4284_vm0, %v4283_v4  ;;  %v659_v8 = vld [vmem:[%s4446_s24] sm:$0xf]  ;;  %v660_v9 = vld [vmem:[%s4446_s24 + $0x4] sm:$0x1]  ;;  %v3461_v17 = vld [vmem:[%s4446_s24 + $0x8] sm:$0xf] }
  0x3d   : >> { %3830 = vmatpush3.bf16.msra.mxu1 %v4012_v5  ;;  %3823 = vmatprep.subr.bf16.mxu0 %v4283_v4  ;;  %v663_v10 = vld [vmem:[%s4449_s26] sm:$0xf]  ;;  %v3487_v11 = vcombine.low %v659_v8, %v660_v9  ;;  %v3462_v18 = vld [vmem:[%s4446_s24 + $0xc] sm:$0x1]  ;;  %v4019_v21 = vld [vmem:[%s5266_s6 + $0x30] sm:$0xff]   ;;  %s5303_s1 = sld [smem:[#allocation7_spill]] }
  0x3e   : >> { %3831 = vmatprep.subr.bf16.mxu1 %v4283_v4  ;;  %3833 = vmatprep.mubr.msk.bf16.mxu1 %vm4284_vm0, %v4283_v4  ;;  %v4018_v19 = vld [vmem:[%s5266_s6 + $0x20] sm:$0xff]   ;;  %v3509_v20 = vcombine.low %v3461_v17, %v3462_v18  ;;  %v4021_v24 = vld [vmem:[%s5266_s6 + $0x48] sm:$0xff]   ;;  %v4022_v25 = vld [vmem:[%s5266_s6 + $0x58] sm:$0xff]  }
  0x3f   : >> { %v815_v13 = vshll.u32 %v3487_v11, 16  ;;  %v813_v15 = vshrl.u32 %v3487_v11, 16  ;;  %v4023_v28 = vld [vmem:[%s5266_s6 + $0x40] sm:$0xff]   ;;  %v4024_v29 = vld [vmem:[%s5266_s6 + $0x50] sm:$0xff]   ;;  %v3465_v30 = vld [vmem:[%s4449_s26 + $0x8] sm:$0xf] }
  0x40   : >> { %3824 = vmatpush3.bf16.msra.mxu0 %v4013_v6  ;;  %v1010_v23 = vshll.u32 %v3509_v20, 16  ;;  %v1008_v26 = vshrl.u32 %v3509_v20, 16  ;;  %v4025_v31 = vld [vmem:[%s5266_s6 + $0x68] sm:$0xff]   ;;  %v3468_v32 = vld [vmem:[%s4446_s24 + $0x10] sm:$0xf]  ;;  %v4026_v33 = vld [vmem:[%s5266_s6 + $0x78] sm:$0xff]  }
  0x41   : >> { %3832 = vmatpush3.bf16.msra.mxu1 %v4014_v7  ;;  %3837 = vmatprep.subr.bf16.mxu0 %v4283_v4  ;;  %v817_v16 = vrot.slane %v815_v13, 1  ;;  %v3469_v34 = vld [vmem:[%s4446_s24 + $0x14] sm:$0x1]  ;;  %v4027_v37 = vld [vmem:[%s5266_s6 + $0x60] sm:$0xff]   ;;  %v4030_v40 = vld [vmem:[%s5266_s6 + $0x88] sm:$0xff]  }
  0x42   : >> { %3845 = vmatprep.subr.bf16.mxu1 %v4283_v4  ;;  %v1012_v27 = vrot.slane %v1010_v23, 1  ;;  %v3531_v36 = vcombine.low %v3468_v32, %v3469_v34  ;;  %v4028_v38 = vld [vmem:[%s5266_s6 + $0x70] sm:$0xff]   ;;  %v4031_v44 = vld [vmem:[%s5266_s6 + $0x80] sm:$0xff]  }
  0x43   : >> { %3826 = vmatmul.mubr.msk.bf16.vlgmr.msra.gmra.mxu0 %vm703_vm1, %v663_v10  ;;  %v818_v22 = vor.u32 %v817_v16, %v813_v15  ;;  %v3472_v41 = vld [vmem:[%s4449_s26 + $0x10] sm:$0xf]  ;;  %v4034_v46 = vld [vmem:[%s5268_s8 + $0x34] ss:$8 sps:$4 sm:$0xff]   ;;  %v4037_v48 = vld [vmem:[%s5268_s8 + $0x24] ss:$8 sps:$4 sm:$0xff]  }
  0x44   : >> { %3834 = vmatmul.mubr.msk.bf16.vlgmr.msra.gmra.mxu1 %vm703_vm1, %v659_v8  ;;  %3838 = vmatpush3.bf16.msra.mxu0 %v4016_v12  ;;  %v1013_v35 = vor.u32 %v1012_v27, %v1008_v26  ;;  %v1205_v39 = vshll.u32 %v3531_v36, 16  ;;  %v1203_v42 = vshrl.u32 %v3531_v36, 16  ;;  %v4032_v47 = vld [vmem:[%s5268_s8 + $0x30] ss:$8 sps:$4 sm:$0xff]   ;;  %v4035_v49 = vld [vmem:[%s5268_s8 + $0x20] ss:$8 sps:$4 sm:$0xff]  }
  0x45   : >> { %3846 = vmatpush3.bf16.msra.mxu1 %v4017_v14  ;;  %3839 = vmatprep.subr.bf16.mxu0 %v4283_v4  ;;  %v4040_v50 = vld [vmem:[%s5268_s8 + $0x14] ss:$8 sps:$4 sm:$0xff]   ;;  %v4038_v51 = vld [vmem:[%s5268_s8 + $0x10] ss:$8 sps:$4 sm:$0xff]   ;;  %v4043_v52 = vld [vmem:[%s5268_s8 + $0x4] ss:$8 sps:$4 sm:$0xff]  }
  0x46   : >> { %3847 = vmatprep.subr.bf16.mxu1 %v4283_v4  ;;  %3841 = vmatprep.mubr.msk.bf16.mxu0 %vm4284_vm0, %v4283_v4  ;;  %v1207_v43 = vrot.slane %v1205_v39, 1  ;;  %v4041_v53 = vld [vmem:[%s5268_s8] ss:$8 sps:$4 sm:$0xff]   ;;  %s4571_s24 = sshll.u32 %s5303_s1, 7 }
  0x47   : >> { %3849 = vmatprep.mubr.msk.bf16.mxu1 %vm4284_vm0, %v4283_v4  ;;  %s4574_s30 = sadd.s32 1, %s4571_s24  ;;  %s5277_s17 = sadd.s32 4, %s4571_s24 }
  0x48   : >> { %3840 = vmatpush3.bf16.msra.mxu0 %v4018_v19  ;;  %v1208_v45 = vor.u32 %v1207_v43, %v1203_v42  ;;  %s1397_s20 = sld [smem:[#allocation4 + %s4571_s24]]  ;;  %s5278_s29 = sadd.s32 5, %s4571_s24 }
  0x49   : >> { %3848 = vmatpush3.bf16.msra.mxu1 %v4019_v21  ;;  %3853 = vmatprep.subr.bf16.mxu0 %v4283_v4  ;;  %s1399_s14 = sld [smem:[#allocation4 + %s4574_s30]]  ;;  %s4583_s16 = sadd.s32 2, %s4571_s24 }
  0x4a   : >> { %3861 = vmatprep.subr.bf16.mxu1 %v4283_v4  ;;  %s1421_s26 = sld [smem:[#allocation4 + %s5277_s17]]  ;;  %s5281_s23 = sadd.s32 8, %s4571_s24 }
  0x4b   : >> { %3842 = vmatmul.mubr.msk.bf16.vlgmr.msra.gmra.mxu0 %vm703_vm1, %v818_v22  ;;  %s1423_s0 = sld [smem:[#allocation4 + %s5278_s29]]  ;;  %s5282_s27 = sadd.s32 9, %s4571_s24 }
  0x4c   : >> { %3850 = vmatmul.mubr.msk.bf16.vlgmr.msra.gmra.mxu1 %vm703_vm1, %v3461_v17  ;;  %3854 = vmatpush3.bf16.msra.mxu0 %v4021_v24  ;;  %s1401_s21 = sld [smem:[#allocation4 + %s4583_s16]]  ;;  %s1402_s1 = sadd.s32 3, %s4571_s24 }
  0x4d   : >> { %3862 = vmatpush3.bf16.msra.mxu1 %v4022_v25  ;;  %3855 = vmatprep.subr.bf16.mxu0 %v4283_v4  ;;  %s1445_s3 = sld [smem:[#allocation4 + %s5281_s23]]  ;;  %s1424_s4 = sadd.s32 6, %s4571_s24 }
  0x4e   : >> { %3863 = vmatprep.subr.bf16.mxu1 %v4283_v4  ;;  %3857 = vmatprep.mubr.msk.bf16.mxu0 %vm4284_vm0, %v4283_v4  ;;  %s1447_s17 = sld [smem:[#allocation4 + %s5282_s27]]  ;;  %p1404_p1 = scmp.ge.s32.totalorder %s4278_s12, %s1397_s20 }
  0x4f   : >> { %3865 = vmatprep.mubr.msk.bf16.mxu1 %vm4284_vm0, %v4283_v4  ;;  %s1403_s5 = sld [smem:[#allocation4 + %s1402_s1]]  ;;  %p1405_p2 = scmp.le.s32.totalorder %s4278_s12, %s1399_s14 }
  0x50   : >> { %3856 = vmatpush3.bf16.msra.mxu0 %v4023_v28  ;;  %s5283_s29 = sadd.s32 7, %s4571_s24  ;;  %p1428_p3 = scmp.ge.s32.totalorder %s4278_s12, %s1421_s26 }
  0x51   : >> { %3864 = vmatpush3.bf16.msra.mxu1 %v4024_v29  ;;  %3869 = vmatprep.subr.bf16.mxu0 %v4283_v4  ;;  %p1429_p4 = scmp.le.s32.totalorder %s4278_s12, %s1423_s0  ;;  %s1425_s13 = sld [smem:[#allocation4 + %s1424_s4]] }
  0x52   : >> { %3877 = vmatprep.subr.bf16.mxu1 %v4283_v4  ;;  %s1448_s18 = sadd.s32 10, %s4571_s24  ;;  %s1427_s2 = sld [smem:[#allocation4 + %s5283_s29]]  ;;  %v1408_v43 = vstv %s1401_s21 }
  0x53   : >> { %3858 = vmatmul.mubr.msk.bf16.vlgmr.msra.gmra.mxu0 %vm703_vm1, %v3465_v30  ;;  %p4608_p5 = pnand %p1405_p2, %p1404_p1  ;;  %s1450_s11 = sadd.s32 11, %s4571_s24  ;;  %vm4635_vm3 = vcmp.ge.s32.totalorder %v4390_v2, %v1408_v43 }
  0x54   : >> { %3866 = vmatmul.mubr.msk.bf16.vlgmr.msra.gmra.mxu1 %vm703_vm1, %v1013_v35  ;;  %3870 = vmatpush3.bf16.msra.mxu0 %v4025_v31  ;;  %v3535_v35 = vld [vmem:[%s5267_s7] ss:$0 sm:$0xff]  ;;  %p4613_p6 = pnand %p1429_p4, %p1428_p3  ;;  %s1449_s20 = sld [smem:[#allocation4 + %s1448_s18]] }
  0x55   : >> { %3878 = vmatpush3.bf16.msra.mxu1 %v4026_v33  ;;  %3871 = vmatprep.subr.bf16.mxu0 %v4283_v4  ;;  %p1452_p7 = scmp.ge.s32.totalorder %s4278_s12, %s1445_s3  ;;  %p1453_p8 = scmp.le.s32.totalorder %s4278_s12, %s1447_s17 }
  0x56   : >> { %3879 = vmatprep.subr.bf16.mxu1 %v4283_v4  ;;  %3873 = vmatprep.mubr.msk.bf16.mxu0 %vm4284_vm0, %v4283_v4  ;;  %s1451_s14 = sld [smem:[#allocation4 + %s1450_s11]] }
  0x57   : >> { %3881 = vmatprep.mubr.msk.bf16.mxu1 %vm4284_vm0, %v4283_v4  ;;  %s3548_s26 = scalar_select %p4608_p5, 0, 1 }
  0x58   : >> { %3872 = vmatpush3.bf16.msra.mxu0 %v4027_v37  ;;  %s3550_s0 = scalar_select %p4613_p6, 0, 1 }
  0x59   : >> { %3880 = vmatpush3.bf16.msra.mxu1 %v4028_v38  ;;  %3885 = vmatprep.subr.bf16.mxu0 %v4283_v4  ;;  %p4627_p9 = pnand %p1453_p8, %p1452_p7 }
  0x5a   : >> { %1347 = vmatprep.subr.bf16.mxu1 %v4034_v46  ;;  %v1434_v46 = vstv %s1427_s2 }
  0x5b   : >> { %3874 = vmatmul.mubr.msk.bf16.vlgmr.msra.gmra.mxu0 %vm703_vm1, %v3468_v32  ;;  %vm4650_vm6 = vcmp.le.s32.totalorder %v4390_v2, %v1434_v46  ;;  %s3552_s2 = scalar_select %p4627_p9, 0, 1 }
  0x5c   : >> { %3882 = vmatmul.mubr.msk.bf16.vlgmr.msra.gmra.mxu1 %vm703_vm1, %v3472_v41  ;;  %3886 = vmatpush3.bf16.msra.mxu0 %v4030_v40 }
  0x5d   : >> { %3887 = vmatprep.subr.bf16.mxu0 %v4283_v4  ;;  %3889 = vmatprep.mubr.msk.bf16.mxu0 %vm4284_vm0, %v4283_v4 }
  0x5e   : >> { %1348 = vmatpush1.bf16.msra.mxu1 %v4032_v47  ;;  %1371 = vmatprep.mubr.bf16.mxu1 %v4285_v54  ;;  %v4632_v47 = vshrl.u32 %v647_v0, 7 }
  0x5f   : >> { %1349 = vmatprep.subr.bf16.mxu1 %v4037_v48 }
  0x60   : >> { %3888 = vmatpush3.bf16.msra.mxu0 %v4031_v44  ;;  %v1410_v44 = vstv %s1403_s5 }
  0x61   : >> { %vm4640_vm4 = vcmp.le.s32.totalorder %v4390_v2, %v1410_v44 }
  0x62   : >> { %1350 = vmatpush1.bf16.msra.mxu1 %v4035_v49  ;;  %vm1412_vm7 = vmand %vm4635_vm3, %vm4640_vm4  ;;  %vm1468_vm4 = vcmask 1040384  }
  0x63   : >> { %3890 = vmatmul.mubr.msk.bf16.vlgmr.msra.gmra.mxu0 %vm703_vm1, %v1208_v45  ;;  %1351 = vmatprep.subr.bf16.mxu1 %v4040_v50  ;;  %v1432_v45 = vstv %s1425_s13  ;;  %v1414_v50 = vstv %s3548_s26  ;;  %s3765_s13 = sshll.u32 %s4278_s12, 3  ;;  %s654_s12 = sadd.s32 1, %s4278_s12  }
  0x64   : >> { %1518 = vmatprep.mubr.bf16.mxu0 %v4285_v54  ;;  %vm4645_vm5 = vcmp.ge.s32.totalorder %v4390_v2, %v1432_v45  ;;  %v1456_v54 = vstv %s1449_s20  ;;  %vm1415_vm8 = vcmp.eq.s32.totalorder %v1414_v50, 1  ;;  %s1391_s17 = scalar_lea.vmem %s4395_s25, %s3765_s13  ;;  %p651_p10 = scmp.ge.s32.totalorder %s654_s12, 7  }
  0x65   : >> { %vm1436_vm9 = vmand %vm4645_vm5, %vm4650_vm6  ;;  %vm1457_vm11 = vcmp.ge.s32.totalorder %v4390_v2, %v1456_v54  ;;  %vm1469_vm5 = vsmask.f32 256  ;;  %v4046_v0 = vld [vmem:[%s5266_s6 + $0x10] sm:$0xff] (%p651_p10)   ;;  %v1544_v43 = vld [vmem:[%s4405_s15 + $0x4] sm:$0x1] (%p651_p10)  ;;  %s2399_s21 = sld [smem:[#allocation5 + %s4571_s24]] (%p651_p10) }
  0x66   : >> { %1352 = vmatpush1.bf16.msra.mxu1 %v4038_v51  ;;  %vm1416_vm13 = vmand %vm1412_vm7, %vm1415_vm8  ;;  %vm1479_vm7 = vcmask 1043456   ;;  %vm1476_vm8 = vcmask 64512   ;;  %v4064_v45 = vld [vmem:[%s5266_s6 + $0x80] sm:$0xff] (%p651_p10)   ;;  %v4052_v48 = vld [vmem:[%s5266_s6 + $0x38] sm:$0xff] (%p651_p10)   ;;  %s2401_s20 = sld [smem:[#allocation5 + %s4574_s30]] (%p651_p10)  ;;  %s5317_s29 = sadd.s32 (%p651_p10), 4, %s4571_s24 }
  0x67   : >> { %1353 = vmatprep.subr.bf16.mxu1 %v4043_v52  ;;  %vm4682_vm6 = vmand %vm1468_vm4, %vm1469_vm5  ;;  %v4053_v52 = vld [vmem:[%s5266_s6 + $0x30] sm:$0xff] (%p651_p10)   ;;  %v3559_v54 = vld [vmem:[%s4400_s28 + $0x78] sm:$0xf] (%p651_p10)  ;;  %s2260_s13 = sld [smem:[#allocation4 + %s4571_s24]] (%p651_p10)  ;;  %s5318_s12 = sadd.s32 (%p651_p10), 5, %s4571_s24 }
  0x68   : > { %s2284_s23 = sld [smem:[#allocation4 + %s5317_s29]] (%p651_p10) }
  0x69   : > { %s2286_s27 = sld [smem:[#allocation4 + %s5318_s12]] (%p651_p10) }
  0x6a   : >> { %1354 = vmatpush1.bf16.msra.mxu1 %v4041_v53  ;;  %v1438_v53 = vstv %s3550_s0  ;;  %s2266_s0 = sld [smem:[#allocation4 + %s1402_s1]] (%p651_p10) }
  0x6b   : >> { %vm1439_vm10 = vcmp.eq.s32.totalorder %v1438_v53, 1  ;;  %3893 = vmatprep.subr.bf16.mxu1 (%p651_p10), %v4282_v1  ;;  %s2312_s1 = sld [smem:[#allocation4 + %s1448_s18]] (%p651_p10) }
  0x6c   : >> { %vm1440_vm14 = vmand %vm1436_vm9, %vm1439_vm10  ;;  %vm4286_vm9 = vmmov (%p651_p10), 0  }
  0x6d   : > { %p3637_p11 = scmp.le.s32.totalorder (%p651_p10), %s2260_s13, 7 }
  0x6e   : > { %p3641_p13 = scmp.le.s32.totalorder (%p651_p10), %s2284_s23, 7 }
  0x6f   : > { %p3642_p0 = scmp.ge.s32.totalorder (%p651_p10), %s2286_s27, 7 }
  0x71   : > { %p4924_p2 = pnand (%p651_p10), %p3642_p0, %p3641_p13 }
 0x103   : >> { %v741_v55 = vpop.f32.mrf.mxu0 }
 0x104   : >> { %v796_v56 = vpop.f32.mrf.mxu1 }
 0x105   : >> { %v3827_v57 = vpop.f32.mrf.mxu0  ;;  %v797_v8 = vadd.f32 %v796_v56, %v741_v55  ;;  %v1458_v55 = vstv %s1451_s14  ;;  %v4661_v56 = vsub.s32 0, %v4632_v47  ;;  %s2403_s14 = sld [smem:[#allocation5 + %s4583_s16]] (%p651_p10) }
 0x106   : >> { %v3835_v58 = vpop.f32.mrf.mxu1  ;;  %v1283_v57 = vld [vmem:[%s5269_s9] sm:$0x3]  ;;  %vm1459_vm12 = vcmp.le.s32.totalorder %v4390_v2, %v1458_v55  ;;  %v3560_v55 = vld [vmem:[%s4400_s28 + $0x7c] sm:$0x1] (%p651_p10) }
 0x107   : >> { %v744_v59 = vpop.f32.mrf.mxu0  ;;  %v1462_v58 = vstv %s3552_s2  ;;  %vm1460_vm15 = vmand %vm1457_vm11, %vm1459_vm12 }
 0x108   : >> { %v799_v60 = vpop.f32.mrf.mxu1  ;;  %v4673_v59 = vsub.s32 1, %v4632_v47  ;;  %vm1463_vm0 = vcmp.eq.s32.totalorder %v1462_v58, 1  ;;  %v4056_v58 = vld [vmem:[%s5266_s6 + $0x40] sm:$0xff] (%p651_p10)  }
 0x109   : >> { %v3828_v61 = vpop.f32.mrf.mxu0  ;;  %v1288_v60 = vrot.slane %v1283_v57, %v4661_v56  ;;  %vm1464_vm3 = vmand %vm1460_vm15, %vm1463_vm0 }
 0x10a   : >> { %v3836_v62 = vpop.f32.mrf.mxu1  ;;  %v1292_v61 = vrot.slane %v1283_v57, %v4673_v59  ;;  %v4055_v57 = vld [vmem:[%s5266_s6 + $0x48] sm:$0xff] (%p651_p10)  }
 0x10b   : >> { %v868_v63 = vpop.f32.mrf.mxu0  ;;  %v3549_v62 = vsel %vm1416_vm13, 1.0, %v4283_v4 }
 0x10c   : >> { %v929_v3 = vpop.f32.mrf.mxu1  ;;  %v874_v11 = vadd.f32 %v868_v63, %v797_v8 }
 0x10d   : >> { %v3843_v5 = vpop.f32.mrf.mxu0 }
 0x10e   : >> { %v3851_v6 = vpop.f32.mrf.mxu1  ;;  %v935_v16 = vadd.f32 %v929_v3, %v874_v11  ;;  %v3551_v3 = vsel %vm1440_vm14, 1.0, %v4283_v4  ;;  %v3553_v11 = vsel %vm1464_vm3, 1.0, %v4283_v4 }
 0x10f   : >> { %v871_v7 = vpop.f32.mrf.mxu0 }
 0x110   : >> { %v932_v9 = vpop.f32.mrf.mxu1  ;;  %v1419_v7 = vpack.c.bf16 %v3549_v62, %v3549_v62  ;;  %v4057_v62 = vld [vmem:[%s5266_s6 + $0x58] sm:$0xff] (%p651_p10)  }
 0x111   : >> { %v3844_v10 = vpop.f32.mrf.mxu0 }
 0x112   : >> { %v3852_v12 = vpop.f32.mrf.mxu1  ;;  %v1443_v10 = vpack.c.bf16 %v3551_v3, %v3551_v3  ;;  %v4058_v3 = vld [vmem:[%s5266_s6 + $0x50] sm:$0xff] (%p651_p10)  }
 0x113   : >> { %v990_v13 = vpop.f32.mrf.mxu0 }
 0x114   : >> { %v1063_v14 = vpop.f32.mrf.mxu1  ;;  %v996_v19 = vadd.f32 %v990_v13, %v935_v16  ;;  %v4086_v13 = vld [vmem:[%s5270_s10 + $0x124] ss:$24 sps:$4 sm:$0xff] (%p651_p10)  }
 0x115   : >> { %v3859_v15 = vpop.f32.mrf.mxu0 }
 0x116   : >> { %v3867_v17 = vpop.f32.mrf.mxu1  ;;  %v1069_v24 = vadd.f32 %v1063_v14, %v996_v19 }
 0x117   : >> { %v993_v18 = vpop.f32.mrf.mxu0  ;;  %v1467_v17 = vpack.c.bf16 %v3553_v11, %v3553_v11  ;;  %v4065_v11 = vld [vmem:[%s5266_s6 + $0x70] sm:$0xff] (%p651_p10)  }
 0x118   : >> { %v1066_v20 = vpop.f32.mrf.mxu1 }
 0x119   : >> { %v3860_v21 = vpop.f32.mrf.mxu0  ;;  %v1471_v20 = vsel %vm4682_vm6, %v1419_v7, %v1443_v10  ;;  %v4059_v7 = vld [vmem:[%s5266_s6 + $0x68] sm:$0xff] (%p651_p10)   ;;  %v4063_v10 = vld [vmem:[%s5266_s6 + $0x78] sm:$0xff] (%p651_p10)  }
 0x11a   : >> { %v3868_v22 = vpop.f32.mrf.mxu1  ;;  %v1475_v21 = vsel %vm1468_vm4, %v1471_v20, %v1467_v17  ;;  %v4069_v17 = vld [vmem:[%s5268_s8 + $0x20] ss:$8 sps:$4 sm:$0xff] (%p651_p10)   ;;  %v4077_v20 = vld [vmem:[%s5268_s8 + $0x4] ss:$8 sps:$4 sm:$0xff] (%p651_p10)  }
 0x11b   : >> { %v1124_v23 = vpop.f32.mrf.mxu0 }
 0x11c   : >> { %v1185_v25 = vpop.f32.mrf.mxu1  ;;  %v1130_v27 = vadd.f32 %v1124_v23, %v1069_v24  ;;  %v1393_v23 = vld [vmem:[#allocation2] sm:$0x77] }
 0x11d   : >> { %v3875_v26 = vpop.f32.mrf.mxu0 }
 0x11e   : >> { %v3883_v28 = vpop.f32.mrf.mxu1  ;;  %v1191_v32 = vadd.f32 %v1185_v25, %v1130_v27 }
 0x11f   : >> { %v1127_v29 = vpop.f32.mrf.mxu0 }
 0x120   : >> { %v1188_v30 = vpop.f32.mrf.mxu1  ;;  %v4045_v29 = vld [vmem:[%s5266_s6 + $0x18] sm:$0xff] (%p651_p10)  }
 0x121   : >> { %v3876_v31 = vpop.f32.mrf.mxu0  ;;  %v3558_v30 = vld [vmem:[%s4410_s19 + $0x70] sm:$0xf] (%p651_p10) }
 0x122   : >> { %v3884_v33 = vpop.f32.mrf.mxu1  ;;  %v4047_v31 = vld [vmem:[%s5266_s6 + $0x8] sm:$0xff] (%p651_p10)  }
 0x123   : >> { %v1258_v34 = vpop.f32.mrf.mxu0  ;;  %v3557_v33 = vld [vmem:[%s4400_s28 + $0x74] sm:$0x1] (%p651_p10) }
 0x124   : >> { %v1264_v36 = vadd.f32 %v1258_v34, %v1191_v32  ;;  %v3556_v32 = vld [vmem:[%s4400_s28 + $0x70] sm:$0xf] (%p651_p10)  ;;  %s2288_s28 = sld [smem:[#allocation4 + %s1424_s4]] (%p651_p10) }
 0x125   : >> { %v3891_v37 = vpop.f32.mrf.mxu0  ;;  %v3576_v34 = vcombine.low (%p651_p10), %v3556_v32, %v3557_v33 }
 0x126   : >> { %v1272_v38 = vadd.f32 %v3535_v35, %v1264_v36  ;;  %v4048_v35 = vld [vmem:[%s5266_s6] sm:$0xff] (%p651_p10)   ;;  %v4050_v37 = vld [vmem:[%s5266_s6 + $0x28] sm:$0xff] (%p651_p10)  }
 0x127   : >> { %v1261_v39 = vpop.f32.mrf.mxu0  ;;  %v1679_v36 = vshll.u32 (%p651_p10), %v3576_v34, 16 }
 0x128   : >> { %v1273_v40 = vmax.f32 %v1272_v38, 0.0  ;;  %v1677_v38 = vshrl.u32 (%p651_p10), %v3576_v34, 16  ;;  %v4051_v39 = vld [vmem:[%s5266_s6 + $0x20] sm:$0xff] (%p651_p10)  }
 0x129   : >> { %v3892_v41 = vpop.f32.mrf.mxu0 }
 0x12a   : >> { %v1274_v42 = vpack.c.bf16 %v1273_v40, %v1273_v40  ;;  %v1681_v40 = vrot.slane (%p651_p10), %v1679_v36, 1  ;;  %v4061_v41 = vld [vmem:[%s5266_s6 + $0x88] sm:$0xff] (%p651_p10)  }
 0x12c   : >> { %3544 = vmatmul.mubr.msk.bf16.vlgmr.msra.gmra.mxu1 %vm1335_vm2, %v1274_v42  ;;  %v1543_v42 = vld [vmem:[%s4405_s15] sm:$0xf] (%p651_p10)  ;;  %v1682_v46 = vor.u32 (%p651_p10), %v1681_v40, %v1677_v38  ;;  %s5319_s15 = sadd.s32 (%p651_p10), 8, %s4571_s24 }
 0x12d   : > { %3897 = vmatprep.mubr.msk.bf16.mxu1 (%p651_p10), %vm4286_vm9, %v4282_v1  ;;  %3894 = vmatpush3.bf16.msra.mxu1 (%p651_p10), %v4045_v29  ;;  %v3620_v44 = vcombine.low (%p651_p10), %v1543_v42, %v1544_v43 }
 0x12e   : > { %3895 = vmatprep.subr.bf16.mxu1 (%p651_p10), %v4282_v1 }
 0x12f   : > { %v2067_v49 = vshrl.u32 (%p651_p10), %v3620_v44, 16  ;;  %v2069_v50 = vshll.u32 (%p651_p10), %v3620_v44, 16 }
 0x131   : > { %3896 = vmatpush3.bf16.msra.mxu1 (%p651_p10), %v4046_v0  ;;  %v2071_v51 = vrot.slane (%p651_p10), %v2069_v50, 1 }
 0x132   : > { %3901 = vmatprep.subr.bf16.mxu1 (%p651_p10), %v4282_v1 }
 0x133   : > { %v2072_v53 = vor.u32 (%p651_p10), %v2071_v51, %v2067_v49 }
 0x134   : > { %3898 = vmatmul.mubr.msk.bf16.vlgmr.msra.gmra.mxu1 (%p651_p10), %vm703_vm1, %v3558_v30 }
 0x135   : > { %3902 = vmatpush3.bf16.msra.mxu1 (%p651_p10), %v4047_v31  ;;  %3905 = vmatprep.mubr.msk.bf16.mxu1 (%p651_p10), %vm4286_vm9, %v4282_v1 }
 0x136   : > { %3903 = vmatprep.subr.bf16.mxu1 (%p651_p10), %v4282_v1 }
 0x139   : > { %3904 = vmatpush3.bf16.msra.mxu1 (%p651_p10), %v4048_v35 }
 0x13a   : > { %3909 = vmatprep.subr.bf16.mxu1 (%p651_p10), %v4282_v1 }
 0x13c   : > { %3906 = vmatmul.mubr.msk.bf16.vlgmr.msra.gmra.mxu1 (%p651_p10), %vm703_vm1, %v3556_v32 }
 0x13d   : > { %3910 = vmatpush3.bf16.msra.mxu1 (%p651_p10), %v4050_v37  ;;  %3913 = vmatprep.mubr.msk.bf16.mxu1 (%p651_p10), %vm4286_vm9, %v4282_v1 }
 0x13e   : > { %3911 = vmatprep.subr.bf16.mxu1 (%p651_p10), %v4282_v1 }
 0x141   : > { %3912 = vmatpush3.bf16.msra.mxu1 (%p651_p10), %v4051_v39 }
 0x142   : > { %3917 = vmatprep.subr.bf16.mxu1 (%p651_p10), %v4282_v1 }
 0x144   : > { %3914 = vmatmul.mubr.msk.bf16.vlgmr.msra.gmra.mxu1 (%p651_p10), %vm703_vm1, %v1682_v46 }
 0x145   : > { %3918 = vmatpush3.bf16.msra.mxu1 (%p651_p10), %v4052_v48  ;;  %3921 = vmatprep.mubr.msk.bf16.mxu1 (%p651_p10), %vm4286_vm9, %v4282_v1 }
 0x146   : > { %3919 = vmatprep.subr.bf16.mxu1 (%p651_p10), %v4282_v1 }
 0x149   : > { %3920 = vmatpush3.bf16.msra.mxu1 (%p651_p10), %v4053_v52 }
 0x14a   : > { %3925 = vmatprep.subr.bf16.mxu1 (%p651_p10), %v4282_v1 }
 0x14c   : > { %3922 = vmatmul.mubr.msk.bf16.vlgmr.msra.gmra.mxu1 (%p651_p10), %vm703_vm1, %v3559_v54 }
 0x14d   : > { %3926 = vmatpush3.bf16.msra.mxu1 (%p651_p10), %v4055_v57  ;;  %3929 = vmatprep.mubr.msk.bf16.mxu1 (%p651_p10), %vm4286_vm9, %v4282_v1 }
 0x14e   : > { %3927 = vmatprep.subr.bf16.mxu1 (%p651_p10), %v4282_v1 }
 0x151   : > { %3928 = vmatpush3.bf16.msra.mxu1 (%p651_p10), %v4056_v58 }
 0x152   : > { %3933 = vmatprep.subr.bf16.mxu1 (%p651_p10), %v4282_v1 }
 0x1ec   : >> { %v1373_v63 = vpop.f32.mrf.mxu1 }
 0x1ed   : >> { %v1374_v5 = vadd.f32 %v1373_v63, %v1288_v60  ;;  %v3598_v60 = vcombine.low (%p651_p10), %v3559_v54, %v3560_v55 }
 0x1ee   : >> { %v1375_v6 = vpop.f32.mrf.mxu1 }
 0x1ef   : >> { %v1380_v8 = vmax.f32 %v1374_v5, 0.0  ;;  %v1376_v9 = vadd.f32 %v1375_v6, %v1292_v61  ;;  %v3561_v61 = vld [vmem:[%s4410_s19 + $0x78] sm:$0xf] (%p651_p10)  ;;  %v1874_v63 = vshll.u32 (%p651_p10), %v3598_v60, 16  ;;  %v1872_v5 = vshrl.u32 (%p651_p10), %v3598_v60, 16 }
 0x1f0   : >> { %v1377_v12 = vpop.f32.mrf.mxu1  ;;  %3930 = vmatmul.mubr.msk.bf16.vlgmr.msra.gmra.mxu1 (%p651_p10), %vm703_vm1, %v3561_v61 }
 0x1f1   : >> { %v1382_v14 = vpack.c.bf16 %v1380_v8, %v1380_v8  ;;  %v1381_v15 = vmax.f32 %v1376_v9, 0.0  ;;  %v1876_v6 = vrot.slane (%p651_p10), %v1874_v63, 1  ;;  %3934 = vmatpush3.bf16.msra.mxu1 (%p651_p10), %v4057_v62  ;;  %3937 = vmatprep.mubr.msk.bf16.mxu1 (%p651_p10), %vm4286_vm9, %v4282_v1  ;;  %v4060_v9 = vld [vmem:[%s5266_s6 + $0x60] sm:$0xff] (%p651_p10)  }
 0x1f2   : >> { %v1378_v16 = vpop.f32.mrf.mxu1  ;;  %3935 = vmatprep.subr.bf16.mxu1 (%p651_p10), %v4282_v1  ;;  %v1545_v12 = vld [vmem:[%s4415_s22] sm:$0xf] (%p651_p10) }
 0x1f3   : >> { %v1383_v18 = vpack.c.bf16 %v1381_v15, %v1381_v15  ;;  %v3764_v19 = vpack.c.bf16 %v1381_v15, %v1380_v8  ;;  %v1481_v4 = vsel %vm1479_vm7, %v1382_v14, 0  ;;  %v1877_v8 = vor.u32 (%p651_p10), %v1876_v6, %v1872_v5  ;;  %v4068_v14 = vld [vmem:[%s5268_s8 + $0x34] ss:$8 sps:$4 sm:$0xff] (%p651_p10)   ;;  %v4066_v15 = vld [vmem:[%s5268_s8 + $0x30] ss:$8 sps:$4 sm:$0xff] (%p651_p10)  }
 0x1f4   : > { %v4071_v16 = vld [vmem:[%s5268_s8 + $0x24] ss:$8 sps:$4 sm:$0xff] (%p651_p10)  }
 0x1f5   : >> { %1392 = vst [vmem:[%s1391_s17] sm:$0xff] %v3764_v19  ;;  %3554 = vmatprep.subr.msk.bf16.mxu0 %vm1479_vm7, %v1383_v18  ;;  %3936 = vmatpush3.bf16.msra.mxu1 (%p651_p10), %v4058_v3  ;;  %v4074_v18 = vld [vmem:[%s5268_s8 + $0x14] ss:$8 sps:$4 sm:$0xff] (%p651_p10)   ;;  %v4072_v19 = vld [vmem:[%s5268_s8 + $0x10] ss:$8 sps:$4 sm:$0xff] (%p651_p10)   ;;  %v3624_v3 = vld [vmem:[%s5267_s7] ss:$0 sm:$0xff] (%p651_p10) }
 0x1f6   : >> { %1501 = vmatpush1.bf16.msra.mxu0 %v1481_v4  ;;  %3941 = vmatprep.subr.bf16.mxu1 (%p651_p10), %v4282_v1  ;;  %v4075_v4 = vld [vmem:[%s5268_s8] ss:$8 sps:$4 sm:$0xff] (%p651_p10)   ;;  %s2262_s17 = sld [smem:[#allocation4 + %s4574_s30]] (%p651_p10)  ;;  %s5321_s30 = sadd.s32 (%p651_p10), 7, %s4571_s24 }
 0x1f7   : > { %3957 = vmatprep.subr.bf16.mxu0 (%p651_p10), %v4282_v1  ;;  %s2290_s2 = sld [smem:[#allocation4 + %s5321_s30]] (%p651_p10) }
 0x1f8   : > { %3938 = vmatmul.mubr.msk.bf16.vlgmr.msra.gmra.mxu1 (%p651_p10), %vm703_vm1, %v1877_v8 }
 0x1f9   : >> { %3555 = vmatmul.mubr.msk.bf16.vlgmr.msra.gmra.mxu0 %vm1476_vm8, %v1475_v21  ;;  %3942 = vmatpush3.bf16.msra.mxu1 (%p651_p10), %v4059_v7  ;;  %v4287_v21 = vmov (%p651_p10), 0  }
 0x1fa   : > { %3961 = vmatprep.mubr.msk.bf16.mxu0 (%p651_p10), %vm4286_vm9, %v4282_v1  ;;  %3958 = vmatpush3.bf16.msra.mxu0 (%p651_p10), %v4061_v41 }
 0x1fb   : > { %3959 = vmatprep.subr.bf16.mxu0 (%p651_p10), %v4282_v1  ;;  %3945 = vmatprep.mubr.msk.bf16.mxu1 (%p651_p10), %vm4286_vm9, %v4282_v1 }
 0x1fc   : > { %3943 = vmatprep.subr.bf16.mxu1 (%p651_p10), %v4282_v1  ;;  %4044 = vset.pattern.permute.xlu0 (%p651_p10), %v4287_v21  ;;  %p3638_p12 = scmp.ge.s32.totalorder (%p651_p10), %s2262_s17, 7 }
 0x1fd   : > { %3944 = vmatpush3.bf16.msra.mxu1 (%p651_p10), %v4060_v9 }
 0x1fe   : > { %3960 = vmatpush3.bf16.msra.mxu0 (%p651_p10), %v4064_v45  ;;  %3949 = vmatprep.subr.bf16.mxu1 (%p651_p10), %v4282_v1  ;;  %p4920_p1 = pnand (%p651_p10), %p3638_p12, %p3637_p11 }
 0x200   : > { %3946 = vmatmul.mubr.msk.bf16.vlgmr.msra.gmra.mxu1 (%p651_p10), %vm703_vm1, %v1543_v42 }
 0x201   : > { %3962 = vmatmul.mubr.msk.bf16.vlgmr.msra.gmra.mxu0 (%p651_p10), %vm703_vm1, %v2072_v53  ;;  %3950 = vmatpush3.bf16.msra.mxu1 (%p651_p10), %v4063_v10 }
 0x202   : > { %3953 = vmatprep.mubr.msk.bf16.mxu1 (%p651_p10), %vm4286_vm9, %v4282_v1  ;;  %3951 = vmatprep.subr.bf16.mxu1 (%p651_p10), %v4282_v1 }
 0x203   : > { %2381 = vmatprep.mubr.bf16.mxu0 (%p651_p10), %v4287_v21 }
 0x205   : > { %3952 = vmatpush3.bf16.msra.mxu1 (%p651_p10), %v4065_v11 }
 0x206   : > { %2211 = vmatprep.subr.bf16.mxu1 (%p651_p10), %v4068_v14  ;;  %v4083_v14 = vld [vmem:[%s5270_s10 + $0x15c] ss:$24 sps:$4 sm:$0xff] (%p651_p10)  }
 0x208   : > { %3954 = vmatmul.mubr.msk.bf16.vlgmr.msra.gmra.mxu1 (%p651_p10), %vm703_vm1, %v1545_v12  ;;  %v4081_v12 = vld [vmem:[%s5270_s10 + $0x158] ss:$24 sps:$4 sm:$0xff] (%p651_p10)   ;;  %vm5284_vm1 = vcmask (%p651_p10), 1041408  }
 0x209   : > { %2212 = vmatpush1.bf16.msra.mxu1 (%p651_p10), %v4066_v15  ;;  %2235 = vmatprep.mubr.bf16.mxu1 (%p651_p10), %v4287_v21  ;;  %v4089_v15 = vld [vmem:[%s5270_s10 + $0x12c] ss:$24 sps:$4 sm:$0xff] (%p651_p10)  }
 0x20a   : > { %2213 = vmatprep.subr.bf16.mxu1 (%p651_p10), %v4071_v16  ;;  %v2400_v16 = vstv (%p651_p10), %s2399_s21  ;;  %s2308_s21 = sld [smem:[#allocation4 + %s5319_s15]] (%p651_p10) }
 0x20d   : > { %2214 = vmatpush1.bf16.msra.mxu1 (%p651_p10), %v4069_v17  ;;  %v4087_v17 = vld [vmem:[%s5270_s10 + $0x128] ss:$24 sps:$4 sm:$0xff] (%p651_p10)  }
 0x20e   : > { %2215 = vmatprep.subr.bf16.mxu1 (%p651_p10), %v4074_v18  ;;  %v2402_v18 = vstv (%p651_p10), %s2401_s20  ;;  %s2264_s20 = sld [smem:[#allocation4 + %s4583_s16]] (%p651_p10) }
 0x20f   : > { %s2314_s16 = sld [smem:[#allocation4 + %s1450_s11]] (%p651_p10) }
 0x210   : > { %p3645_p3 = scmp.le.s32.totalorder (%p651_p10), %s2308_s21, 7 }
 0x211   : > { %2216 = vmatpush1.bf16.msra.mxu1 (%p651_p10), %v4072_v19  ;;  %v2404_v19 = vstv (%p651_p10), %s2403_s14  ;;  %s5320_s14 = sadd.s32 (%p651_p10), 9, %s4571_s24 }
 0x212   : > { %2217 = vmatprep.subr.bf16.mxu1 (%p651_p10), %v4077_v20  ;;  %v2405_v20 = vsel (%p651_p10), %vm1468_vm4, %v2400_v16, %v2402_v18  ;;  %s2310_s26 = sld [smem:[#allocation4 + %s5320_s14]] (%p651_p10)  ;;  %v4084_v18 = vld [vmem:[%s5270_s10 + $0x120] ss:$24 sps:$4 sm:$0xff] (%p651_p10)  }
 0x213   : > { %v2407_v21 = vsel (%p651_p10), %vm5284_vm1, %v2405_v20, %v2404_v19  ;;  %v4092_v19 = vld [vmem:[%s5270_s10 + $0xf4] ss:$24 sps:$4 sm:$0xff] (%p651_p10)   ;;  %v4090_v20 = vld [vmem:[%s5270_s10 + $0xf0] ss:$24 sps:$4 sm:$0xff] (%p651_p10)  }
 0x214   : > { %2411 = vperm.xlu0 (%p651_p10), %4044, %v2407_v21   ;;  %v4096_v21 = vld [vmem:[%s5270_s10 + $0xc0] ss:$24 sps:$4 sm:$0xff] (%p651_p10)  }
 0x215   : > { %2218 = vmatpush1.bf16.msra.mxu1 (%p651_p10), %v4075_v4  ;;  %v4095_v4 = vld [vmem:[%s5270_s10 + $0xfc] ss:$24 sps:$4 sm:$0xff] (%p651_p10)  }
 0x216   : > { %3076 = vmatprep.subr.bf16.mxu1 (%p651_p10), %v4083_v14 }
 0x218   : > { %p3646_p4 = scmp.ge.s32.totalorder (%p651_p10), %s2310_s26, 7 }
 0x21a   : > { %p4936_p5 = pnand (%p651_p10), %p3646_p4, %p3645_p3 }
 0x2b9   : >> { %v1520_v22 = vpop.f32.mrf.mxu0 }
 0x2bb   : >> { %v1522_v24 = vpop.f32.mrf.mxu0 }
 0x2bc   : >> { %v1529_v25 = vcombine.low %v1520_v22, %v1522_v24  ;;  %653 = sbr.rel (!%p651_p10) target bundleno = 58 (0x3a), region = 154  ;;  %v1605_v22 = vpop.f32.mrf.mxu1 (%p651_p10) }
 0x2bd   : >> { %v1524_v26 = vpop.f32.mrf.mxu0 }
 0x2be   : >> { %v1531_v27 = vadd.f32 %v1529_v25, %v1393_v23  ;;  %v3899_v23 = vpop.f32.mrf.mxu1 (%p651_p10) }
 0x2bf   : >> { %v1525_v28 = vpop.f32.mrf.mxu0  ;;  %v4101_v23 = vld [vmem:[%s5270_s10 + $0xcc] ss:$24 sps:$4 sm:$0xff] (%p651_p10)  }
 0x2c0   : >> { %1532 = vst [vmem:[#allocation2] sm:$0x77] %v1531_v27  ;;  %v1608_v24 = vpop.f32.mrf.mxu1 (%p651_p10) }
 0x2c1   : > { %v2122_v31 = vpop.f32.mrf.mxu0  ;;  %v4099_v24 = vld [vmem:[%s5270_s10 + $0xc8] ss:$24 sps:$4 sm:$0xff]   ;;  %s3639_s4 = scalar_select %p4920_p1, 0, 1 }
 0x2c2   : > { %v3900_v25 = vpop.f32.mrf.mxu1  ;;  %s3643_s5 = scalar_select %p4924_p2, 0, 1 }
 0x2c3   : > { %v3963_v33 = vpop.f32.mrf.mxu0  ;;  %v4107_v25 = vld [vmem:[%s5270_s10 + $0x9c] ss:$24 sps:$4 sm:$0xff]   ;;  %s3647_s11 = scalar_select %p4936_p5, 0, 1 }
 0x2c4   : > { %v1660_v26 = vpop.f32.mrf.mxu1  ;;  %v4129_v33 = vld [vmem:[%s5270_s10 + $0x2d8] ss:$24 sps:$4 sm:$0xff]  }
 0x2c5   : > { %v2125_v35 = vpop.f32.mrf.mxu0  ;;  %v1661_v49 = vadd.f32 %v1660_v26, %v1605_v22  ;;  %v4093_v22 = vld [vmem:[%s5270_s10 + $0xf8] ss:$24 sps:$4 sm:$0xff]  }
 0x2c6   : > { %v3907_v27 = vpop.f32.mrf.mxu1  ;;  %v4105_v26 = vld [vmem:[%s5270_s10 + $0x98] ss:$24 sps:$4 sm:$0xff]   ;;  %v4135_v35 = vld [vmem:[%s5270_s10 + $0x2a8] ss:$24 sps:$4 sm:$0xff]  }
 0x2c7   : > { %v3964_v37 = vpop.f32.mrf.mxu0  ;;  %v4113_v27 = vld [vmem:[%s5270_s10 + $0x6c] ss:$24 sps:$4 sm:$0xff]  }
 0x2c8   : > { %v1663_v28 = vpop.f32.mrf.mxu1  ;;  %v4141_v37 = vld [vmem:[%s5270_s10 + $0x278] ss:$24 sps:$4 sm:$0xff]  }
 0x2c9   : > { %v4111_v28 = vld [vmem:[%s5270_s10 + $0x68] ss:$24 sps:$4 sm:$0xff]  }
 0x2ca   : > { %v3908_v29 = vpop.f32.mrf.mxu1 }
 0x2cb   : > { %v4119_v29 = vld [vmem:[%s5270_s10 + $0x3c] ss:$24 sps:$4 sm:$0xff]  }
 0x2cc   : > { %v1732_v0 = vpop.f32.mrf.mxu1 }
 0x2cd   : > { %v1738_v51 = vadd.f32 %v1732_v0, %v1661_v49  ;;  %v4117_v0 = vld [vmem:[%s5270_s10 + $0x38] ss:$24 sps:$4 sm:$0xff]   ;;  %v2319_v49 = vstv %s2312_s1 }
 0x2ce   : > { %v3915_v30 = vpop.f32.mrf.mxu1  ;;  %vm2320_vm3 = vcmp.ge.s32.totalorder %v4390_v2, %v2319_v49  ;;  %v4162_v49 = vld [vmem:[%s5270_s10 + $0x1b0] ss:$24 sps:$4 sm:$0xff]  }
 0x2cf   : > { %v4125_v30 = vld [vmem:[%s5270_s10 + $0xc] ss:$24 sps:$4 sm:$0xff]  }
 0x2d0   : > { %v1735_v32 = vpop.f32.mrf.mxu1 }
 0x2d1   : > { %v4131_v32 = vld [vmem:[%s5270_s10 + $0x2dc] ss:$24 sps:$4 sm:$0xff]  }
 0x2d2   : > { %v3916_v34 = vpop.f32.mrf.mxu1 }
 0x2d3   : > { %v4137_v34 = vld [vmem:[%s5270_s10 + $0x2ac] ss:$24 sps:$4 sm:$0xff]  }
 0x2d4   : > { %v1793_v36 = vpop.f32.mrf.mxu1 }
 0x2d5   : > { %v1799_v53 = vadd.f32 %v1793_v36, %v1738_v51  ;;  %v4143_v36 = vld [vmem:[%s5270_s10 + $0x27c] ss:$24 sps:$4 sm:$0xff]   ;;  %v2147_v51 = vld [vmem:[%s5269_s9] sm:$0x3] }
 0x2d6   : > { %v3923_v38 = vpop.f32.mrf.mxu1 }
 0x2d7   : > { %v2271_v38 = vstv %s2264_s20 }
 0x2d8   : > { %v1796_v39 = vpop.f32.mrf.mxu1 }
 0x2d9   : > { %v2273_v39 = vstv %s2266_s0 }
 0x2da   : > { %v3924_v40 = vpop.f32.mrf.mxu1  ;;  %vm4946_vm10 = vcmp.le.s32.totalorder %v4390_v2, %v2273_v39  ;;  %v4152_v39 = vld [vmem:[%s5270_s10 + $0x214] ss:$24 sps:$4 sm:$0xff]  }
 0x2db   : > { %v2295_v40 = vstv %s2288_s28 }
 0x2dc   : > { %v1854_v41 = vpop.f32.mrf.mxu1  ;;  %vm4951_vm11 = vcmp.ge.s32.totalorder %v4390_v2, %v2295_v40  ;;  %v4150_v40 = vld [vmem:[%s5270_s10 + $0x210] ss:$24 sps:$4 sm:$0xff]  }
 0x2dd   : > { %v1860_v55 = vadd.f32 %v1854_v41, %v1799_v53  ;;  %v2297_v41 = vstv %s2290_s2  ;;  %v2152_v53 = vrot.slane %v2147_v51, %v4661_v56 }
 0x2de   : > { %v3931_v42 = vpop.f32.mrf.mxu1  ;;  %vm4956_vm12 = vcmp.le.s32.totalorder %v4390_v2, %v2297_v41  ;;  %v4155_v41 = vld [vmem:[%s5270_s10 + $0x21c] ss:$24 sps:$4 sm:$0xff]  }
 0x2df   : > { %vm2299_vm15 = vmand %vm4951_vm11, %vm4956_vm12  ;;  %v4153_v42 = vld [vmem:[%s5270_s10 + $0x218] ss:$24 sps:$4 sm:$0xff]  }
 0x2e0   : > { %v1857_v43 = vpop.f32.mrf.mxu1 }
 0x2e1   : > { %v4156_v43 = vld [vmem:[%s5270_s10 + $0x1e0] ss:$24 sps:$4 sm:$0xff]  }
 0x2e2   : > { %v3932_v44 = vpop.f32.mrf.mxu1 }
 0x2e3   : > { %v2277_v44 = vstv %s3639_s4  ;;  %s5333_s4 = sld [smem:[#allocation16_spill]] }
 0x2e4   : > { %v1927_v45 = vpop.f32.mrf.mxu1  ;;  %vm2278_vm14 = vcmp.eq.s32.totalorder %v2277_v44, 1  ;;  %v4158_v44 = vld [vmem:[%s5270_s10 + $0x1e4] ss:$24 sps:$4 sm:$0xff]  }
 0x2e5   : > { %v1933_v58 = vadd.f32 %v1927_v45, %v1860_v55  ;;  %v4159_v45 = vld [vmem:[%s5270_s10 + $0x1e8] ss:$24 sps:$4 sm:$0xff]  }
 0x2e6   : > { %v3939_v46 = vpop.f32.mrf.mxu1 }
 0x2e7   : > { %v4161_v46 = vld [vmem:[%s5270_s10 + $0x1ec] ss:$24 sps:$4 sm:$0xff]  }
 0x2e8   : > { %v1930_v48 = vpop.f32.mrf.mxu1 }
 0x2e9   : > { %v2301_v48 = vstv %s3643_s5  ;;  %s5339_s5 = sld [smem:[#allocation11_spill]] }
 0x2ea   : > { %v3940_v50 = vpop.f32.mrf.mxu1  ;;  %vm2302_vm0 = vcmp.eq.s32.totalorder %v2301_v48, 1  ;;  %v4164_v48 = vld [vmem:[%s5270_s10 + $0x1b4] ss:$24 sps:$4 sm:$0xff]  }
 0x2eb   : > { %v2321_v50 = vstv %s2314_s16  ;;  %vm2303_vm1 = vmand %vm2299_vm15, %vm2302_vm0 }
 0x2ec   : > { %v1988_v52 = vpop.f32.mrf.mxu1  ;;  %vm2322_vm5 = vcmp.le.s32.totalorder %v4390_v2, %v2321_v50  ;;  %v4167_v50 = vld [vmem:[%s5270_s10 + $0x1bc] ss:$24 sps:$4 sm:$0xff]  }
 0x2ed   : > { %v1994_v61 = vadd.f32 %v1988_v52, %v1933_v58  ;;  %v2325_v52 = vstv %s3647_s11  ;;  %v3644_v58 = vsel %vm2303_vm1, 1.0, %v4282_v1 }
 0x2ee   : > { %v3947_v54 = vpop.f32.mrf.mxu1 }
 0x2ef   : > { %v2156_v54 = vrot.slane %v2147_v51, %v4673_v59  ;;  %v4165_v51 = vld [vmem:[%s5270_s10 + $0x1b8] ss:$24 sps:$4 sm:$0xff]  }
 0x2f0   : > { %v1991_v57 = vpop.f32.mrf.mxu1 }
 0x2f2   : > { %v3948_v60 = vpop.f32.mrf.mxu1 }
 0x2f4   : > { %v2049_v62 = vpop.f32.mrf.mxu1 }
 0x2f5   : > { %v2055_v63 = vadd.f32 %v2049_v62, %v1994_v61 }
 0x2f6   : > { %v3955_v5 = vpop.f32.mrf.mxu1 }
 0x2f7   : > { %v2128_v6 = vadd.f32 %v2122_v31, %v2055_v63  ;;  %v4123_v31 = vld [vmem:[%s5270_s10 + $0x8] ss:$24 sps:$4 sm:$0xff]  }
 0x2f8   : > { %v2052_v7 = vpop.f32.mrf.mxu1 }
 0x2f9   : > { %v2136_v8 = vadd.f32 %v3624_v3, %v2128_v6  ;;  %v2306_v3 = vpack.c.bf16 %v3644_v58, %v3644_v58  ;;  %v4288_v58 = vmov 839922192  }
 0x2fa   : > { %v3956_v9 = vpop.f32.mrf.mxu1 }
 0x2fb   : > { %v2137_v10 = vmax.f32 %v2136_v8, 0.0 }
 0x2fd   : > { %v2138_v11 = vpack.c.bf16 %v2137_v10, %v2137_v10 }
 0x2ff   : > { %3633 = vmatmul.mubr.msk.bf16.vlgmr.msra.gmra.mxu1 %vm1335_vm2, %v2138_v11  ;;  %vm4941_vm2 = vcmp.ge.s32.totalorder %v4390_v2, %v2271_v38  ;;  %v4147_v38 = vld [vmem:[%s5270_s10 + $0x248] ss:$24 sps:$4 sm:$0xff]  }
 0x300   : > { %3077 = vmatpush1.bf16.msra.mxu1 %v4081_v12  ;;  %vm2275_vm13 = vmand %vm4941_vm2, %vm4946_vm10  ;;  %vm2326_vm10 = vcmp.eq.s32.totalorder %v2325_v52, 1  ;;  %v4170_v52 = vld [vmem:[%s5270_s10 + $0x184] ss:$24 sps:$4 sm:$0xff]  }
 0x301   : > { %3078 = vmatprep.subr.bf16.mxu1 %v4089_v15  ;;  %vm2279_vm9 = vmand %vm2275_vm13, %vm2278_vm14  ;;  %v4080_v15 = vld [vmem:[%s5270_s10 + $0x154] ss:$24 sps:$4 sm:$0xff]   ;;  %vm3210_vm13 = vcmask 1045508   ;;  %vm3211_vm14 = vsmask.f32 5376 }
 0x302   : > { %vm2323_vm2 = vmand %vm2320_vm3, %vm2322_vm5  ;;  %v3640_v55 = vsel %vm2279_vm9, 1.0, %v4282_v1  ;;  %vm3214_vm3 = vcmask 1047558   ;;  %vm3215_vm5 = vsmask.f32 7424 }
 0x303   : > { %vm2327_vm11 = vmand %vm2323_vm2, %vm2326_vm10  ;;  %v2282_v62 = vpack.c.bf16 %v3640_v55, %v3640_v55  ;;  %v4171_v55 = vld [vmem:[%s5270_s10 + $0x188] ss:$24 sps:$4 sm:$0xff]  }
 0x304   : > { %3079 = vmatpush1.bf16.msra.mxu1 %v4087_v17  ;;  %v3648_v5 = vsel %vm2327_vm11, 1.0, %v4282_v1  ;;  %v4078_v17 = vld [vmem:[%s5270_s10 + $0x150] ss:$24 sps:$4 sm:$0xff]   ;;  %vm3212_vm0 = vmand %vm3210_vm13, %vm3211_vm14 }
 0x305   : > { %3080 = vmatprep.subr.bf16.mxu1 %v4095_v4  ;;  %v2330_v10 = vpack.c.bf16 %v3648_v5, %v3648_v5  ;;  %v2334_v14 = vsel %vm4682_vm6, %v2282_v62, %v2306_v3  ;;  %v4098_v4 = vld [vmem:[%s5270_s10 + $0xc4] ss:$24 sps:$4 sm:$0xff]   ;;  %vm3206_vm6 = vcmask 1043458   ;;  %vm3216_vm2 = vmand %vm3214_vm3, %vm3215_vm5 }
 0x306   : > { %v2256_v62 = vld [vmem:[#allocation2] sm:$0x77] }
 0x307   : > { %v2338_v1 = vsel %vm1468_vm4, %v2334_v14, %v2330_v10  ;;  %vm3204_vm4 = vsmask.f32 1280 }
 0x308   : > { %3081 = vmatpush1.bf16.msra.mxu1 %v4093_v22  ;;  %v4104_v22 = vld [vmem:[%s5270_s10 + $0x94] ss:$24 sps:$4 sm:$0xff]  }
 0x309   : > { %3082 = vmatprep.subr.bf16.mxu1 %v4101_v23  ;;  %v4102_v23 = vld [vmem:[%s5270_s10 + $0x90] ss:$24 sps:$4 sm:$0xff]  }
 0x30c   : > { %3083 = vmatpush1.bf16.msra.mxu1 %v4099_v24  ;;  %v4110_v24 = vld [vmem:[%s5270_s10 + $0x64] ss:$24 sps:$4 sm:$0xff]  }
 0x30d   : > { %3084 = vmatprep.subr.bf16.mxu1 %v4107_v25  ;;  %v4108_v25 = vld [vmem:[%s5270_s10 + $0x60] ss:$24 sps:$4 sm:$0xff]  }
 0x310   : > { %3085 = vmatpush1.bf16.msra.mxu1 %v4105_v26  ;;  %v4116_v26 = vld [vmem:[%s5270_s10 + $0x34] ss:$24 sps:$4 sm:$0xff]  }
 0x311   : > { %3086 = vmatprep.subr.bf16.mxu1 %v4113_v27  ;;  %v4114_v27 = vld [vmem:[%s5270_s10 + $0x30] ss:$24 sps:$4 sm:$0xff]  }
 0x314   : > { %3087 = vmatpush1.bf16.msra.mxu1 %v4111_v28  ;;  %v4122_v28 = vld [vmem:[%s5270_s10 + $0x4] ss:$24 sps:$4 sm:$0xff]  }
 0x315   : > { %3088 = vmatprep.subr.bf16.mxu1 %v4119_v29  ;;  %v4120_v29 = vld [vmem:[%s5270_s10] ss:$24 sps:$4 sm:$0xff]  }
 0x318   : > { %3089 = vmatpush1.bf16.msra.mxu1 %v4117_v0  ;;  %v4128_v0 = vld [vmem:[%s5270_s10 + $0x2d4] ss:$24 sps:$4 sm:$0xff]  }
 0x319   : > { %3090 = vmatprep.subr.bf16.mxu1 %v4125_v30  ;;  %v4126_v30 = vld [vmem:[%s5270_s10 + $0x2d0] ss:$24 sps:$4 sm:$0xff]  }
 0x31c   : > { %3091 = vmatpush1.bf16.msra.mxu1 %v4123_v31  ;;  %v4134_v31 = vld [vmem:[%s5270_s10 + $0x2a4] ss:$24 sps:$4 sm:$0xff]  }
 0x31d   : > { %3092 = vmatprep.subr.bf16.mxu1 %v4131_v32  ;;  %v4132_v32 = vld [vmem:[%s5270_s10 + $0x2a0] ss:$24 sps:$4 sm:$0xff]  }
 0x320   : > { %3093 = vmatpush2.bf16.msra.mxu1 %v4129_v33  ;;  %v4140_v33 = vld [vmem:[%s5270_s10 + $0x274] ss:$24 sps:$4 sm:$0xff]  }
 0x321   : > { %3094 = vmatprep.subr.bf16.mxu1 %v4137_v34  ;;  %v4138_v34 = vld [vmem:[%s5270_s10 + $0x270] ss:$24 sps:$4 sm:$0xff]  }
 0x324   : > { %3095 = vmatpush2.bf16.msra.mxu1 %v4135_v35  ;;  %v4146_v35 = vld [vmem:[%s5270_s10 + $0x244] ss:$24 sps:$4 sm:$0xff]  }
 0x325   : > { %3096 = vmatprep.subr.bf16.mxu1 %v4143_v36  ;;  %v4144_v36 = vld [vmem:[%s5270_s10 + $0x240] ss:$24 sps:$4 sm:$0xff]  }
 0x328   : > { %3097 = vmatpush2.bf16.msra.mxu1 %v4141_v37  ;;  %v4149_v37 = vld [vmem:[%s5270_s10 + $0x24c] ss:$24 sps:$4 sm:$0xff]  }
 0x329   : > { %3098 = vmatprep.subr.bf16.mxu1 %v4149_v37  ;;  %v4210_v37 = vld [vmem:[%s5270_s10 + $0x220] ss:$24 sps:$4 sm:$0xff]  }
 0x32c   : > { %3099 = vmatpush2.bf16.msra.mxu1 %v4147_v38  ;;  %v4215_v38 = vld [vmem:[%s5270_s10 + $0x1f4] ss:$24 sps:$4 sm:$0xff]  }
 0x32d   : > { %3100 = vmatprep.subr.bf16.mxu1 %v4155_v41  ;;  %v4216_v41 = vld [vmem:[%s5270_s10 + $0x1c0] ss:$24 sps:$4 sm:$0xff]  }
 0x330   : > { %3101 = vmatpush2.bf16.msra.mxu1 %v4153_v42  ;;  %v4221_v42 = vld [vmem:[%s5270_s10 + $0x194] ss:$24 sps:$4 sm:$0xff]  }
 0x331   : > { %3102 = vmatprep.subr.bf16.mxu1 %v4161_v46  ;;  %v2539_v46 = vsub.s32 3, %v4632_v47 }
 0x334   : > { %3103 = vmatpush2.bf16.msra.mxu1 %v4159_v45  ;;  %v2523_v45 = vld [vmem:[%s5333_s4] sm:$0x3f] }
 0x335   : > { %3104 = vmatprep.subr.bf16.mxu1 %v4167_v50  ;;  %v2528_v50 = vrot.slane %v2523_v45, %v4661_v56 }
 0x338   : > { %3105 = vmatpush2.bf16.msra.mxu1 %v4165_v51 }
 0x3bf   : > { %v2237_v57 = vpop.f32.mrf.mxu1 }
 0x3c0   : > { %v2238_v60 = vadd.f32 %v2237_v57, %v2152_v53  ;;  %v4168_v53 = vld [vmem:[%s5270_s10 + $0x180] ss:$24 sps:$4 sm:$0xff]   ;;  %v4176_v57 = vld [vmem:[%s5270_s10 + $0x164] ss:$24 sps:$4 sm:$0xff]  }
 0x3c1   : > { %v2239_v61 = vpop.f32.mrf.mxu1 }
 0x3c2   : > { %v2244_v2 = vmax.f32 %v2238_v60, 0.0  ;;  %v2240_v63 = vadd.f32 %v2239_v61, %v2156_v54  ;;  %v4173_v54 = vld [vmem:[%s5270_s10 + $0x18c] ss:$24 sps:$4 sm:$0xff]   ;;  %v2414_v60 = vunpack.c.l.s4 %v4288_v58 }
 0x3c3   : > { %v2241_v6 = vpop.f32.mrf.mxu1  ;;  %3106 = vmatprep.subr.bf16.mxu1 %v4173_v54  ;;  %v2532_v54 = vrot.slane %v2523_v45, %v4673_v59 }
 0x3c4   : > { %v2246_v7 = vpack.c.bf16 %v2244_v2, %v2244_v2  ;;  %v2245_v8 = vmax.f32 %v2240_v63, 0.0  ;;  %3107 = vmatpush2.bf16.msra.mxu1 %v4171_v55  ;;  %v2415_v3 = vunpack.c.0.s8 %v2414_v60  ;;  %v2540_v55 = vrot.slane %v2523_v45, %v2539_v46 }
 0x3c5   : > { %v2242_v9 = vpop.f32.mrf.mxu1 }
 0x3c6   : > { %v2247_v11 = vpack.c.bf16 %v2245_v8, %v2245_v8  ;;  %v3766_v12 = vpack.c.bf16 %v2245_v8, %v2244_v2  ;;  %v2344_v16 = vsel %vm1479_vm7, %v2246_v7, 0  ;;  %v2418_v8 = vsub.s32 %v2415_v3, %v4632_v47  ;;  %v2412_v9 = vpop.permute.xlu0 %2411 }
 0x3c8   : > { %3635 = vst [vmem:[%s4395_s25 + $0x38] sm:$0xff] %v3766_v12  ;;  %3649 = vmatprep.subr.msk.bf16.mxu0 %vm1479_vm7, %v2247_v11  ;;  %v2419_v10 = vrot.slane %v2412_v9, %v2418_v8  ;;  %vm3207_vm7 = vsmask.f32 3328 }
 0x3c9   : > { %2364 = vmatpush1.bf16.msra.mxu0 %v2344_v16  ;;  %v4174_v16 = vld [vmem:[%s5270_s10 + $0x160] ss:$24 sps:$4 sm:$0xff]   ;;  %vm5226_vm12 = vmand %vm3206_vm6, %vm3207_vm7 }
 0x3ca   : > { %3035 = vmatprep.subr.bf16.mxu0 %v4080_v15 }
 0x3cc   : > { %3650 = vmatmul.mubr.msk.bf16.vlgmr.msra.gmra.mxu0 %vm1476_vm8, %v2338_v1  ;;  %vm5334_vm8 = vcmask 1041408  }
 0x3cd   : > { %3036 = vmatpush1.bf16.msra.mxu0 %v4078_v17  ;;  %v4179_v17 = vld [vmem:[%s5270_s10 + $0x134] ss:$24 sps:$4 sm:$0xff]   ;;  %vm5222_vm1 = vmand %vm5334_vm8, %vm3204_vm4 }
 0x3ce   : > { %3037 = vmatprep.subr.bf16.mxu0 %v4086_v13  ;;  %v4177_v13 = vld [vmem:[%s5270_s10 + $0x130] ss:$24 sps:$4 sm:$0xff]   ;;  %vm3209_vm15 = vmor %vm5226_vm12, %vm5222_vm1 }
 0x3cf   : > { %vm3213_vm9 = vmor %vm3212_vm0, %vm3209_vm15 }
 0x3d0   : > { %vm3217_vm10 = vmor %vm3216_vm2, %vm3213_vm9 }
 0x3d1   : > { %3038 = vmatpush1.bf16.msra.mxu0 %v4084_v18  ;;  %v4182_v18 = vld [vmem:[%s5270_s10 + $0x104] ss:$24 sps:$4 sm:$0xff]  }
 0x3d2   : > { %3039 = vmatprep.subr.bf16.mxu0 %v4092_v19  ;;  %v4180_v19 = vld [vmem:[%s5270_s10 + $0x100] ss:$24 sps:$4 sm:$0xff]  }
 0x3d5   : > { %3040 = vmatpush1.bf16.msra.mxu0 %v4090_v20  ;;  %v4185_v20 = vld [vmem:[%s5270_s10 + $0xd4] ss:$24 sps:$4 sm:$0xff]  }
 0x3d6   : > { %3041 = vmatprep.subr.bf16.mxu0 %v4098_v4  ;;  %v4183_v4 = vld [vmem:[%s5270_s10 + $0xd0] ss:$24 sps:$4 sm:$0xff]  }
 0x3d9   : > { %3042 = vmatpush1.bf16.msra.mxu0 %v4096_v21  ;;  %v4188_v21 = vld [vmem:[%s5270_s10 + $0xa4] ss:$24 sps:$4 sm:$0xff]  }
 0x3da   : > { %3043 = vmatprep.subr.bf16.mxu0 %v4104_v22  ;;  %v4186_v22 = vld [vmem:[%s5270_s10 + $0xa0] ss:$24 sps:$4 sm:$0xff]  }
 0x3dd   : > { %3044 = vmatpush1.bf16.msra.mxu0 %v4102_v23  ;;  %v4191_v23 = vld [vmem:[%s5270_s10 + $0x74] ss:$24 sps:$4 sm:$0xff]  }
 0x3de   : > { %3045 = vmatprep.subr.bf16.mxu0 %v4110_v24  ;;  %v4189_v24 = vld [vmem:[%s5270_s10 + $0x70] ss:$24 sps:$4 sm:$0xff]  }
 0x3e1   : > { %3046 = vmatpush1.bf16.msra.mxu0 %v4108_v25  ;;  %v4194_v25 = vld [vmem:[%s5270_s10 + $0x44] ss:$24 sps:$4 sm:$0xff]  }
 0x3e2   : > { %3047 = vmatprep.subr.bf16.mxu0 %v4116_v26  ;;  %v4192_v26 = vld [vmem:[%s5270_s10 + $0x40] ss:$24 sps:$4 sm:$0xff]  }
 0x3e5   : > { %3048 = vmatpush1.bf16.msra.mxu0 %v4114_v27  ;;  %v4197_v27 = vld [vmem:[%s5270_s10 + $0x14] ss:$24 sps:$4 sm:$0xff]  }
 0x3e6   : > { %3049 = vmatprep.subr.bf16.mxu0 %v4122_v28  ;;  %v4195_v28 = vld [vmem:[%s5270_s10 + $0x10] ss:$24 sps:$4 sm:$0xff]  }
 0x3e9   : > { %3050 = vmatpush1.bf16.msra.mxu0 %v4120_v29  ;;  %v4200_v29 = vld [vmem:[%s5270_s10 + $0x2e4] ss:$24 sps:$4 sm:$0xff]  }
 0x3ea   : > { %3051 = vmatprep.subr.bf16.mxu0 %v4128_v0  ;;  %v4198_v0 = vld [vmem:[%s5270_s10 + $0x2e0] ss:$24 sps:$4 sm:$0xff]  }
 0x3ed   : > { %3052 = vmatpush2.bf16.msra.mxu0 %v4126_v30  ;;  %v4203_v30 = vld [vmem:[%s5270_s10 + $0x2b4] ss:$24 sps:$4 sm:$0xff]  }
 0x3ee   : > { %3053 = vmatprep.subr.bf16.mxu0 %v4134_v31  ;;  %v4201_v31 = vld [vmem:[%s5270_s10 + $0x2b0] ss:$24 sps:$4 sm:$0xff]  }
 0x3f1   : > { %3054 = vmatpush2.bf16.msra.mxu0 %v4132_v32  ;;  %v4206_v32 = vld [vmem:[%s5270_s10 + $0x284] ss:$24 sps:$4 sm:$0xff]  }
 0x3f2   : > { %3055 = vmatprep.subr.bf16.mxu0 %v4140_v33  ;;  %v4204_v33 = vld [vmem:[%s5270_s10 + $0x280] ss:$24 sps:$4 sm:$0xff]  }
 0x3f5   : > { %3056 = vmatpush2.bf16.msra.mxu0 %v4138_v34  ;;  %v4209_v34 = vld [vmem:[%s5270_s10 + $0x254] ss:$24 sps:$4 sm:$0xff]  }
 0x3f6   : > { %3057 = vmatprep.subr.bf16.mxu0 %v4146_v35  ;;  %v4207_v35 = vld [vmem:[%s5270_s10 + $0x250] ss:$24 sps:$4 sm:$0xff]  }
 0x3f9   : > { %3058 = vmatpush2.bf16.msra.mxu0 %v4144_v36  ;;  %v4212_v36 = vld [vmem:[%s5270_s10 + $0x224] ss:$24 sps:$4 sm:$0xff]  }
 0x3fa   : > { %3059 = vmatprep.subr.bf16.mxu0 %v4152_v39  ;;  %v4213_v39 = vld [vmem:[%s5270_s10 + $0x1f0] ss:$24 sps:$4 sm:$0xff]  }
 0x3fd   : > { %3060 = vmatpush2.bf16.msra.mxu0 %v4150_v40  ;;  %v4218_v40 = vld [vmem:[%s5270_s10 + $0x1c4] ss:$24 sps:$4 sm:$0xff]  }
 0x3fe   : > { %3061 = vmatprep.subr.bf16.mxu0 %v4158_v44  ;;  %v2535_v44 = vsub.s32 2, %v4632_v47 }
 0x400   : > { %v2536_v51 = vrot.slane %v2523_v45, %v2535_v44 }
 0x401   : > { %3062 = vmatpush2.bf16.msra.mxu0 %v4156_v43  ;;  %v4219_v43 = vld [vmem:[%s5270_s10 + $0x190] ss:$24 sps:$4 sm:$0xff]  }
 0x402   : > { %3063 = vmatprep.subr.bf16.mxu0 %v4164_v48  ;;  %v4289_v48 = vmov 1983009808  }
 0x405   : > { %3064 = vmatpush2.bf16.msra.mxu0 %v4162_v49  ;;  %v3179_v49 = vunpack.c.l.s4 %v4289_v48 }
 0x406   : > { %3065 = vmatprep.subr.bf16.mxu0 %v4170_v52 }
 0x407   : > { %v3180_v60 = vunpack.c.0.s8 %v3179_v49 }
 0x409   : > { %3066 = vmatpush2.bf16.msra.mxu0 %v4168_v53  ;;  %v3183_v59 = vsub.s32 %v3180_v60, %v4632_v47 }
 0x40a   : > { %3117 = vmatprep.subr.bf16.mxu0 %v4176_v57 }
 0x48c   : > { %v2383_v61 = vpop.f32.mrf.mxu0 }
 0x48e   : > { %v2385_v2 = vpop.f32.mrf.mxu0 }
 0x48f   : > { %v2392_v63 = vcombine.low %v2383_v61, %v2385_v2 }
 0x490   : > { %v2387_v5 = vpop.f32.mrf.mxu0 }
 0x491   : > { %v2394_v6 = vadd.f32 %v2392_v63, %v2256_v62 }
 0x492   : > { %v2388_v7 = vpop.f32.mrf.mxu0 }
 0x493   : > { %2395 = vst [vmem:[#allocation2] sm:$0x77] %v2394_v6 }
 0x49a   : > { %v2408_v11 = vld [vmem:[#allocation2] sm:$0x77] }
 0x49b   : > { %v2421_v12 = vmul.f32 %v2419_v10, %v2408_v11 }
 0x49d   : > { %v2423_v14 = vcombine.high %v2421_v12, %v2421_v12  ;;  %v5120_v1 = vpack.c.bf16 %v2421_v12, %v2421_v12 }
 0x49f   : > { %v2426_v15 = vpack.c.bf16 %v2423_v14, %v2423_v14 }
 0x4a1   : > { %3067 = vmatprep.mubr.bf16.mxu0 %v2426_v15  ;;  %3108 = vmatprep.mubr.bf16.mxu1 %v2426_v15 }
 0x4a2   : > { %3068 = vmatmul.mubr.bf16.vlgmr.msra.gmra.mxu0 %v5120_v1  ;;  %3109 = vmatmul.mubr.bf16.vlgmr.msra.gmra.mxu1 %v5120_v1 }
 0x4a3   : > { %3118 = vmatpush1.bf16.msra.mxu0 %v4174_v16  ;;  %3149 = vmatprep.mubr.bf16.mxu0 %v2426_v15 }
 0x4a4   : > { %3119 = vmatprep.subr.bf16.mxu0 %v4179_v17  ;;  %v3218_v17 = vld [vmem:[%s5339_s5] sm:$0xff] }
 0x4a7   : > { %3120 = vmatpush1.bf16.msra.mxu0 %v4177_v13 }
 0x4a8   : > { %3121 = vmatprep.subr.bf16.mxu0 %v4182_v18 }
 0x4ab   : > { %3122 = vmatpush1.bf16.msra.mxu0 %v4180_v19  ;;  %v2543_v19 = vsub.s32 4, %v4632_v47 }
 0x4ac   : > { %3123 = vmatprep.subr.bf16.mxu0 %v4185_v20  ;;  %v2547_v20 = vsub.s32 5, %v4632_v47 }
 0x4af   : > { %3124 = vmatpush1.bf16.msra.mxu0 %v4183_v4  ;;  %v2544_v4 = vrot.slane %v2523_v45, %v2543_v19 }
 0x4b0   : > { %3125 = vmatprep.subr.bf16.mxu0 %v4188_v21  ;;  %v2548_v21 = vrot.slane %v2523_v45, %v2547_v20 }
 0x4b3   : > { %3126 = vmatpush1.bf16.msra.mxu0 %v4186_v22 }
 0x4b4   : > { %3127 = vmatprep.subr.bf16.mxu0 %v4191_v23 }
 0x4b7   : > { %3128 = vmatpush1.bf16.msra.mxu0 %v4189_v24 }
 0x4b8   : > { %3129 = vmatprep.subr.bf16.mxu0 %v4194_v25 }
 0x4bb   : > { %3130 = vmatpush1.bf16.msra.mxu0 %v4192_v26 }
 0x4bc   : > { %3131 = vmatprep.subr.bf16.mxu0 %v4197_v27 }
 0x4bf   : > { %3132 = vmatpush1.bf16.msra.mxu0 %v4195_v28 }
 0x4c0   : > { %3133 = vmatprep.subr.bf16.mxu0 %v4200_v29 }
 0x4c3   : > { %3134 = vmatpush2.bf16.msra.mxu0 %v4198_v0 }
 0x4c4   : > { %3135 = vmatprep.subr.bf16.mxu0 %v4203_v30  ;;  %v3221_v30 = vld [vmem:[%s5339_s5 + $0x8] sm:$0xf] }
 0x4c7   : > { %3136 = vmatpush2.bf16.msra.mxu0 %v4201_v31 }
 0x4c8   : > { %3137 = vmatprep.subr.bf16.mxu0 %v4206_v32 }
 0x4cb   : > { %3138 = vmatpush2.bf16.msra.mxu0 %v4204_v33 }
 0x4cc   : > { %3139 = vmatprep.subr.bf16.mxu0 %v4209_v34 }
 0x4cf   : > { %3140 = vmatpush2.bf16.msra.mxu0 %v4207_v35 }
 0x4d0   : > { %3141 = vmatprep.subr.bf16.mxu0 %v4212_v36 }
 0x4d3   : > { %3142 = vmatpush2.bf16.msra.mxu0 %v4210_v37 }
 0x4d4   : > { %3143 = vmatprep.subr.bf16.mxu0 %v4215_v38 }
 0x4d7   : > { %3144 = vmatpush2.bf16.msra.mxu0 %v4213_v39 }
 0x4d8   : > { %3145 = vmatprep.subr.bf16.mxu0 %v4218_v40 }
 0x4db   : > { %3146 = vmatpush2.bf16.msra.mxu0 %v4216_v41 }
 0x4dc   : > { %3147 = vmatprep.subr.bf16.mxu0 %v4221_v42 }
 0x4df   : > { %3148 = vmatpush2.bf16.msra.mxu0 %v4219_v43 }
 0x4e2   : > { %3150 = vmatmul.mubr.bf16.vlgmr.msra.gmra.mxu0 %v5120_v1 }
 0x562   : > { %v3069_v57 = vpop.f32.mrf.mxu0  ;;  %v3110_v58 = vpop.f32.mrf.mxu1 }
 0x563   : > { %v3070_v61 = vadd.f32 %v3069_v57, %v2528_v50  ;;  %v3111_v56 = vadd.f32 %v3110_v58, %v2536_v51 }
 0x564   : > { %v3071_v62 = vpop.f32.mrf.mxu0  ;;  %v3112_v2 = vpop.f32.mrf.mxu1 }
 0x565   : > { %v3072_v63 = vadd.f32 %v3071_v62, %v2532_v54  ;;  %v3113_v3 = vadd.f32 %v3112_v2, %v2540_v55  ;;  %v3158_v7 = vmax.f32 %v3070_v61, 0.0  ;;  %v3160_v8 = vmax.f32 %v3111_v56, 0.0 }
 0x566   : > { %v3073_v5 = vpop.f32.mrf.mxu0  ;;  %v3114_v6 = vpop.f32.mrf.mxu1 }
 0x567   : > { %v3159_v9 = vmax.f32 %v3072_v63, 0.0  ;;  %v3161_v10 = vmax.f32 %v3113_v3, 0.0 }
 0x568   : > { %v3074_v11 = vpop.f32.mrf.mxu0  ;;  %v3115_v12 = vpop.f32.mrf.mxu1 }
 0x569   : > { %v3747_v14 = vpack.c.bf16 %v3159_v9, %v3158_v7  ;;  %v3748_v15 = vpack.c.bf16 %v3161_v10, %v3160_v8 }
 0x56b   : > { %v3184_v16 = vrot.slane %v3747_v14, %v3183_v59  ;;  %v3191_v1 = vrot.slane %v3748_v15, %v3183_v59 }
 0x56d   : > { %v3192_v13 = vcombine.low %v3184_v16, %v3191_v1 }
 0x56f   : > { %v3219_v18 = vsel %vm3217_vm10, %v3192_v13, %v3218_v17 }
 0x570   : > { %3220 = vst [vmem:[%s5339_s5] sm:$0xff] %v3219_v18 }
 0x5a2   : > { %v3151_v22 = vpop.f32.mrf.mxu0 }
 0x5a3   : > { %v3152_v23 = vadd.f32 %v3151_v22, %v2544_v4 }
 0x5a4   : > { %v3153_v24 = vpop.f32.mrf.mxu0 }
 0x5a5   : > { %v3154_v25 = vadd.f32 %v3153_v24, %v2548_v21  ;;  %v3162_v27 = vmax.f32 %v3152_v23, 0.0 }
 0x5a6   : > { %v3155_v26 = vpop.f32.mrf.mxu0 }
 0x5a7   : > { %v3163_v28 = vmax.f32 %v3154_v25, 0.0 }
 0x5a8   : > { %v3156_v29 = vpop.f32.mrf.mxu0 }
 0x5a9   : > { %v3749_v0 = vpack.c.bf16 %v3163_v28, %v3162_v27 }
 0x5ab   : > { %v3200_v31 = vrot.slane %v3749_v0, %v3183_v59 }
 0x5ad   : > { %v3222_v32 = vsel %vm3209_vm15, %v3200_v31, %v3221_v30 }
 0x5ae   : > { %3223 = vst [vmem:[%s5339_s5 + $0x8] sm:$0xf] %v3222_v32 }
 0x5af PF: > { %s5340_s19 = sld [smem:[#allocation9_spill]] }
 0x5b0   : > { %s5341_s1 = sld [smem:[#allocation8_spill]] }
 0x5b1   : > { %s5342_s17 = sld [smem:[#allocation10_spill]] }
 0x5b5   : > { %s34_s18 = sadd.s32 1, %s5340_s19  }
 0x5b6   : > { %p31_p6 = scmp.ge.s32.totalorder %s34_s18, 4  }
 0x5b8   :  { %33 = sbr.rel (!%p31_p6) target bundleno = 30 (0x1e), region = 165 }

</bundles_post_ra>
